<compile_context>
chip_gen: v6e
topology: v6e:2x2x1
jax: 0.10.0
libtpu: 0.0.40
codegen_flags: <defaults>
</compile_context>

<pallas_src>
import jax
import jax.numpy as jnp
from jax.experimental import pallas as pl
from jax.experimental.pallas import tpu as pltpu


# ----------------------------------------------------------------------------
# Fused RDG kernel (one batch element per grid step)
# ----------------------------------------------------------------------------
def _make_rdg_kernel(G0, C, G, n_RDB, H, W, halo):
    HW = H * W
    Cmax = G0 + C * G
    OFFS = [(dy, dx) for dy in (-1, 0, 1) for dx in (-1, 0, 1)]

    def kernel(x_ref, cw_ref, cb_ref, lw_ref, lb_ref, fw_ref, fb_ref,
               o_ref, buf_ref):
        wpad = buf_ref.shape[1]
        # Zero only the halo lanes; the interior is fully overwritten each RDB.
        buf_ref[:, 0:halo] = jnp.zeros((Cmax, halo), jnp.float32)
        buf_ref[:, halo + HW:wpad] = jnp.zeros((Cmax, wpad - halo - HW),
                                               jnp.float32)

        # Row-wrap masks for the dx = +/-1 taps (dy out-of-image is covered by
        # the zeroed halo).  Computed once, (1, HW), broadcast over channels.
        col = jax.lax.broadcasted_iota(jnp.int32, (1, HW), 1)
        wpos = col % W
        ok_r = (wpos < (W - 1)).astype(jnp.float32)   # reading w+1 is valid
        ok_l = (wpos > 0).astype(jnp.float32)         # reading w-1 is valid

        cur_in = x_ref[...].astype(jnp.float32)       # (G0, HW) RDB input
        final_acc = jnp.zeros((G0, HW), jnp.float32)  # running final 1x1 conv

        for i in range(n_RDB):
            # RDB input occupies channels [0:G0] of the dense buffer.
            buf_ref[0:G0, halo:halo + HW] = cur_in

            for j in range(C):
                cin = G0 + j * G
                layer = i * C + j
                y = jnp.zeros((G, HW), jnp.float32)
                for t, (dy, dx) in enumerate(OFFS):
                    s = dy * W + dx
                    # Shifted tap: flat (h+dy, w+dx) pixels; halo gives the
                    # dy padding zeros, masks kill the dx row wrap-around.
                    tap = buf_ref[0:cin, halo + s:halo + s + HW]   # (cin, HW)
                    if dx == 1:
                        tap = tap * ok_r
                    elif dx == -1:
                        tap = tap * ok_l
                    wt = cw_ref[layer * 9 + t, :, 0:cin]           # (G, cin)
                    y = y + jnp.dot(wt, tap,
                                    preferred_element_type=jnp.float32)
                y = y + cb_ref[layer * G:(layer + 1) * G, :]       # (G, 1)
                y = jnp.where(y >= 0.0, y, 0.1 * y)                # LeakyReLU
                # Dense concat == write the new G channels below the old ones.
                buf_ref[cin:cin + G, halo:halo + HW] = y

            # LFF 1x1 conv over the full dense buffer + residual.
            dense = buf_ref[0:Cmax, halo:halo + HW]                # (Cmax, HW)
            lff = jnp.dot(lw_ref[i * G0:(i + 1) * G0, :], dense,
                          preferred_element_type=jnp.float32)
            lff = lff + lb_ref[i * G0:(i + 1) * G0, :]
            cur_in = lff + cur_in                                  # RDB output

            # Fold this RDB's slice of the final 1x1 conv over concat(temp).
            final_acc = final_acc + jnp.dot(
                fw_ref[i * G0:(i + 1) * G0, :], cur_in,
                preferred_element_type=jnp.float32)

        o_ref[...] = (final_acc + fb_ref[...]).astype(o_ref.dtype)

    return kernel


# ----------------------------------------------------------------------------
# Wrapper: weight packing + one pallas_call for the whole RDG
# ----------------------------------------------------------------------------
def rdg_forward(x, params):
    """x: (N, G0, H, W) NCHW (same layout as the PyTorch module)."""
    N, G0, H, W = x.shape
    rdbs = params["rdbs"]
    n_RDB = len(rdbs)
    C = len(rdbs[0]["convs"])
    G = rdbs[0]["convs"][0][0].shape[0]
    Cmax = G0 + C * G
    HW = H * W
    HALO = 128                       # lane-aligned halo (>= W+1 needed)
    WPAD = HALO + HW + HALO
    CIN_PAD = G0 + (C - 1) * G       # widest conv input; taps zero-padded to it

    # ---- pack weights/biases into a handful of 2-D/3-D slabs ---------------
    conv_w, conv_b, lff_w, lff_b = [], [], [], []
    for rdb in rdbs:
        for (w, b) in rdb["convs"]:                  # w: OIHW (G, cin, 3, 3)
            cin = w.shape[1]
            for dy in (-1, 0, 1):
                for dx in (-1, 0, 1):
                    wt = w[:, :, dy + 1, dx + 1]                     # (G, cin)
                    conv_w.append(jnp.pad(wt, ((0, 0), (0, CIN_PAD - cin))))
            conv_b.append(b.reshape(G, 1))
        lff_w.append(rdb["lff_w"])                   # (G0, Cmax)
        lff_b.append(rdb["lff_b"].reshape(G0, 1))
    conv_w = jnp.stack(conv_w, axis=0)               # (n_RDB*C*9, G, CIN_PAD)
    conv_b = jnp.concatenate(conv_b, axis=0)         # (n_RDB*C*G, 1)
    lff_w = jnp.concatenate(lff_w, axis=0)           # (n_RDB*G0, Cmax)
    lff_b = jnp.concatenate(lff_b, axis=0)           # (n_RDB*G0, 1)
    fw = params["final_w"]                           # (G0, G0*n_RDB)
    final_w = jnp.concatenate(
        [fw[:, i * G0:(i + 1) * G0] for i in range(n_RDB)], axis=0)  # (n_RDB*G0, G0)
    final_b = params["final_b"].reshape(G0, 1)

    x2 = x.reshape(N, G0, HW)                        # lane-dense, contiguous

    kernel = _make_rdg_kernel(G0, C, G, n_RDB, H, W, HALO)

    in_specs = [
        pl.BlockSpec((None, G0, HW), lambda n: (n, 0, 0)),
        pl.BlockSpec(conv_w.shape, lambda n: (0, 0, 0)),
        pl.BlockSpec(conv_b.shape, lambda n: (0, 0)),
        pl.BlockSpec(lff_w.shape, lambda n: (0, 0)),
        pl.BlockSpec(lff_b.shape, lambda n: (0, 0)),
        pl.BlockSpec(final_w.shape, lambda n: (0, 0)),
        pl.BlockSpec(final_b.shape, lambda n: (0, 0)),
    ]

    out = pl.pallas_call(
        kernel,
        out_shape=jax.ShapeDtypeStruct((N, G0, HW), x.dtype),
        grid=(N,),
        in_specs=in_specs,
        out_specs=pl.BlockSpec((None, G0, HW), lambda n: (n, 0, 0)),
        scratch_shapes=[pltpu.VMEM((Cmax, WPAD), jnp.float32)],
        compiler_params=pltpu.CompilerParams(
            dimension_semantics=("parallel",)),
    )(x2, conv_w, conv_b, lff_w, lff_b, final_w, final_b)

    return out.reshape(N, G0, H, W)


# ----------------------------------------------------------------------------
# Parameter construction (deterministic, synthetic, PyTorch OIHW layout)
# ----------------------------------------------------------------------------
def init_rdg_params(key, G0, C, G, n_RDB):
    params = {"rdbs": []}
    for _ in range(n_RDB):
        rdb = {"convs": []}
        for j in range(C):
            cin = G0 + j * G
            key, k1, k2 = jax.random.split(key, 3)
            w = jax.random.normal(k1, (G, cin, 3, 3), jnp.float32) * 0.05
            b = jax.random.normal(k2, (G,), jnp.float32) * 0.01
            rdb["convs"].append((w, b))
        key, k1, k2 = jax.random.split(key, 3)
        rdb["lff_w"] = jax.random.normal(k1, (G0, G0 + C * G), jnp.float32) * 0.05
        rdb["lff_b"] = jax.random.normal(k2, (G0,), jnp.float32) * 0.01
        params["rdbs"].append(rdb)
    key, k1, k2 = jax.random.split(key, 3)
    params["final_w"] = jax.random.normal(k1, (G0, G0 * n_RDB), jnp.float32) * 0.05
    params["final_b"] = jax.random.normal(k2, (G0,), jnp.float32) * 0.01
    return params


# ----------------------------------------------------------------------------
# Pure-JAX reference (same math, lax.conv, NCHW/OIHW like PyTorch)
# ----------------------------------------------------------------------------
def _ref_conv3x3_lrelu(x, w, b):
    y = jax.lax.conv_general_dilated(
        x, w, window_strides=(1, 1), padding="SAME",
        dimension_numbers=("NCHW", "OIHW", "NCHW"))
    y = y + b.reshape(1, -1, 1, 1)
    return jnp.where(y >= 0, y, 0.1 * y)


def _ref_conv1x1(x, w, b):
    return jnp.einsum("nchw,dc->ndhw", x, w) + b.reshape(1, -1, 1, 1)


def rdg_forward_ref(x, params):
    buffer = x
    temp = []
    for rdb_p in params["rdbs"]:
        cur = buffer
        for (w, b) in rdb_p["convs"]:
            cur = jnp.concatenate([cur, _ref_conv3x3_lrelu(cur, w, b)], axis=1)
        buffer = _ref_conv1x1(cur, rdb_p["lff_w"], rdb_p["lff_b"]) + buffer
        temp.append(buffer)
    buffer_cat = jnp.concatenate(temp, axis=1)
    return _ref_conv1x1(buffer_cat, params["final_w"], params["final_b"])


# ----------------------------------------------------------------------------
if __name__ == "__main__":
    # Config: G0=8, C=3, G=8, n_RDB=2; input NCHW (2, 8, 16, 16)
    G0, C, G, n_RDB = 8, 3, 8, 2
    N, H, W = 2, 16, 16

    key = jax.random.PRNGKey(0)
    key, kx = jax.random.split(key)
    x = jax.random.normal(kx, (N, G0, H, W), jnp.float32)
    params = init_rdg_params(key, G0, C, G, n_RDB)

    out = jax.block_until_ready(jax.jit(rdg_forward)(x, params))
    ref = jax.block_until_ready(rdg_forward_ref(x, params))

    assert out.shape == (N, G0, H, W), out.shape
    err = float(jnp.max(jnp.abs(out - ref)))
    assert jnp.allclose(out, ref, atol=2e-4, rtol=2e-4), err

    print("KERNEL_OK")
</pallas_src>

<mosaic_0001>
module attributes {stable_mosaic.version = 11 : i64} {
  func.func @kernel(%arg0: i32, %arg1: memref<1x8x256xf32, #tpu.memory_space<vmem>>, %arg2: memref<54x8x24xf32, #tpu.memory_space<vmem>>, %arg3: memref<48x1xf32, #tpu.memory_space<vmem>>, %arg4: memref<16x32xf32, #tpu.memory_space<vmem>>, %arg5: memref<16x1xf32, #tpu.memory_space<vmem>>, %arg6: memref<16x8xf32, #tpu.memory_space<vmem>>, %arg7: memref<8x1xf32, #tpu.memory_space<vmem>>, %arg8: memref<1x8x256xf32, #tpu.memory_space<vmem>>, %arg9: memref<32x512xf32, #tpu.memory_space<vmem>>) attributes {dimension_semantics = [#tpu.dimension_semantics<parallel>], iteration_bounds = array<i64: 2>, scalar_prefetch = 0 : i64, scratch_operands = 1 : i64, tpu.core_type = #tpu.core_type<tc>, window_params = [{transform_indices = @transform_0, window_bounds = array<i64: 1, 8, 256>}, {pipeline_mode = #tpu.pipeline_mode<synchronous>, transform_indices = @transform_1, window_bounds = array<i64: 54, 8, 24>}, {pipeline_mode = #tpu.pipeline_mode<synchronous>, transform_indices = @transform_2, window_bounds = array<i64: 48, 1>}, {pipeline_mode = #tpu.pipeline_mode<synchronous>, transform_indices = @transform_3, window_bounds = array<i64: 16, 32>}, {pipeline_mode = #tpu.pipeline_mode<synchronous>, transform_indices = @transform_4, window_bounds = array<i64: 16, 1>}, {pipeline_mode = #tpu.pipeline_mode<synchronous>, transform_indices = @transform_5, window_bounds = array<i64: 16, 8>}, {pipeline_mode = #tpu.pipeline_mode<synchronous>, transform_indices = @transform_6, window_bounds = array<i64: 8, 1>}, {transform_indices = @transform_7, window_bounds = array<i64: 1, 8, 256>}]} {
    %cst = arith.constant 0.000000e+00 : f32
    %0 = vector.broadcast %cst : f32 to vector<32x128xf32>
    %c0 = arith.constant 0 : index
    %c0_0 = arith.constant 0 : index
    %1 = vector.load %arg9[%c0, %c0_0] : memref<32x512xf32, #tpu.memory_space<vmem>>, vector<32x128xf32>
    tpu.vector_store %arg9[%c0, %c0_0], %0 {strides = array<i32>} : memref<32x512xf32, #tpu.memory_space<vmem>>, vector<32x128xf32>,
    %cst_1 = arith.constant 0.000000e+00 : f32
    %2 = vector.broadcast %cst_1 : f32 to vector<32x128xf32>
    %c0_2 = arith.constant 0 : index
    %c384 = arith.constant 384 : index
    %3 = vector.load %arg9[%c0_2, %c384] : memref<32x512xf32, #tpu.memory_space<vmem>>, vector<32x128xf32>
    tpu.vector_store %arg9[%c0_2, %c384], %2 {strides = array<i32>} : memref<32x512xf32, #tpu.memory_space<vmem>>, vector<32x128xf32>,
    %4 = tpu.iota {dimensions = array<i32: 1>} : vector<1x256xi32>
    %c16_i32 = arith.constant 16 : i32
    %c0_i32 = arith.constant 0 : i32
    %5 = arith.cmpi eq, %c16_i32, %c0_i32 : i32
    %c1_i32 = arith.constant 1 : i32
    %6 = arith.select %5, %c1_i32, %c16_i32 : i32
    %7 = vector.broadcast %6 : i32 to vector<1x256xi32>
    %8 = arith.remsi %4, %7 : vector<1x256xi32>
    %c0_i32_3 = arith.constant 0 : i32
    %9 = vector.broadcast %c0_i32_3 : i32 to vector<1x256xi32>
    %10 = arith.cmpi ne, %8, %9 : vector<1x256xi32>
    %c0_i32_4 = arith.constant 0 : i32
    %11 = vector.broadcast %c0_i32_4 : i32 to vector<1x256xi32>
    %12 = arith.cmpi slt, %8, %11 : vector<1x256xi32>
    %c0_i32_5 = arith.constant 0 : i32
    %13 = arith.cmpi slt, %6, %c0_i32_5 : i32
    %14 = vector.broadcast %13 : i1 to vector<1x256xi1>
    %15 = vector.broadcast %14 : vector<1x256xi1> to vector<1x256xi1>
    %16 = arith.xori %12, %15 : vector<1x256xi1>
    %17 = arith.andi %16, %10 : vector<1x256xi1>
    %18 = vector.broadcast %6 : i32 to vector<1x256xi32>
    %19 = arith.addi %8, %18 : vector<1x256xi32>
    %20 = arith.select %17, %19, %8 : vector<1x256xi1>, vector<1x256xi32>
    %c15_i32 = arith.constant 15 : i32
    %21 = vector.broadcast %c15_i32 : i32 to vector<1x256xi32>
    %22 = arith.cmpi slt, %20, %21 : vector<1x256xi32>
    %23 = arith.extui %22 : vector<1x256xi1> to vector<1x256xi32>
    %24 = arith.sitofp %23 : vector<1x256xi32> to vector<1x256xf32>
    %c0_i32_6 = arith.constant 0 : i32
    %25 = vector.broadcast %c0_i32_6 : i32 to vector<1x256xi32>
    %26 = arith.cmpi sgt, %20, %25 : vector<1x256xi32>
    %27 = arith.extui %26 : vector<1x256xi1> to vector<1x256xi32>
    %28 = arith.sitofp %27 : vector<1x256xi32> to vector<1x256xf32>
    %c0_7 = arith.constant 0 : index
    %c0_8 = arith.constant 0 : index
    %c0_9 = arith.constant 0 : index
    %29 = vector.load %arg1[%c0_7, %c0_8, %c0_9] : memref<1x8x256xf32, #tpu.memory_space<vmem>>, vector<1x8x256xf32>
    %30 = vector.shape_cast %29 : vector<1x8x256xf32> to vector<8x256xf32>
    %cst_10 = arith.constant 0.000000e+00 : f32
    %31 = vector.broadcast %cst_10 : f32 to vector<8x256xf32>
    %c0_11 = arith.constant 0 : index
    %c128 = arith.constant 128 : index
    %32 = vector.load %arg9[%c0_11, %c128] : memref<32x512xf32, #tpu.memory_space<vmem>>, vector<8x256xf32>
    tpu.vector_store %arg9[%c0_11, %c128], %30 {strides = array<i32>} : memref<32x512xf32, #tpu.memory_space<vmem>>, vector<8x256xf32>,
    %cst_12 = arith.constant 0.000000e+00 : f32
    %33 = vector.broadcast %cst_12 : f32 to vector<8x256xf32>
    %c0_13 = arith.constant 0 : index
    %c111 = arith.constant 111 : index
    %34 = vector.load %arg9[%c0_13, %c111] : memref<32x512xf32, #tpu.memory_space<vmem>>, vector<8x256xf32>
    %35 = vector.broadcast %28 : vector<1x256xf32> to vector<8x256xf32>
    %36 = arith.mulf %34, %35 : vector<8x256xf32>
    %c0_14 = arith.constant 0 : index
    %c0_15 = arith.constant 0 : index
    %c0_16 = arith.constant 0 : index
    %37 = vector.load %arg2[%c0_14, %c0_15, %c0_16] : memref<54x8x24xf32, #tpu.memory_space<vmem>>, vector<1x8x8xf32>
    %38 = vector.shape_cast %37 : vector<1x8x8xf32> to vector<8x8xf32>
    %cst_17 = arith.constant dense<0.000000e+00> : vector<8x256xf32>
    %39 = tpu.matmul %38, %36, %cst_17 {dimension_numbers = #tpu.dot_dimension_numbers<[1], [0], [0], [1], [0, 0, 1, 1], [], []>} : vector<8x8xf32>, vector<8x256xf32>, vector<8x256xf32> -> vector<8x256xf32>
    %40 = arith.addf %33, %39 : vector<8x256xf32>
    %c0_18 = arith.constant 0 : index
    %c112 = arith.constant 112 : index
    %41 = vector.load %arg9[%c0_18, %c112] : memref<32x512xf32, #tpu.memory_space<vmem>>, vector<8x256xf32>
    %c1 = arith.constant 1 : index
    %c0_19 = arith.constant 0 : index
    %c0_20 = arith.constant 0 : index
    %42 = vector.load %arg2[%c1, %c0_19, %c0_20] : memref<54x8x24xf32, #tpu.memory_space<vmem>>, vector<1x8x8xf32>
    %43 = vector.shape_cast %42 : vector<1x8x8xf32> to vector<8x8xf32>
    %cst_21 = arith.constant dense<0.000000e+00> : vector<8x256xf32>
    %44 = tpu.matmul %43, %41, %cst_21 {dimension_numbers = #tpu.dot_dimension_numbers<[1], [0], [0], [1], [0, 0, 1, 1], [], []>} : vector<8x8xf32>, vector<8x256xf32>, vector<8x256xf32> -> vector<8x256xf32>
    %45 = arith.addf %40, %44 : vector<8x256xf32>
    %c0_22 = arith.constant 0 : index
    %c113 = arith.constant 113 : index
    %46 = vector.load %arg9[%c0_22, %c113] : memref<32x512xf32, #tpu.memory_space<vmem>>, vector<8x256xf32>
    %47 = vector.broadcast %24 : vector<1x256xf32> to vector<8x256xf32>
    %48 = arith.mulf %46, %47 : vector<8x256xf32>
    %c2 = arith.constant 2 : index
    %c0_23 = arith.constant 0 : index
    %c0_24 = arith.constant 0 : index
    %49 = vector.load %arg2[%c2, %c0_23, %c0_24] : memref<54x8x24xf32, #tpu.memory_space<vmem>>, vector<1x8x8xf32>
    %50 = vector.shape_cast %49 : vector<1x8x8xf32> to vector<8x8xf32>
    %cst_25 = arith.constant dense<0.000000e+00> : vector<8x256xf32>
    %51 = tpu.matmul %50, %48, %cst_25 {dimension_numbers = #tpu.dot_dimension_numbers<[1], [0], [0], [1], [0, 0, 1, 1], [], []>} : vector<8x8xf32>, vector<8x256xf32>, vector<8x256xf32> -> vector<8x256xf32>
    %52 = arith.addf %45, %51 : vector<8x256xf32>
    %c0_26 = arith.constant 0 : index
    %c127 = arith.constant 127 : index
    %53 = vector.load %arg9[%c0_26, %c127] : memref<32x512xf32, #tpu.memory_space<vmem>>, vector<8x256xf32>
    %54 = vector.broadcast %28 : vector<1x256xf32> to vector<8x256xf32>
    %55 = arith.mulf %53, %54 : vector<8x256xf32>
    %c3 = arith.constant 3 : index
    %c0_27 = arith.constant 0 : index
    %c0_28 = arith.constant 0 : index
    %56 = vector.load %arg2[%c3, %c0_27, %c0_28] : memref<54x8x24xf32, #tpu.memory_space<vmem>>, vector<1x8x8xf32>
    %57 = vector.shape_cast %56 : vector<1x8x8xf32> to vector<8x8xf32>
    %cst_29 = arith.constant dense<0.000000e+00> : vector<8x256xf32>
    %58 = tpu.matmul %57, %55, %cst_29 {dimension_numbers = #tpu.dot_dimension_numbers<[1], [0], [0], [1], [0, 0, 1, 1], [], []>} : vector<8x8xf32>, vector<8x256xf32>, vector<8x256xf32> -> vector<8x256xf32>
    %59 = arith.addf %52, %58 : vector<8x256xf32>
    %c0_30 = arith.constant 0 : index
    %c128_31 = arith.constant 128 : index
    %60 = vector.load %arg9[%c0_30, %c128_31] : memref<32x512xf32, #tpu.memory_space<vmem>>, vector<8x256xf32>
    %c4 = arith.constant 4 : index
    %c0_32 = arith.constant 0 : index
    %c0_33 = arith.constant 0 : index
    %61 = vector.load %arg2[%c4, %c0_32, %c0_33] : memref<54x8x24xf32, #tpu.memory_space<vmem>>, vector<1x8x8xf32>
    %62 = vector.shape_cast %61 : vector<1x8x8xf32> to vector<8x8xf32>
    %cst_34 = arith.constant dense<0.000000e+00> : vector<8x256xf32>
    %63 = tpu.matmul %62, %60, %cst_34 {dimension_numbers = #tpu.dot_dimension_numbers<[1], [0], [0], [1], [0, 0, 1, 1], [], []>} : vector<8x8xf32>, vector<8x256xf32>, vector<8x256xf32> -> vector<8x256xf32>
    %64 = arith.addf %59, %63 : vector<8x256xf32>
    %c0_35 = arith.constant 0 : index
    %c129 = arith.constant 129 : index
    %65 = vector.load %arg9[%c0_35, %c129] : memref<32x512xf32, #tpu.memory_space<vmem>>, vector<8x256xf32>
    %66 = vector.broadcast %24 : vector<1x256xf32> to vector<8x256xf32>
    %67 = arith.mulf %65, %66 : vector<8x256xf32>
    %c5 = arith.constant 5 : index
    %c0_36 = arith.constant 0 : index
    %c0_37 = arith.constant 0 : index
    %68 = vector.load %arg2[%c5, %c0_36, %c0_37] : memref<54x8x24xf32, #tpu.memory_space<vmem>>, vector<1x8x8xf32>
    %69 = vector.shape_cast %68 : vector<1x8x8xf32> to vector<8x8xf32>
    %cst_38 = arith.constant dense<0.000000e+00> : vector<8x256xf32>
    %70 = tpu.matmul %69, %67, %cst_38 {dimension_numbers = #tpu.dot_dimension_numbers<[1], [0], [0], [1], [0, 0, 1, 1], [], []>} : vector<8x8xf32>, vector<8x256xf32>, vector<8x256xf32> -> vector<8x256xf32>
    %71 = arith.addf %64, %70 : vector<8x256xf32>
    %c0_39 = arith.constant 0 : index
    %c143 = arith.constant 143 : index
    %72 = vector.load %arg9[%c0_39, %c143] : memref<32x512xf32, #tpu.memory_space<vmem>>, vector<8x256xf32>
    %73 = vector.broadcast %28 : vector<1x256xf32> to vector<8x256xf32>
    %74 = arith.mulf %72, %73 : vector<8x256xf32>
    %c6 = arith.constant 6 : index
    %c0_40 = arith.constant 0 : index
    %c0_41 = arith.constant 0 : index
    %75 = vector.load %arg2[%c6, %c0_40, %c0_41] : memref<54x8x24xf32, #tpu.memory_space<vmem>>, vector<1x8x8xf32>
    %76 = vector.shape_cast %75 : vector<1x8x8xf32> to vector<8x8xf32>
    %cst_42 = arith.constant dense<0.000000e+00> : vector<8x256xf32>
    %77 = tpu.matmul %76, %74, %cst_42 {dimension_numbers = #tpu.dot_dimension_numbers<[1], [0], [0], [1], [0, 0, 1, 1], [], []>} : vector<8x8xf32>, vector<8x256xf32>, vector<8x256xf32> -> vector<8x256xf32>
    %78 = arith.addf %71, %77 : vector<8x256xf32>
    %c0_43 = arith.constant 0 : index
    %c144 = arith.constant 144 : index
    %79 = vector.load %arg9[%c0_43, %c144] : memref<32x512xf32, #tpu.memory_space<vmem>>, vector<8x256xf32>
    %c7 = arith.constant 7 : index
    %c0_44 = arith.constant 0 : index
    %c0_45 = arith.constant 0 : index
    %80 = vector.load %arg2[%c7, %c0_44, %c0_45] : memref<54x8x24xf32, #tpu.memory_space<vmem>>, vector<1x8x8xf32>
    %81 = vector.shape_cast %80 : vector<1x8x8xf32> to vector<8x8xf32>
    %cst_46 = arith.constant dense<0.000000e+00> : vector<8x256xf32>
    %82 = tpu.matmul %81, %79, %cst_46 {dimension_numbers = #tpu.dot_dimension_numbers<[1], [0], [0], [1], [0, 0, 1, 1], [], []>} : vector<8x8xf32>, vector<8x256xf32>, vector<8x256xf32> -> vector<8x256xf32>
    %83 = arith.addf %78, %82 : vector<8x256xf32>
    %c0_47 = arith.constant 0 : index
    %c145 = arith.constant 145 : index
    %84 = vector.load %arg9[%c0_47, %c145] : memref<32x512xf32, #tpu.memory_space<vmem>>, vector<8x256xf32>
    %85 = vector.broadcast %24 : vector<1x256xf32> to vector<8x256xf32>
    %86 = arith.mulf %84, %85 : vector<8x256xf32>
    %c8 = arith.constant 8 : index
    %c0_48 = arith.constant 0 : index
    %c0_49 = arith.constant 0 : index
    %87 = vector.load %arg2[%c8, %c0_48, %c0_49] : memref<54x8x24xf32, #tpu.memory_space<vmem>>, vector<1x8x8xf32>
    %88 = vector.shape_cast %87 : vector<1x8x8xf32> to vector<8x8xf32>
    %cst_50 = arith.constant dense<0.000000e+00> : vector<8x256xf32>
    %89 = tpu.matmul %88, %86, %cst_50 {dimension_numbers = #tpu.dot_dimension_numbers<[1], [0], [0], [1], [0, 0, 1, 1], [], []>} : vector<8x8xf32>, vector<8x256xf32>, vector<8x256xf32> -> vector<8x256xf32>
    %90 = arith.addf %83, %89 : vector<8x256xf32>
    %c0_51 = arith.constant 0 : index
    %c0_52 = arith.constant 0 : index
    %91 = vector.load %arg3[%c0_51, %c0_52] : memref<48x1xf32, #tpu.memory_space<vmem>>, vector<8x1xf32>
    %92 = vector.broadcast %91 : vector<8x1xf32> to vector<8x256xf32>
    %93 = arith.addf %90, %92 : vector<8x256xf32>
    %cst_53 = arith.constant 0.000000e+00 : f32
    %94 = vector.broadcast %cst_53 : f32 to vector<8x256xf32>
    %95 = arith.cmpf oge, %93, %94 : vector<8x256xf32>
    %cst_54 = arith.constant 1.000000e-01 : f32
    %96 = vector.broadcast %cst_54 : f32 to vector<8x256xf32>
    %97 = arith.mulf %96, %93 : vector<8x256xf32>
    %98 = arith.select %95, %93, %97 : vector<8x256xi1>, vector<8x256xf32>
    %c8_55 = arith.constant 8 : index
    %c128_56 = arith.constant 128 : index
    %99 = vector.load %arg9[%c8_55, %c128_56] : memref<32x512xf32, #tpu.memory_space<vmem>>, vector<8x256xf32>
    tpu.vector_store %arg9[%c8_55, %c128_56], %98 {strides = array<i32>} : memref<32x512xf32, #tpu.memory_space<vmem>>, vector<8x256xf32>,
    %cst_57 = arith.constant 0.000000e+00 : f32
    %100 = vector.broadcast %cst_57 : f32 to vector<8x256xf32>
    %c0_58 = arith.constant 0 : index
    %c111_59 = arith.constant 111 : index
    %101 = vector.load %arg9[%c0_58, %c111_59] : memref<32x512xf32, #tpu.memory_space<vmem>>, vector<16x256xf32>
    %102 = vector.broadcast %28 : vector<1x256xf32> to vector<16x256xf32>
    %103 = arith.mulf %101, %102 : vector<16x256xf32>
    %c9 = arith.constant 9 : index
    %c0_60 = arith.constant 0 : index
    %c0_61 = arith.constant 0 : index
    %104 = vector.load %arg2[%c9, %c0_60, %c0_61] : memref<54x8x24xf32, #tpu.memory_space<vmem>>, vector<1x8x16xf32>
    %105 = vector.shape_cast %104 : vector<1x8x16xf32> to vector<8x16xf32>
    %cst_62 = arith.constant dense<0.000000e+00> : vector<8x256xf32>
    %106 = tpu.matmul %105, %103, %cst_62 {dimension_numbers = #tpu.dot_dimension_numbers<[1], [0], [0], [1], [0, 0, 1, 1], [], []>} : vector<8x16xf32>, vector<16x256xf32>, vector<8x256xf32> -> vector<8x256xf32>
    %107 = arith.addf %100, %106 : vector<8x256xf32>
    %c0_63 = arith.constant 0 : index
    %c112_64 = arith.constant 112 : index
    %108 = vector.load %arg9[%c0_63, %c112_64] : memref<32x512xf32, #tpu.memory_space<vmem>>, vector<16x256xf32>
    %c10 = arith.constant 10 : index
    %c0_65 = arith.constant 0 : index
    %c0_66 = arith.constant 0 : index
    %109 = vector.load %arg2[%c10, %c0_65, %c0_66] : memref<54x8x24xf32, #tpu.memory_space<vmem>>, vector<1x8x16xf32>
    %110 = vector.shape_cast %109 : vector<1x8x16xf32> to vector<8x16xf32>
    %cst_67 = arith.constant dense<0.000000e+00> : vector<8x256xf32>
    %111 = tpu.matmul %110, %108, %cst_67 {dimension_numbers = #tpu.dot_dimension_numbers<[1], [0], [0], [1], [0, 0, 1, 1], [], []>} : vector<8x16xf32>, vector<16x256xf32>, vector<8x256xf32> -> vector<8x256xf32>
    %112 = arith.addf %107, %111 : vector<8x256xf32>
    %c0_68 = arith.constant 0 : index
    %c113_69 = arith.constant 113 : index
    %113 = vector.load %arg9[%c0_68, %c113_69] : memref<32x512xf32, #tpu.memory_space<vmem>>, vector<16x256xf32>
    %114 = vector.broadcast %24 : vector<1x256xf32> to vector<16x256xf32>
    %115 = arith.mulf %113, %114 : vector<16x256xf32>
    %c11 = arith.constant 11 : index
    %c0_70 = arith.constant 0 : index
    %c0_71 = arith.constant 0 : index
    %116 = vector.load %arg2[%c11, %c0_70, %c0_71] : memref<54x8x24xf32, #tpu.memory_space<vmem>>, vector<1x8x16xf32>
    %117 = vector.shape_cast %116 : vector<1x8x16xf32> to vector<8x16xf32>
    %cst_72 = arith.constant dense<0.000000e+00> : vector<8x256xf32>
    %118 = tpu.matmul %117, %115, %cst_72 {dimension_numbers = #tpu.dot_dimension_numbers<[1], [0], [0], [1], [0, 0, 1, 1], [], []>} : vector<8x16xf32>, vector<16x256xf32>, vector<8x256xf32> -> vector<8x256xf32>
    %119 = arith.addf %112, %118 : vector<8x256xf32>
    %c0_73 = arith.constant 0 : index
    %c127_74 = arith.constant 127 : index
    %120 = vector.load %arg9[%c0_73, %c127_74] : memref<32x512xf32, #tpu.memory_space<vmem>>, vector<16x256xf32>
    %121 = vector.broadcast %28 : vector<1x256xf32> to vector<16x256xf32>
    %122 = arith.mulf %120, %121 : vector<16x256xf32>
    %c12 = arith.constant 12 : index
    %c0_75 = arith.constant 0 : index
    %c0_76 = arith.constant 0 : index
    %123 = vector.load %arg2[%c12, %c0_75, %c0_76] : memref<54x8x24xf32, #tpu.memory_space<vmem>>, vector<1x8x16xf32>
    %124 = vector.shape_cast %123 : vector<1x8x16xf32> to vector<8x16xf32>
    %cst_77 = arith.constant dense<0.000000e+00> : vector<8x256xf32>
    %125 = tpu.matmul %124, %122, %cst_77 {dimension_numbers = #tpu.dot_dimension_numbers<[1], [0], [0], [1], [0, 0, 1, 1], [], []>} : vector<8x16xf32>, vector<16x256xf32>, vector<8x256xf32> -> vector<8x256xf32>
    %126 = arith.addf %119, %125 : vector<8x256xf32>
    %c0_78 = arith.constant 0 : index
    %c128_79 = arith.constant 128 : index
    %127 = vector.load %arg9[%c0_78, %c128_79] : memref<32x512xf32, #tpu.memory_space<vmem>>, vector<16x256xf32>
    %c13 = arith.constant 13 : index
    %c0_80 = arith.constant 0 : index
    %c0_81 = arith.constant 0 : index
    %128 = vector.load %arg2[%c13, %c0_80, %c0_81] : memref<54x8x24xf32, #tpu.memory_space<vmem>>, vector<1x8x16xf32>
    %129 = vector.shape_cast %128 : vector<1x8x16xf32> to vector<8x16xf32>
    %cst_82 = arith.constant dense<0.000000e+00> : vector<8x256xf32>
    %130 = tpu.matmul %129, %127, %cst_82 {dimension_numbers = #tpu.dot_dimension_numbers<[1], [0], [0], [1], [0, 0, 1, 1], [], []>} : vector<8x16xf32>, vector<16x256xf32>, vector<8x256xf32> -> vector<8x256xf32>
    %131 = arith.addf %126, %130 : vector<8x256xf32>
    %c0_83 = arith.constant 0 : index
    %c129_84 = arith.constant 129 : index
    %132 = vector.load %arg9[%c0_83, %c129_84] : memref<32x512xf32, #tpu.memory_space<vmem>>, vector<16x256xf32>
    %133 = vector.broadcast %24 : vector<1x256xf32> to vector<16x256xf32>
    %134 = arith.mulf %132, %133 : vector<16x256xf32>
    %c14 = arith.constant 14 : index
    %c0_85 = arith.constant 0 : index
    %c0_86 = arith.constant 0 : index
    %135 = vector.load %arg2[%c14, %c0_85, %c0_86] : memref<54x8x24xf32, #tpu.memory_space<vmem>>, vector<1x8x16xf32>
    %136 = vector.shape_cast %135 : vector<1x8x16xf32> to vector<8x16xf32>
    %cst_87 = arith.constant dense<0.000000e+00> : vector<8x256xf32>
    %137 = tpu.matmul %136, %134, %cst_87 {dimension_numbers = #tpu.dot_dimension_numbers<[1], [0], [0], [1], [0, 0, 1, 1], [], []>} : vector<8x16xf32>, vector<16x256xf32>, vector<8x256xf32> -> vector<8x256xf32>
    %138 = arith.addf %131, %137 : vector<8x256xf32>
    %c0_88 = arith.constant 0 : index
    %c143_89 = arith.constant 143 : index
    %139 = vector.load %arg9[%c0_88, %c143_89] : memref<32x512xf32, #tpu.memory_space<vmem>>, vector<16x256xf32>
    %140 = vector.broadcast %28 : vector<1x256xf32> to vector<16x256xf32>
    %141 = arith.mulf %139, %140 : vector<16x256xf32>
    %c15 = arith.constant 15 : index
    %c0_90 = arith.constant 0 : index
    %c0_91 = arith.constant 0 : index
    %142 = vector.load %arg2[%c15, %c0_90, %c0_91] : memref<54x8x24xf32, #tpu.memory_space<vmem>>, vector<1x8x16xf32>
    %143 = vector.shape_cast %142 : vector<1x8x16xf32> to vector<8x16xf32>
    %cst_92 = arith.constant dense<0.000000e+00> : vector<8x256xf32>
    %144 = tpu.matmul %143, %141, %cst_92 {dimension_numbers = #tpu.dot_dimension_numbers<[1], [0], [0], [1], [0, 0, 1, 1], [], []>} : vector<8x16xf32>, vector<16x256xf32>, vector<8x256xf32> -> vector<8x256xf32>
    %145 = arith.addf %138, %144 : vector<8x256xf32>
    %c0_93 = arith.constant 0 : index
    %c144_94 = arith.constant 144 : index
    %146 = vector.load %arg9[%c0_93, %c144_94] : memref<32x512xf32, #tpu.memory_space<vmem>>, vector<16x256xf32>
    %c16 = arith.constant 16 : index
    %c0_95 = arith.constant 0 : index
    %c0_96 = arith.constant 0 : index
    %147 = vector.load %arg2[%c16, %c0_95, %c0_96] : memref<54x8x24xf32, #tpu.memory_space<vmem>>, vector<1x8x16xf32>
    %148 = vector.shape_cast %147 : vector<1x8x16xf32> to vector<8x16xf32>
    %cst_97 = arith.constant dense<0.000000e+00> : vector<8x256xf32>
    %149 = tpu.matmul %148, %146, %cst_97 {dimension_numbers = #tpu.dot_dimension_numbers<[1], [0], [0], [1], [0, 0, 1, 1], [], []>} : vector<8x16xf32>, vector<16x256xf32>, vector<8x256xf32> -> vector<8x256xf32>
    %150 = arith.addf %145, %149 : vector<8x256xf32>
    %c0_98 = arith.constant 0 : index
    %c145_99 = arith.constant 145 : index
    %151 = vector.load %arg9[%c0_98, %c145_99] : memref<32x512xf32, #tpu.memory_space<vmem>>, vector<16x256xf32>
    %152 = vector.broadcast %24 : vector<1x256xf32> to vector<16x256xf32>
    %153 = arith.mulf %151, %152 : vector<16x256xf32>
    %c17 = arith.constant 17 : index
    %c0_100 = arith.constant 0 : index
    %c0_101 = arith.constant 0 : index
    %154 = vector.load %arg2[%c17, %c0_100, %c0_101] : memref<54x8x24xf32, #tpu.memory_space<vmem>>, vector<1x8x16xf32>
    %155 = vector.shape_cast %154 : vector<1x8x16xf32> to vector<8x16xf32>
    %cst_102 = arith.constant dense<0.000000e+00> : vector<8x256xf32>
    %156 = tpu.matmul %155, %153, %cst_102 {dimension_numbers = #tpu.dot_dimension_numbers<[1], [0], [0], [1], [0, 0, 1, 1], [], []>} : vector<8x16xf32>, vector<16x256xf32>, vector<8x256xf32> -> vector<8x256xf32>
    %157 = arith.addf %150, %156 : vector<8x256xf32>
    %c8_103 = arith.constant 8 : index
    %c0_104 = arith.constant 0 : index
    %158 = vector.load %arg3[%c8_103, %c0_104] : memref<48x1xf32, #tpu.memory_space<vmem>>, vector<8x1xf32>
    %159 = vector.broadcast %158 : vector<8x1xf32> to vector<8x256xf32>
    %160 = arith.addf %157, %159 : vector<8x256xf32>
    %cst_105 = arith.constant 0.000000e+00 : f32
    %161 = vector.broadcast %cst_105 : f32 to vector<8x256xf32>
    %162 = arith.cmpf oge, %160, %161 : vector<8x256xf32>
    %cst_106 = arith.constant 1.000000e-01 : f32
    %163 = vector.broadcast %cst_106 : f32 to vector<8x256xf32>
    %164 = arith.mulf %163, %160 : vector<8x256xf32>
    %165 = arith.select %162, %160, %164 : vector<8x256xi1>, vector<8x256xf32>
    %c16_107 = arith.constant 16 : index
    %c128_108 = arith.constant 128 : index
    %166 = vector.load %arg9[%c16_107, %c128_108] : memref<32x512xf32, #tpu.memory_space<vmem>>, vector<8x256xf32>
    tpu.vector_store %arg9[%c16_107, %c128_108], %165 {strides = array<i32>} : memref<32x512xf32, #tpu.memory_space<vmem>>, vector<8x256xf32>,
    %cst_109 = arith.constant 0.000000e+00 : f32
    %167 = vector.broadcast %cst_109 : f32 to vector<8x256xf32>
    %c0_110 = arith.constant 0 : index
    %c111_111 = arith.constant 111 : index
    %168 = vector.load %arg9[%c0_110, %c111_111] : memref<32x512xf32, #tpu.memory_space<vmem>>, vector<24x256xf32>
    %169 = vector.broadcast %28 : vector<1x256xf32> to vector<24x256xf32>
    %170 = arith.mulf %168, %169 : vector<24x256xf32>
    %c18 = arith.constant 18 : index
    %c0_112 = arith.constant 0 : index
    %c0_113 = arith.constant 0 : index
    %171 = vector.load %arg2[%c18, %c0_112, %c0_113] : memref<54x8x24xf32, #tpu.memory_space<vmem>>, vector<1x8x24xf32>
    %172 = vector.shape_cast %171 : vector<1x8x24xf32> to vector<8x24xf32>
    %cst_114 = arith.constant dense<0.000000e+00> : vector<8x256xf32>
    %173 = tpu.matmul %172, %170, %cst_114 {dimension_numbers = #tpu.dot_dimension_numbers<[1], [0], [0], [1], [0, 0, 1, 1], [], []>} : vector<8x24xf32>, vector<24x256xf32>, vector<8x256xf32> -> vector<8x256xf32>
    %174 = arith.addf %167, %173 : vector<8x256xf32>
    %c0_115 = arith.constant 0 : index
    %c112_116 = arith.constant 112 : index
    %175 = vector.load %arg9[%c0_115, %c112_116] : memref<32x512xf32, #tpu.memory_space<vmem>>, vector<24x256xf32>
    %c19 = arith.constant 19 : index
    %c0_117 = arith.constant 0 : index
    %c0_118 = arith.constant 0 : index
    %176 = vector.load %arg2[%c19, %c0_117, %c0_118] : memref<54x8x24xf32, #tpu.memory_space<vmem>>, vector<1x8x24xf32>
    %177 = vector.shape_cast %176 : vector<1x8x24xf32> to vector<8x24xf32>
    %cst_119 = arith.constant dense<0.000000e+00> : vector<8x256xf32>
    %178 = tpu.matmul %177, %175, %cst_119 {dimension_numbers = #tpu.dot_dimension_numbers<[1], [0], [0], [1], [0, 0, 1, 1], [], []>} : vector<8x24xf32>, vector<24x256xf32>, vector<8x256xf32> -> vector<8x256xf32>
    %179 = arith.addf %174, %178 : vector<8x256xf32>
    %c0_120 = arith.constant 0 : index
    %c113_121 = arith.constant 113 : index
    %180 = vector.load %arg9[%c0_120, %c113_121] : memref<32x512xf32, #tpu.memory_space<vmem>>, vector<24x256xf32>
    %181 = vector.broadcast %24 : vector<1x256xf32> to vector<24x256xf32>
    %182 = arith.mulf %180, %181 : vector<24x256xf32>
    %c20 = arith.constant 20 : index
    %c0_122 = arith.constant 0 : index
    %c0_123 = arith.constant 0 : index
    %183 = vector.load %arg2[%c20, %c0_122, %c0_123] : memref<54x8x24xf32, #tpu.memory_space<vmem>>, vector<1x8x24xf32>
    %184 = vector.shape_cast %183 : vector<1x8x24xf32> to vector<8x24xf32>
    %cst_124 = arith.constant dense<0.000000e+00> : vector<8x256xf32>
    %185 = tpu.matmul %184, %182, %cst_124 {dimension_numbers = #tpu.dot_dimension_numbers<[1], [0], [0], [1], [0, 0, 1, 1], [], []>} : vector<8x24xf32>, vector<24x256xf32>, vector<8x256xf32> -> vector<8x256xf32>
    %186 = arith.addf %179, %185 : vector<8x256xf32>
    %c0_125 = arith.constant 0 : index
    %c127_126 = arith.constant 127 : index
    %187 = vector.load %arg9[%c0_125, %c127_126] : memref<32x512xf32, #tpu.memory_space<vmem>>, vector<24x256xf32>
    %188 = vector.broadcast %28 : vector<1x256xf32> to vector<24x256xf32>
    %189 = arith.mulf %187, %188 : vector<24x256xf32>
    %c21 = arith.constant 21 : index
    %c0_127 = arith.constant 0 : index
    %c0_128 = arith.constant 0 : index
    %190 = vector.load %arg2[%c21, %c0_127, %c0_128] : memref<54x8x24xf32, #tpu.memory_space<vmem>>, vector<1x8x24xf32>
    %191 = vector.shape_cast %190 : vector<1x8x24xf32> to vector<8x24xf32>
    %cst_129 = arith.constant dense<0.000000e+00> : vector<8x256xf32>
    %192 = tpu.matmul %191, %189, %cst_129 {dimension_numbers = #tpu.dot_dimension_numbers<[1], [0], [0], [1], [0, 0, 1, 1], [], []>} : vector<8x24xf32>, vector<24x256xf32>, vector<8x256xf32> -> vector<8x256xf32>
    %193 = arith.addf %186, %192 : vector<8x256xf32>
    %c0_130 = arith.constant 0 : index
    %c128_131 = arith.constant 128 : index
    %194 = vector.load %arg9[%c0_130, %c128_131] : memref<32x512xf32, #tpu.memory_space<vmem>>, vector<24x256xf32>
    %c22 = arith.constant 22 : index
    %c0_132 = arith.constant 0 : index
    %c0_133 = arith.constant 0 : index
    %195 = vector.load %arg2[%c22, %c0_132, %c0_133] : memref<54x8x24xf32, #tpu.memory_space<vmem>>, vector<1x8x24xf32>
    %196 = vector.shape_cast %195 : vector<1x8x24xf32> to vector<8x24xf32>
    %cst_134 = arith.constant dense<0.000000e+00> : vector<8x256xf32>
    %197 = tpu.matmul %196, %194, %cst_134 {dimension_numbers = #tpu.dot_dimension_numbers<[1], [0], [0], [1], [0, 0, 1, 1], [], []>} : vector<8x24xf32>, vector<24x256xf32>, vector<8x256xf32> -> vector<8x256xf32>
    %198 = arith.addf %193, %197 : vector<8x256xf32>
    %c0_135 = arith.constant 0 : index
    %c129_136 = arith.constant 129 : index
    %199 = vector.load %arg9[%c0_135, %c129_136] : memref<32x512xf32, #tpu.memory_space<vmem>>, vector<24x256xf32>
    %200 = vector.broadcast %24 : vector<1x256xf32> to vector<24x256xf32>
    %201 = arith.mulf %199, %200 : vector<24x256xf32>
    %c23 = arith.constant 23 : index
    %c0_137 = arith.constant 0 : index
    %c0_138 = arith.constant 0 : index
    %202 = vector.load %arg2[%c23, %c0_137, %c0_138] : memref<54x8x24xf32, #tpu.memory_space<vmem>>, vector<1x8x24xf32>
    %203 = vector.shape_cast %202 : vector<1x8x24xf32> to vector<8x24xf32>
    %cst_139 = arith.constant dense<0.000000e+00> : vector<8x256xf32>
    %204 = tpu.matmul %203, %201, %cst_139 {dimension_numbers = #tpu.dot_dimension_numbers<[1], [0], [0], [1], [0, 0, 1, 1], [], []>} : vector<8x24xf32>, vector<24x256xf32>, vector<8x256xf32> -> vector<8x256xf32>
    %205 = arith.addf %198, %204 : vector<8x256xf32>
    %c0_140 = arith.constant 0 : index
    %c143_141 = arith.constant 143 : index
    %206 = vector.load %arg9[%c0_140, %c143_141] : memref<32x512xf32, #tpu.memory_space<vmem>>, vector<24x256xf32>
    %207 = vector.broadcast %28 : vector<1x256xf32> to vector<24x256xf32>
    %208 = arith.mulf %206, %207 : vector<24x256xf32>
    %c24 = arith.constant 24 : index
    %c0_142 = arith.constant 0 : index
    %c0_143 = arith.constant 0 : index
    %209 = vector.load %arg2[%c24, %c0_142, %c0_143] : memref<54x8x24xf32, #tpu.memory_space<vmem>>, vector<1x8x24xf32>
    %210 = vector.shape_cast %209 : vector<1x8x24xf32> to vector<8x24xf32>
    %cst_144 = arith.constant dense<0.000000e+00> : vector<8x256xf32>
    %211 = tpu.matmul %210, %208, %cst_144 {dimension_numbers = #tpu.dot_dimension_numbers<[1], [0], [0], [1], [0, 0, 1, 1], [], []>} : vector<8x24xf32>, vector<24x256xf32>, vector<8x256xf32> -> vector<8x256xf32>
    %212 = arith.addf %205, %211 : vector<8x256xf32>
    %c0_145 = arith.constant 0 : index
    %c144_146 = arith.constant 144 : index
    %213 = vector.load %arg9[%c0_145, %c144_146] : memref<32x512xf32, #tpu.memory_space<vmem>>, vector<24x256xf32>
    %c25 = arith.constant 25 : index
    %c0_147 = arith.constant 0 : index
    %c0_148 = arith.constant 0 : index
    %214 = vector.load %arg2[%c25, %c0_147, %c0_148] : memref<54x8x24xf32, #tpu.memory_space<vmem>>, vector<1x8x24xf32>
    %215 = vector.shape_cast %214 : vector<1x8x24xf32> to vector<8x24xf32>
    %cst_149 = arith.constant dense<0.000000e+00> : vector<8x256xf32>
    %216 = tpu.matmul %215, %213, %cst_149 {dimension_numbers = #tpu.dot_dimension_numbers<[1], [0], [0], [1], [0, 0, 1, 1], [], []>} : vector<8x24xf32>, vector<24x256xf32>, vector<8x256xf32> -> vector<8x256xf32>
    %217 = arith.addf %212, %216 : vector<8x256xf32>
    %c0_150 = arith.constant 0 : index
    %c145_151 = arith.constant 145 : index
    %218 = vector.load %arg9[%c0_150, %c145_151] : memref<32x512xf32, #tpu.memory_space<vmem>>, vector<24x256xf32>
    %219 = vector.broadcast %24 : vector<1x256xf32> to vector<24x256xf32>
    %220 = arith.mulf %218, %219 : vector<24x256xf32>
    %c26 = arith.constant 26 : index
    %c0_152 = arith.constant 0 : index
    %c0_153 = arith.constant 0 : index
    %221 = vector.load %arg2[%c26, %c0_152, %c0_153] : memref<54x8x24xf32, #tpu.memory_space<vmem>>, vector<1x8x24xf32>
    %222 = vector.shape_cast %221 : vector<1x8x24xf32> to vector<8x24xf32>
    %cst_154 = arith.constant dense<0.000000e+00> : vector<8x256xf32>
    %223 = tpu.matmul %222, %220, %cst_154 {dimension_numbers = #tpu.dot_dimension_numbers<[1], [0], [0], [1], [0, 0, 1, 1], [], []>} : vector<8x24xf32>, vector<24x256xf32>, vector<8x256xf32> -> vector<8x256xf32>
    %224 = arith.addf %217, %223 : vector<8x256xf32>
    %c16_155 = arith.constant 16 : index
    %c0_156 = arith.constant 0 : index
    %225 = vector.load %arg3[%c16_155, %c0_156] : memref<48x1xf32, #tpu.memory_space<vmem>>, vector<8x1xf32>
    %226 = vector.broadcast %225 : vector<8x1xf32> to vector<8x256xf32>
    %227 = arith.addf %224, %226 : vector<8x256xf32>
    %cst_157 = arith.constant 0.000000e+00 : f32
    %228 = vector.broadcast %cst_157 : f32 to vector<8x256xf32>
    %229 = arith.cmpf oge, %227, %228 : vector<8x256xf32>
    %cst_158 = arith.constant 1.000000e-01 : f32
    %230 = vector.broadcast %cst_158 : f32 to vector<8x256xf32>
    %231 = arith.mulf %230, %227 : vector<8x256xf32>
    %232 = arith.select %229, %227, %231 : vector<8x256xi1>, vector<8x256xf32>
    %c24_159 = arith.constant 24 : index
    %c128_160 = arith.constant 128 : index
    %233 = vector.load %arg9[%c24_159, %c128_160] : memref<32x512xf32, #tpu.memory_space<vmem>>, vector<8x256xf32>
    tpu.vector_store %arg9[%c24_159, %c128_160], %232 {strides = array<i32>} : memref<32x512xf32, #tpu.memory_space<vmem>>, vector<8x256xf32>,
    %c0_161 = arith.constant 0 : index
    %c128_162 = arith.constant 128 : index
    %234 = vector.load %arg9[%c0_161, %c128_162] : memref<32x512xf32, #tpu.memory_space<vmem>>, vector<32x256xf32>
    %c0_163 = arith.constant 0 : index
    %c0_164 = arith.constant 0 : index
    %235 = vector.load %arg4[%c0_163, %c0_164] : memref<16x32xf32, #tpu.memory_space<vmem>>, vector<8x32xf32>
    %cst_165 = arith.constant dense<0.000000e+00> : vector<8x256xf32>
    %236 = tpu.matmul %235, %234, %cst_165 {dimension_numbers = #tpu.dot_dimension_numbers<[1], [0], [0], [1], [0, 0, 1, 1], [], []>} : vector<8x32xf32>, vector<32x256xf32>, vector<8x256xf32> -> vector<8x256xf32>
    %c0_166 = arith.constant 0 : index
    %c0_167 = arith.constant 0 : index
    %237 = vector.load %arg5[%c0_166, %c0_167] : memref<16x1xf32, #tpu.memory_space<vmem>>, vector<8x1xf32>
    %238 = vector.broadcast %237 : vector<8x1xf32> to vector<8x256xf32>
    %239 = arith.addf %236, %238 : vector<8x256xf32>
    %240 = arith.addf %239, %30 : vector<8x256xf32>
    %c0_168 = arith.constant 0 : index
    %c0_169 = arith.constant 0 : index
    %241 = vector.load %arg6[%c0_168, %c0_169] : memref<16x8xf32, #tpu.memory_space<vmem>>, vector<8x8xf32>
    %cst_170 = arith.constant dense<0.000000e+00> : vector<8x256xf32>
    %242 = tpu.matmul %241, %240, %cst_170 {dimension_numbers = #tpu.dot_dimension_numbers<[1], [0], [0], [1], [0, 0, 1, 1], [], []>} : vector<8x8xf32>, vector<8x256xf32>, vector<8x256xf32> -> vector<8x256xf32>
    %243 = arith.addf %31, %242 : vector<8x256xf32>
    %c0_171 = arith.constant 0 : index
    %c128_172 = arith.constant 128 : index
    %244 = vector.load %arg9[%c0_171, %c128_172] : memref<32x512xf32, #tpu.memory_space<vmem>>, vector<8x256xf32>
    tpu.vector_store %arg9[%c0_171, %c128_172], %240 {strides = array<i32>} : memref<32x512xf32, #tpu.memory_space<vmem>>, vector<8x256xf32>,
    %cst_173 = arith.constant 0.000000e+00 : f32
    %245 = vector.broadcast %cst_173 : f32 to vector<8x256xf32>
    %c0_174 = arith.constant 0 : index
    %c111_175 = arith.constant 111 : index
    %246 = vector.load %arg9[%c0_174, %c111_175] : memref<32x512xf32, #tpu.memory_space<vmem>>, vector<8x256xf32>
    %247 = vector.broadcast %28 : vector<1x256xf32> to vector<8x256xf32>
    %248 = arith.mulf %246, %247 : vector<8x256xf32>
    %c27 = arith.constant 27 : index
    %c0_176 = arith.constant 0 : index
    %c0_177 = arith.constant 0 : index
    %249 = vector.load %arg2[%c27, %c0_176, %c0_177] : memref<54x8x24xf32, #tpu.memory_space<vmem>>, vector<1x8x8xf32>
    %250 = vector.shape_cast %249 : vector<1x8x8xf32> to vector<8x8xf32>
    %cst_178 = arith.constant dense<0.000000e+00> : vector<8x256xf32>
    %251 = tpu.matmul %250, %248, %cst_178 {dimension_numbers = #tpu.dot_dimension_numbers<[1], [0], [0], [1], [0, 0, 1, 1], [], []>} : vector<8x8xf32>, vector<8x256xf32>, vector<8x256xf32> -> vector<8x256xf32>
    %252 = arith.addf %245, %251 : vector<8x256xf32>
    %c0_179 = arith.constant 0 : index
    %c112_180 = arith.constant 112 : index
    %253 = vector.load %arg9[%c0_179, %c112_180] : memref<32x512xf32, #tpu.memory_space<vmem>>, vector<8x256xf32>
    %c28 = arith.constant 28 : index
    %c0_181 = arith.constant 0 : index
    %c0_182 = arith.constant 0 : index
    %254 = vector.load %arg2[%c28, %c0_181, %c0_182] : memref<54x8x24xf32, #tpu.memory_space<vmem>>, vector<1x8x8xf32>
    %255 = vector.shape_cast %254 : vector<1x8x8xf32> to vector<8x8xf32>
    %cst_183 = arith.constant dense<0.000000e+00> : vector<8x256xf32>
    %256 = tpu.matmul %255, %253, %cst_183 {dimension_numbers = #tpu.dot_dimension_numbers<[1], [0], [0], [1], [0, 0, 1, 1], [], []>} : vector<8x8xf32>, vector<8x256xf32>, vector<8x256xf32> -> vector<8x256xf32>
    %257 = arith.addf %252, %256 : vector<8x256xf32>
    %c0_184 = arith.constant 0 : index
    %c113_185 = arith.constant 113 : index
    %258 = vector.load %arg9[%c0_184, %c113_185] : memref<32x512xf32, #tpu.memory_space<vmem>>, vector<8x256xf32>
    %259 = vector.broadcast %24 : vector<1x256xf32> to vector<8x256xf32>
    %260 = arith.mulf %258, %259 : vector<8x256xf32>
    %c29 = arith.constant 29 : index
    %c0_186 = arith.constant 0 : index
    %c0_187 = arith.constant 0 : index
    %261 = vector.load %arg2[%c29, %c0_186, %c0_187] : memref<54x8x24xf32, #tpu.memory_space<vmem>>, vector<1x8x8xf32>
    %262 = vector.shape_cast %261 : vector<1x8x8xf32> to vector<8x8xf32>
    %cst_188 = arith.constant dense<0.000000e+00> : vector<8x256xf32>
    %263 = tpu.matmul %262, %260, %cst_188 {dimension_numbers = #tpu.dot_dimension_numbers<[1], [0], [0], [1], [0, 0, 1, 1], [], []>} : vector<8x8xf32>, vector<8x256xf32>, vector<8x256xf32> -> vector<8x256xf32>
    %264 = arith.addf %257, %263 : vector<8x256xf32>
    %c0_189 = arith.constant 0 : index
    %c127_190 = arith.constant 127 : index
    %265 = vector.load %arg9[%c0_189, %c127_190] : memref<32x512xf32, #tpu.memory_space<vmem>>, vector<8x256xf32>
    %266 = vector.broadcast %28 : vector<1x256xf32> to vector<8x256xf32>
    %267 = arith.mulf %265, %266 : vector<8x256xf32>
    %c30 = arith.constant 30 : index
    %c0_191 = arith.constant 0 : index
    %c0_192 = arith.constant 0 : index
    %268 = vector.load %arg2[%c30, %c0_191, %c0_192] : memref<54x8x24xf32, #tpu.memory_space<vmem>>, vector<1x8x8xf32>
    %269 = vector.shape_cast %268 : vector<1x8x8xf32> to vector<8x8xf32>
    %cst_193 = arith.constant dense<0.000000e+00> : vector<8x256xf32>
    %270 = tpu.matmul %269, %267, %cst_193 {dimension_numbers = #tpu.dot_dimension_numbers<[1], [0], [0], [1], [0, 0, 1, 1], [], []>} : vector<8x8xf32>, vector<8x256xf32>, vector<8x256xf32> -> vector<8x256xf32>
    %271 = arith.addf %264, %270 : vector<8x256xf32>
    %c0_194 = arith.constant 0 : index
    %c128_195 = arith.constant 128 : index
    %272 = vector.load %arg9[%c0_194, %c128_195] : memref<32x512xf32, #tpu.memory_space<vmem>>, vector<8x256xf32>
    %c31 = arith.constant 31 : index
    %c0_196 = arith.constant 0 : index
    %c0_197 = arith.constant 0 : index
    %273 = vector.load %arg2[%c31, %c0_196, %c0_197] : memref<54x8x24xf32, #tpu.memory_space<vmem>>, vector<1x8x8xf32>
    %274 = vector.shape_cast %273 : vector<1x8x8xf32> to vector<8x8xf32>
    %cst_198 = arith.constant dense<0.000000e+00> : vector<8x256xf32>
    %275 = tpu.matmul %274, %272, %cst_198 {dimension_numbers = #tpu.dot_dimension_numbers<[1], [0], [0], [1], [0, 0, 1, 1], [], []>} : vector<8x8xf32>, vector<8x256xf32>, vector<8x256xf32> -> vector<8x256xf32>
    %276 = arith.addf %271, %275 : vector<8x256xf32>
    %c0_199 = arith.constant 0 : index
    %c129_200 = arith.constant 129 : index
    %277 = vector.load %arg9[%c0_199, %c129_200] : memref<32x512xf32, #tpu.memory_space<vmem>>, vector<8x256xf32>
    %278 = vector.broadcast %24 : vector<1x256xf32> to vector<8x256xf32>
    %279 = arith.mulf %277, %278 : vector<8x256xf32>
    %c32 = arith.constant 32 : index
    %c0_201 = arith.constant 0 : index
    %c0_202 = arith.constant 0 : index
    %280 = vector.load %arg2[%c32, %c0_201, %c0_202] : memref<54x8x24xf32, #tpu.memory_space<vmem>>, vector<1x8x8xf32>
    %281 = vector.shape_cast %280 : vector<1x8x8xf32> to vector<8x8xf32>
    %cst_203 = arith.constant dense<0.000000e+00> : vector<8x256xf32>
    %282 = tpu.matmul %281, %279, %cst_203 {dimension_numbers = #tpu.dot_dimension_numbers<[1], [0], [0], [1], [0, 0, 1, 1], [], []>} : vector<8x8xf32>, vector<8x256xf32>, vector<8x256xf32> -> vector<8x256xf32>
    %283 = arith.addf %276, %282 : vector<8x256xf32>
    %c0_204 = arith.constant 0 : index
    %c143_205 = arith.constant 143 : index
    %284 = vector.load %arg9[%c0_204, %c143_205] : memref<32x512xf32, #tpu.memory_space<vmem>>, vector<8x256xf32>
    %285 = vector.broadcast %28 : vector<1x256xf32> to vector<8x256xf32>
    %286 = arith.mulf %284, %285 : vector<8x256xf32>
    %c33 = arith.constant 33 : index
    %c0_206 = arith.constant 0 : index
    %c0_207 = arith.constant 0 : index
    %287 = vector.load %arg2[%c33, %c0_206, %c0_207] : memref<54x8x24xf32, #tpu.memory_space<vmem>>, vector<1x8x8xf32>
    %288 = vector.shape_cast %287 : vector<1x8x8xf32> to vector<8x8xf32>
    %cst_208 = arith.constant dense<0.000000e+00> : vector<8x256xf32>
    %289 = tpu.matmul %288, %286, %cst_208 {dimension_numbers = #tpu.dot_dimension_numbers<[1], [0], [0], [1], [0, 0, 1, 1], [], []>} : vector<8x8xf32>, vector<8x256xf32>, vector<8x256xf32> -> vector<8x256xf32>
    %290 = arith.addf %283, %289 : vector<8x256xf32>
    %c0_209 = arith.constant 0 : index
    %c144_210 = arith.constant 144 : index
    %291 = vector.load %arg9[%c0_209, %c144_210] : memref<32x512xf32, #tpu.memory_space<vmem>>, vector<8x256xf32>
    %c34 = arith.constant 34 : index
    %c0_211 = arith.constant 0 : index
    %c0_212 = arith.constant 0 : index
    %292 = vector.load %arg2[%c34, %c0_211, %c0_212] : memref<54x8x24xf32, #tpu.memory_space<vmem>>, vector<1x8x8xf32>
    %293 = vector.shape_cast %292 : vector<1x8x8xf32> to vector<8x8xf32>
    %cst_213 = arith.constant dense<0.000000e+00> : vector<8x256xf32>
    %294 = tpu.matmul %293, %291, %cst_213 {dimension_numbers = #tpu.dot_dimension_numbers<[1], [0], [0], [1], [0, 0, 1, 1], [], []>} : vector<8x8xf32>, vector<8x256xf32>, vector<8x256xf32> -> vector<8x256xf32>
    %295 = arith.addf %290, %294 : vector<8x256xf32>
    %c0_214 = arith.constant 0 : index
    %c145_215 = arith.constant 145 : index
    %296 = vector.load %arg9[%c0_214, %c145_215] : memref<32x512xf32, #tpu.memory_space<vmem>>, vector<8x256xf32>
    %297 = vector.broadcast %24 : vector<1x256xf32> to vector<8x256xf32>
    %298 = arith.mulf %296, %297 : vector<8x256xf32>
    %c35 = arith.constant 35 : index
    %c0_216 = arith.constant 0 : index
    %c0_217 = arith.constant 0 : index
    %299 = vector.load %arg2[%c35, %c0_216, %c0_217] : memref<54x8x24xf32, #tpu.memory_space<vmem>>, vector<1x8x8xf32>
    %300 = vector.shape_cast %299 : vector<1x8x8xf32> to vector<8x8xf32>
    %cst_218 = arith.constant dense<0.000000e+00> : vector<8x256xf32>
    %301 = tpu.matmul %300, %298, %cst_218 {dimension_numbers = #tpu.dot_dimension_numbers<[1], [0], [0], [1], [0, 0, 1, 1], [], []>} : vector<8x8xf32>, vector<8x256xf32>, vector<8x256xf32> -> vector<8x256xf32>
    %302 = arith.addf %295, %301 : vector<8x256xf32>
    %c24_219 = arith.constant 24 : index
    %c0_220 = arith.constant 0 : index
    %303 = vector.load %arg3[%c24_219, %c0_220] : memref<48x1xf32, #tpu.memory_space<vmem>>, vector<8x1xf32>
    %304 = vector.broadcast %303 : vector<8x1xf32> to vector<8x256xf32>
    %305 = arith.addf %302, %304 : vector<8x256xf32>
    %cst_221 = arith.constant 0.000000e+00 : f32
    %306 = vector.broadcast %cst_221 : f32 to vector<8x256xf32>
    %307 = arith.cmpf oge, %305, %306 : vector<8x256xf32>
    %cst_222 = arith.constant 1.000000e-01 : f32
    %308 = vector.broadcast %cst_222 : f32 to vector<8x256xf32>
    %309 = arith.mulf %308, %305 : vector<8x256xf32>
    %310 = arith.select %307, %305, %309 : vector<8x256xi1>, vector<8x256xf32>
    %c8_223 = arith.constant 8 : index
    %c128_224 = arith.constant 128 : index
    %311 = vector.load %arg9[%c8_223, %c128_224] : memref<32x512xf32, #tpu.memory_space<vmem>>, vector<8x256xf32>
    tpu.vector_store %arg9[%c8_223, %c128_224], %310 {strides = array<i32>} : memref<32x512xf32, #tpu.memory_space<vmem>>, vector<8x256xf32>,
    %cst_225 = arith.constant 0.000000e+00 : f32
    %312 = vector.broadcast %cst_225 : f32 to vector<8x256xf32>
    %c0_226 = arith.constant 0 : index
    %c111_227 = arith.constant 111 : index
    %313 = vector.load %arg9[%c0_226, %c111_227] : memref<32x512xf32, #tpu.memory_space<vmem>>, vector<16x256xf32>
    %314 = vector.broadcast %28 : vector<1x256xf32> to vector<16x256xf32>
    %315 = arith.mulf %313, %314 : vector<16x256xf32>
    %c36 = arith.constant 36 : index
    %c0_228 = arith.constant 0 : index
    %c0_229 = arith.constant 0 : index
    %316 = vector.load %arg2[%c36, %c0_228, %c0_229] : memref<54x8x24xf32, #tpu.memory_space<vmem>>, vector<1x8x16xf32>
    %317 = vector.shape_cast %316 : vector<1x8x16xf32> to vector<8x16xf32>
    %cst_230 = arith.constant dense<0.000000e+00> : vector<8x256xf32>
    %318 = tpu.matmul %317, %315, %cst_230 {dimension_numbers = #tpu.dot_dimension_numbers<[1], [0], [0], [1], [0, 0, 1, 1], [], []>} : vector<8x16xf32>, vector<16x256xf32>, vector<8x256xf32> -> vector<8x256xf32>
    %319 = arith.addf %312, %318 : vector<8x256xf32>
    %c0_231 = arith.constant 0 : index
    %c112_232 = arith.constant 112 : index
    %320 = vector.load %arg9[%c0_231, %c112_232] : memref<32x512xf32, #tpu.memory_space<vmem>>, vector<16x256xf32>
    %c37 = arith.constant 37 : index
    %c0_233 = arith.constant 0 : index
    %c0_234 = arith.constant 0 : index
    %321 = vector.load %arg2[%c37, %c0_233, %c0_234] : memref<54x8x24xf32, #tpu.memory_space<vmem>>, vector<1x8x16xf32>
    %322 = vector.shape_cast %321 : vector<1x8x16xf32> to vector<8x16xf32>
    %cst_235 = arith.constant dense<0.000000e+00> : vector<8x256xf32>
    %323 = tpu.matmul %322, %320, %cst_235 {dimension_numbers = #tpu.dot_dimension_numbers<[1], [0], [0], [1], [0, 0, 1, 1], [], []>} : vector<8x16xf32>, vector<16x256xf32>, vector<8x256xf32> -> vector<8x256xf32>
    %324 = arith.addf %319, %323 : vector<8x256xf32>
    %c0_236 = arith.constant 0 : index
    %c113_237 = arith.constant 113 : index
    %325 = vector.load %arg9[%c0_236, %c113_237] : memref<32x512xf32, #tpu.memory_space<vmem>>, vector<16x256xf32>
    %326 = vector.broadcast %24 : vector<1x256xf32> to vector<16x256xf32>
    %327 = arith.mulf %325, %326 : vector<16x256xf32>
    %c38 = arith.constant 38 : index
    %c0_238 = arith.constant 0 : index
    %c0_239 = arith.constant 0 : index
    %328 = vector.load %arg2[%c38, %c0_238, %c0_239] : memref<54x8x24xf32, #tpu.memory_space<vmem>>, vector<1x8x16xf32>
    %329 = vector.shape_cast %328 : vector<1x8x16xf32> to vector<8x16xf32>
    %cst_240 = arith.constant dense<0.000000e+00> : vector<8x256xf32>
    %330 = tpu.matmul %329, %327, %cst_240 {dimension_numbers = #tpu.dot_dimension_numbers<[1], [0], [0], [1], [0, 0, 1, 1], [], []>} : vector<8x16xf32>, vector<16x256xf32>, vector<8x256xf32> -> vector<8x256xf32>
    %331 = arith.addf %324, %330 : vector<8x256xf32>
    %c0_241 = arith.constant 0 : index
    %c127_242 = arith.constant 127 : index
    %332 = vector.load %arg9[%c0_241, %c127_242] : memref<32x512xf32, #tpu.memory_space<vmem>>, vector<16x256xf32>
    %333 = vector.broadcast %28 : vector<1x256xf32> to vector<16x256xf32>
    %334 = arith.mulf %332, %333 : vector<16x256xf32>
    %c39 = arith.constant 39 : index
    %c0_243 = arith.constant 0 : index
    %c0_244 = arith.constant 0 : index
    %335 = vector.load %arg2[%c39, %c0_243, %c0_244] : memref<54x8x24xf32, #tpu.memory_space<vmem>>, vector<1x8x16xf32>
    %336 = vector.shape_cast %335 : vector<1x8x16xf32> to vector<8x16xf32>
    %cst_245 = arith.constant dense<0.000000e+00> : vector<8x256xf32>
    %337 = tpu.matmul %336, %334, %cst_245 {dimension_numbers = #tpu.dot_dimension_numbers<[1], [0], [0], [1], [0, 0, 1, 1], [], []>} : vector<8x16xf32>, vector<16x256xf32>, vector<8x256xf32> -> vector<8x256xf32>
    %338 = arith.addf %331, %337 : vector<8x256xf32>
    %c0_246 = arith.constant 0 : index
    %c128_247 = arith.constant 128 : index
    %339 = vector.load %arg9[%c0_246, %c128_247] : memref<32x512xf32, #tpu.memory_space<vmem>>, vector<16x256xf32>
    %c40 = arith.constant 40 : index
    %c0_248 = arith.constant 0 : index
    %c0_249 = arith.constant 0 : index
    %340 = vector.load %arg2[%c40, %c0_248, %c0_249] : memref<54x8x24xf32, #tpu.memory_space<vmem>>, vector<1x8x16xf32>
    %341 = vector.shape_cast %340 : vector<1x8x16xf32> to vector<8x16xf32>
    %cst_250 = arith.constant dense<0.000000e+00> : vector<8x256xf32>
    %342 = tpu.matmul %341, %339, %cst_250 {dimension_numbers = #tpu.dot_dimension_numbers<[1], [0], [0], [1], [0, 0, 1, 1], [], []>} : vector<8x16xf32>, vector<16x256xf32>, vector<8x256xf32> -> vector<8x256xf32>
    %343 = arith.addf %338, %342 : vector<8x256xf32>
    %c0_251 = arith.constant 0 : index
    %c129_252 = arith.constant 129 : index
    %344 = vector.load %arg9[%c0_251, %c129_252] : memref<32x512xf32, #tpu.memory_space<vmem>>, vector<16x256xf32>
    %345 = vector.broadcast %24 : vector<1x256xf32> to vector<16x256xf32>
    %346 = arith.mulf %344, %345 : vector<16x256xf32>
    %c41 = arith.constant 41 : index
    %c0_253 = arith.constant 0 : index
    %c0_254 = arith.constant 0 : index
    %347 = vector.load %arg2[%c41, %c0_253, %c0_254] : memref<54x8x24xf32, #tpu.memory_space<vmem>>, vector<1x8x16xf32>
    %348 = vector.shape_cast %347 : vector<1x8x16xf32> to vector<8x16xf32>
    %cst_255 = arith.constant dense<0.000000e+00> : vector<8x256xf32>
    %349 = tpu.matmul %348, %346, %cst_255 {dimension_numbers = #tpu.dot_dimension_numbers<[1], [0], [0], [1], [0, 0, 1, 1], [], []>} : vector<8x16xf32>, vector<16x256xf32>, vector<8x256xf32> -> vector<8x256xf32>
    %350 = arith.addf %343, %349 : vector<8x256xf32>
    %c0_256 = arith.constant 0 : index
    %c143_257 = arith.constant 143 : index
    %351 = vector.load %arg9[%c0_256, %c143_257] : memref<32x512xf32, #tpu.memory_space<vmem>>, vector<16x256xf32>
    %352 = vector.broadcast %28 : vector<1x256xf32> to vector<16x256xf32>
    %353 = arith.mulf %351, %352 : vector<16x256xf32>
    %c42 = arith.constant 42 : index
    %c0_258 = arith.constant 0 : index
    %c0_259 = arith.constant 0 : index
    %354 = vector.load %arg2[%c42, %c0_258, %c0_259] : memref<54x8x24xf32, #tpu.memory_space<vmem>>, vector<1x8x16xf32>
    %355 = vector.shape_cast %354 : vector<1x8x16xf32> to vector<8x16xf32>
    %cst_260 = arith.constant dense<0.000000e+00> : vector<8x256xf32>
    %356 = tpu.matmul %355, %353, %cst_260 {dimension_numbers = #tpu.dot_dimension_numbers<[1], [0], [0], [1], [0, 0, 1, 1], [], []>} : vector<8x16xf32>, vector<16x256xf32>, vector<8x256xf32> -> vector<8x256xf32>
    %357 = arith.addf %350, %356 : vector<8x256xf32>
    %c0_261 = arith.constant 0 : index
    %c144_262 = arith.constant 144 : index
    %358 = vector.load %arg9[%c0_261, %c144_262] : memref<32x512xf32, #tpu.memory_space<vmem>>, vector<16x256xf32>
    %c43 = arith.constant 43 : index
    %c0_263 = arith.constant 0 : index
    %c0_264 = arith.constant 0 : index
    %359 = vector.load %arg2[%c43, %c0_263, %c0_264] : memref<54x8x24xf32, #tpu.memory_space<vmem>>, vector<1x8x16xf32>
    %360 = vector.shape_cast %359 : vector<1x8x16xf32> to vector<8x16xf32>
    %cst_265 = arith.constant dense<0.000000e+00> : vector<8x256xf32>
    %361 = tpu.matmul %360, %358, %cst_265 {dimension_numbers = #tpu.dot_dimension_numbers<[1], [0], [0], [1], [0, 0, 1, 1], [], []>} : vector<8x16xf32>, vector<16x256xf32>, vector<8x256xf32> -> vector<8x256xf32>
    %362 = arith.addf %357, %361 : vector<8x256xf32>
    %c0_266 = arith.constant 0 : index
    %c145_267 = arith.constant 145 : index
    %363 = vector.load %arg9[%c0_266, %c145_267] : memref<32x512xf32, #tpu.memory_space<vmem>>, vector<16x256xf32>
    %364 = vector.broadcast %24 : vector<1x256xf32> to vector<16x256xf32>
    %365 = arith.mulf %363, %364 : vector<16x256xf32>
    %c44 = arith.constant 44 : index
    %c0_268 = arith.constant 0 : index
    %c0_269 = arith.constant 0 : index
    %366 = vector.load %arg2[%c44, %c0_268, %c0_269] : memref<54x8x24xf32, #tpu.memory_space<vmem>>, vector<1x8x16xf32>
    %367 = vector.shape_cast %366 : vector<1x8x16xf32> to vector<8x16xf32>
    %cst_270 = arith.constant dense<0.000000e+00> : vector<8x256xf32>
    %368 = tpu.matmul %367, %365, %cst_270 {dimension_numbers = #tpu.dot_dimension_numbers<[1], [0], [0], [1], [0, 0, 1, 1], [], []>} : vector<8x16xf32>, vector<16x256xf32>, vector<8x256xf32> -> vector<8x256xf32>
    %369 = arith.addf %362, %368 : vector<8x256xf32>
    %c32_271 = arith.constant 32 : index
    %c0_272 = arith.constant 0 : index
    %370 = vector.load %arg3[%c32_271, %c0_272] : memref<48x1xf32, #tpu.memory_space<vmem>>, vector<8x1xf32>
    %371 = vector.broadcast %370 : vector<8x1xf32> to vector<8x256xf32>
    %372 = arith.addf %369, %371 : vector<8x256xf32>
    %cst_273 = arith.constant 0.000000e+00 : f32
    %373 = vector.broadcast %cst_273 : f32 to vector<8x256xf32>
    %374 = arith.cmpf oge, %372, %373 : vector<8x256xf32>
    %cst_274 = arith.constant 1.000000e-01 : f32
    %375 = vector.broadcast %cst_274 : f32 to vector<8x256xf32>
    %376 = arith.mulf %375, %372 : vector<8x256xf32>
    %377 = arith.select %374, %372, %376 : vector<8x256xi1>, vector<8x256xf32>
    %c16_275 = arith.constant 16 : index
    %c128_276 = arith.constant 128 : index
    %378 = vector.load %arg9[%c16_275, %c128_276] : memref<32x512xf32, #tpu.memory_space<vmem>>, vector<8x256xf32>
    tpu.vector_store %arg9[%c16_275, %c128_276], %377 {strides = array<i32>} : memref<32x512xf32, #tpu.memory_space<vmem>>, vector<8x256xf32>,
    %cst_277 = arith.constant 0.000000e+00 : f32
    %379 = vector.broadcast %cst_277 : f32 to vector<8x256xf32>
    %c0_278 = arith.constant 0 : index
    %c111_279 = arith.constant 111 : index
    %380 = vector.load %arg9[%c0_278, %c111_279] : memref<32x512xf32, #tpu.memory_space<vmem>>, vector<24x256xf32>
    %381 = vector.broadcast %28 : vector<1x256xf32> to vector<24x256xf32>
    %382 = arith.mulf %380, %381 : vector<24x256xf32>
    %c45 = arith.constant 45 : index
    %c0_280 = arith.constant 0 : index
    %c0_281 = arith.constant 0 : index
    %383 = vector.load %arg2[%c45, %c0_280, %c0_281] : memref<54x8x24xf32, #tpu.memory_space<vmem>>, vector<1x8x24xf32>
    %384 = vector.shape_cast %383 : vector<1x8x24xf32> to vector<8x24xf32>
    %cst_282 = arith.constant dense<0.000000e+00> : vector<8x256xf32>
    %385 = tpu.matmul %384, %382, %cst_282 {dimension_numbers = #tpu.dot_dimension_numbers<[1], [0], [0], [1], [0, 0, 1, 1], [], []>} : vector<8x24xf32>, vector<24x256xf32>, vector<8x256xf32> -> vector<8x256xf32>
    %386 = arith.addf %379, %385 : vector<8x256xf32>
    %c0_283 = arith.constant 0 : index
    %c112_284 = arith.constant 112 : index
    %387 = vector.load %arg9[%c0_283, %c112_284] : memref<32x512xf32, #tpu.memory_space<vmem>>, vector<24x256xf32>
    %c46 = arith.constant 46 : index
    %c0_285 = arith.constant 0 : index
    %c0_286 = arith.constant 0 : index
    %388 = vector.load %arg2[%c46, %c0_285, %c0_286] : memref<54x8x24xf32, #tpu.memory_space<vmem>>, vector<1x8x24xf32>
    %389 = vector.shape_cast %388 : vector<1x8x24xf32> to vector<8x24xf32>
    %cst_287 = arith.constant dense<0.000000e+00> : vector<8x256xf32>
    %390 = tpu.matmul %389, %387, %cst_287 {dimension_numbers = #tpu.dot_dimension_numbers<[1], [0], [0], [1], [0, 0, 1, 1], [], []>} : vector<8x24xf32>, vector<24x256xf32>, vector<8x256xf32> -> vector<8x256xf32>
    %391 = arith.addf %386, %390 : vector<8x256xf32>
    %c0_288 = arith.constant 0 : index
    %c113_289 = arith.constant 113 : index
    %392 = vector.load %arg9[%c0_288, %c113_289] : memref<32x512xf32, #tpu.memory_space<vmem>>, vector<24x256xf32>
    %393 = vector.broadcast %24 : vector<1x256xf32> to vector<24x256xf32>
    %394 = arith.mulf %392, %393 : vector<24x256xf32>
    %c47 = arith.constant 47 : index
    %c0_290 = arith.constant 0 : index
    %c0_291 = arith.constant 0 : index
    %395 = vector.load %arg2[%c47, %c0_290, %c0_291] : memref<54x8x24xf32, #tpu.memory_space<vmem>>, vector<1x8x24xf32>
    %396 = vector.shape_cast %395 : vector<1x8x24xf32> to vector<8x24xf32>
    %cst_292 = arith.constant dense<0.000000e+00> : vector<8x256xf32>
    %397 = tpu.matmul %396, %394, %cst_292 {dimension_numbers = #tpu.dot_dimension_numbers<[1], [0], [0], [1], [0, 0, 1, 1], [], []>} : vector<8x24xf32>, vector<24x256xf32>, vector<8x256xf32> -> vector<8x256xf32>
    %398 = arith.addf %391, %397 : vector<8x256xf32>
    %c0_293 = arith.constant 0 : index
    %c127_294 = arith.constant 127 : index
    %399 = vector.load %arg9[%c0_293, %c127_294] : memref<32x512xf32, #tpu.memory_space<vmem>>, vector<24x256xf32>
    %400 = vector.broadcast %28 : vector<1x256xf32> to vector<24x256xf32>
    %401 = arith.mulf %399, %400 : vector<24x256xf32>
    %c48 = arith.constant 48 : index
    %c0_295 = arith.constant 0 : index
    %c0_296 = arith.constant 0 : index
    %402 = vector.load %arg2[%c48, %c0_295, %c0_296] : memref<54x8x24xf32, #tpu.memory_space<vmem>>, vector<1x8x24xf32>
    %403 = vector.shape_cast %402 : vector<1x8x24xf32> to vector<8x24xf32>
    %cst_297 = arith.constant dense<0.000000e+00> : vector<8x256xf32>
    %404 = tpu.matmul %403, %401, %cst_297 {dimension_numbers = #tpu.dot_dimension_numbers<[1], [0], [0], [1], [0, 0, 1, 1], [], []>} : vector<8x24xf32>, vector<24x256xf32>, vector<8x256xf32> -> vector<8x256xf32>
    %405 = arith.addf %398, %404 : vector<8x256xf32>
    %c0_298 = arith.constant 0 : index
    %c128_299 = arith.constant 128 : index
    %406 = vector.load %arg9[%c0_298, %c128_299] : memref<32x512xf32, #tpu.memory_space<vmem>>, vector<24x256xf32>
    %c49 = arith.constant 49 : index
    %c0_300 = arith.constant 0 : index
    %c0_301 = arith.constant 0 : index
    %407 = vector.load %arg2[%c49, %c0_300, %c0_301] : memref<54x8x24xf32, #tpu.memory_space<vmem>>, vector<1x8x24xf32>
    %408 = vector.shape_cast %407 : vector<1x8x24xf32> to vector<8x24xf32>
    %cst_302 = arith.constant dense<0.000000e+00> : vector<8x256xf32>
    %409 = tpu.matmul %408, %406, %cst_302 {dimension_numbers = #tpu.dot_dimension_numbers<[1], [0], [0], [1], [0, 0, 1, 1], [], []>} : vector<8x24xf32>, vector<24x256xf32>, vector<8x256xf32> -> vector<8x256xf32>
    %410 = arith.addf %405, %409 : vector<8x256xf32>
    %c0_303 = arith.constant 0 : index
    %c129_304 = arith.constant 129 : index
    %411 = vector.load %arg9[%c0_303, %c129_304] : memref<32x512xf32, #tpu.memory_space<vmem>>, vector<24x256xf32>
    %412 = vector.broadcast %24 : vector<1x256xf32> to vector<24x256xf32>
    %413 = arith.mulf %411, %412 : vector<24x256xf32>
    %c50 = arith.constant 50 : index
    %c0_305 = arith.constant 0 : index
    %c0_306 = arith.constant 0 : index
    %414 = vector.load %arg2[%c50, %c0_305, %c0_306] : memref<54x8x24xf32, #tpu.memory_space<vmem>>, vector<1x8x24xf32>
    %415 = vector.shape_cast %414 : vector<1x8x24xf32> to vector<8x24xf32>
    %cst_307 = arith.constant dense<0.000000e+00> : vector<8x256xf32>
    %416 = tpu.matmul %415, %413, %cst_307 {dimension_numbers = #tpu.dot_dimension_numbers<[1], [0], [0], [1], [0, 0, 1, 1], [], []>} : vector<8x24xf32>, vector<24x256xf32>, vector<8x256xf32> -> vector<8x256xf32>
    %417 = arith.addf %410, %416 : vector<8x256xf32>
    %c0_308 = arith.constant 0 : index
    %c143_309 = arith.constant 143 : index
    %418 = vector.load %arg9[%c0_308, %c143_309] : memref<32x512xf32, #tpu.memory_space<vmem>>, vector<24x256xf32>
    %419 = vector.broadcast %28 : vector<1x256xf32> to vector<24x256xf32>
    %420 = arith.mulf %418, %419 : vector<24x256xf32>
    %c51 = arith.constant 51 : index
    %c0_310 = arith.constant 0 : index
    %c0_311 = arith.constant 0 : index
    %421 = vector.load %arg2[%c51, %c0_310, %c0_311] : memref<54x8x24xf32, #tpu.memory_space<vmem>>, vector<1x8x24xf32>
    %422 = vector.shape_cast %421 : vector<1x8x24xf32> to vector<8x24xf32>
    %cst_312 = arith.constant dense<0.000000e+00> : vector<8x256xf32>
    %423 = tpu.matmul %422, %420, %cst_312 {dimension_numbers = #tpu.dot_dimension_numbers<[1], [0], [0], [1], [0, 0, 1, 1], [], []>} : vector<8x24xf32>, vector<24x256xf32>, vector<8x256xf32> -> vector<8x256xf32>
    %424 = arith.addf %417, %423 : vector<8x256xf32>
    %c0_313 = arith.constant 0 : index
    %c144_314 = arith.constant 144 : index
    %425 = vector.load %arg9[%c0_313, %c144_314] : memref<32x512xf32, #tpu.memory_space<vmem>>, vector<24x256xf32>
    %c52 = arith.constant 52 : index
    %c0_315 = arith.constant 0 : index
    %c0_316 = arith.constant 0 : index
    %426 = vector.load %arg2[%c52, %c0_315, %c0_316] : memref<54x8x24xf32, #tpu.memory_space<vmem>>, vector<1x8x24xf32>
    %427 = vector.shape_cast %426 : vector<1x8x24xf32> to vector<8x24xf32>
    %cst_317 = arith.constant dense<0.000000e+00> : vector<8x256xf32>
    %428 = tpu.matmul %427, %425, %cst_317 {dimension_numbers = #tpu.dot_dimension_numbers<[1], [0], [0], [1], [0, 0, 1, 1], [], []>} : vector<8x24xf32>, vector<24x256xf32>, vector<8x256xf32> -> vector<8x256xf32>
    %429 = arith.addf %424, %428 : vector<8x256xf32>
    %c0_318 = arith.constant 0 : index
    %c145_319 = arith.constant 145 : index
    %430 = vector.load %arg9[%c0_318, %c145_319] : memref<32x512xf32, #tpu.memory_space<vmem>>, vector<24x256xf32>
    %431 = vector.broadcast %24 : vector<1x256xf32> to vector<24x256xf32>
    %432 = arith.mulf %430, %431 : vector<24x256xf32>
    %c53 = arith.constant 53 : index
    %c0_320 = arith.constant 0 : index
    %c0_321 = arith.constant 0 : index
    %433 = vector.load %arg2[%c53, %c0_320, %c0_321] : memref<54x8x24xf32, #tpu.memory_space<vmem>>, vector<1x8x24xf32>
    %434 = vector.shape_cast %433 : vector<1x8x24xf32> to vector<8x24xf32>
    %cst_322 = arith.constant dense<0.000000e+00> : vector<8x256xf32>
    %435 = tpu.matmul %434, %432, %cst_322 {dimension_numbers = #tpu.dot_dimension_numbers<[1], [0], [0], [1], [0, 0, 1, 1], [], []>} : vector<8x24xf32>, vector<24x256xf32>, vector<8x256xf32> -> vector<8x256xf32>
    %436 = arith.addf %429, %435 : vector<8x256xf32>
    %c40_323 = arith.constant 40 : index
    %c0_324 = arith.constant 0 : index
    %437 = vector.load %arg3[%c40_323, %c0_324] : memref<48x1xf32, #tpu.memory_space<vmem>>, vector<8x1xf32>
    %438 = vector.broadcast %437 : vector<8x1xf32> to vector<8x256xf32>
    %439 = arith.addf %436, %438 : vector<8x256xf32>
    %cst_325 = arith.constant 0.000000e+00 : f32
    %440 = vector.broadcast %cst_325 : f32 to vector<8x256xf32>
    %441 = arith.cmpf oge, %439, %440 : vector<8x256xf32>
    %cst_326 = arith.constant 1.000000e-01 : f32
    %442 = vector.broadcast %cst_326 : f32 to vector<8x256xf32>
    %443 = arith.mulf %442, %439 : vector<8x256xf32>
    %444 = arith.select %441, %439, %443 : vector<8x256xi1>, vector<8x256xf32>
    %c24_327 = arith.constant 24 : index
    %c128_328 = arith.constant 128 : index
    %445 = vector.load %arg9[%c24_327, %c128_328] : memref<32x512xf32, #tpu.memory_space<vmem>>, vector<8x256xf32>
    tpu.vector_store %arg9[%c24_327, %c128_328], %444 {strides = array<i32>} : memref<32x512xf32, #tpu.memory_space<vmem>>, vector<8x256xf32>,
    %c0_329 = arith.constant 0 : index
    %c128_330 = arith.constant 128 : index
    %446 = vector.load %arg9[%c0_329, %c128_330] : memref<32x512xf32, #tpu.memory_space<vmem>>, vector<32x256xf32>
    %c8_331 = arith.constant 8 : index
    %c0_332 = arith.constant 0 : index
    %447 = vector.load %arg4[%c8_331, %c0_332] : memref<16x32xf32, #tpu.memory_space<vmem>>, vector<8x32xf32>
    %cst_333 = arith.constant dense<0.000000e+00> : vector<8x256xf32>
    %448 = tpu.matmul %447, %446, %cst_333 {dimension_numbers = #tpu.dot_dimension_numbers<[1], [0], [0], [1], [0, 0, 1, 1], [], []>} : vector<8x32xf32>, vector<32x256xf32>, vector<8x256xf32> -> vector<8x256xf32>
    %c8_334 = arith.constant 8 : index
    %c0_335 = arith.constant 0 : index
    %449 = vector.load %arg5[%c8_334, %c0_335] : memref<16x1xf32, #tpu.memory_space<vmem>>, vector<8x1xf32>
    %450 = vector.broadcast %449 : vector<8x1xf32> to vector<8x256xf32>
    %451 = arith.addf %448, %450 : vector<8x256xf32>
    %452 = arith.addf %451, %240 : vector<8x256xf32>
    %c8_336 = arith.constant 8 : index
    %c0_337 = arith.constant 0 : index
    %453 = vector.load %arg6[%c8_336, %c0_337] : memref<16x8xf32, #tpu.memory_space<vmem>>, vector<8x8xf32>
    %cst_338 = arith.constant dense<0.000000e+00> : vector<8x256xf32>
    %454 = tpu.matmul %453, %452, %cst_338 {dimension_numbers = #tpu.dot_dimension_numbers<[1], [0], [0], [1], [0, 0, 1, 1], [], []>} : vector<8x8xf32>, vector<8x256xf32>, vector<8x256xf32> -> vector<8x256xf32>
    %455 = arith.addf %243, %454 : vector<8x256xf32>
    %c0_339 = arith.constant 0 : index
    %c0_340 = arith.constant 0 : index
    %456 = vector.load %arg7[%c0_339, %c0_340] : memref<8x1xf32, #tpu.memory_space<vmem>>, vector<8x1xf32>
    %457 = vector.broadcast %456 : vector<8x1xf32> to vector<8x256xf32>
    %458 = arith.addf %455, %457 : vector<8x256xf32>
    %c0_341 = arith.constant 0 : index
    %c0_342 = arith.constant 0 : index
    %c0_343 = arith.constant 0 : index
    %459 = vector.load %arg8[%c0_341, %c0_342, %c0_343] : memref<1x8x256xf32, #tpu.memory_space<vmem>>, vector<1x8x256xf32>
    %460 = vector.shape_cast %459 : vector<1x8x256xf32> to vector<8x256xf32>
    %461 = vector.shape_cast %458 : vector<8x256xf32> to vector<1x8x256xf32>
    tpu.vector_store %arg8[%c0_341, %c0_342, %c0_343], %461 {strides = array<i32>} : memref<1x8x256xf32, #tpu.memory_space<vmem>>, vector<1x8x256xf32>,
    return
  }
  func.func @transform_0(%arg0: i32) -> (i32, i32, i32) {
    %c0_i32 = arith.constant 0 : i32
    %c0_i32_0 = arith.constant 0 : i32
    %c0_i32_1 = arith.constant 0 : i32
    return %arg0, %c0_i32, %c0_i32_0 : i32, i32, i32
  }
  func.func @transform_1(%arg0: i32) -> (i32, i32, i32) {
    %c0_i32 = arith.constant 0 : i32
    %c0_i32_0 = arith.constant 0 : i32
    %c0_i32_1 = arith.constant 0 : i32
    %c0_i32_2 = arith.constant 0 : i32
    return %c0_i32, %c0_i32_0, %c0_i32_1 : i32, i32, i32
  }
  func.func @transform_2(%arg0: i32) -> (i32, i32) {
    %c0_i32 = arith.constant 0 : i32
    %c0_i32_0 = arith.constant 0 : i32
    %c0_i32_1 = arith.constant 0 : i32
    return %c0_i32, %c0_i32_0 : i32, i32
  }
  func.func @transform_3(%arg0: i32) -> (i32, i32) {
    %c0_i32 = arith.constant 0 : i32
    %c0_i32_0 = arith.constant 0 : i32
    %c0_i32_1 = arith.constant 0 : i32
    return %c0_i32, %c0_i32_0 : i32, i32
  }
  func.func @transform_4(%arg0: i32) -> (i32, i32) {
    %c0_i32 = arith.constant 0 : i32
    %c0_i32_0 = arith.constant 0 : i32
    %c0_i32_1 = arith.constant 0 : i32
    return %c0_i32, %c0_i32_0 : i32, i32
  }
  func.func @transform_5(%arg0: i32) -> (i32, i32) {
    %c0_i32 = arith.constant 0 : i32
    %c0_i32_0 = arith.constant 0 : i32
    %c0_i32_1 = arith.constant 0 : i32
    return %c0_i32, %c0_i32_0 : i32, i32
  }
  func.func @transform_6(%arg0: i32) -> (i32, i32) {
    %c0_i32 = arith.constant 0 : i32
    %c0_i32_0 = arith.constant 0 : i32
    %c0_i32_1 = arith.constant 0 : i32
    return %c0_i32, %c0_i32_0 : i32, i32
  }
  func.func @transform_7(%arg0: i32) -> (i32, i32, i32) {
    %c0_i32 = arith.constant 0 : i32
    %c0_i32_0 = arith.constant 0 : i32
    %c0_i32_1 = arith.constant 0 : i32
    return %arg0, %c0_i32, %c0_i32_0 : i32, i32, i32
  }
}

</mosaic_0001>

<bundles_post_ra>
// kernel: rdg_forward.1
= control target key start
LH: loop header
LB: loop body
LE: loop exit
PB: predicated region body
PF: predicated region fallthrough
CT: control target
= control target key end

     0   :  { %s6889_s24 = smov 0   ;;  %s8795_s0 = inlined_call_operand.vmem [shape: f32[2,8,256], index: 0, kind: input, shape index: {}]   ;;  %s8796_s1 = inlined_call_operand.vmem [shape: f32[54,8,24], index: 1, kind: input, shape index: {}]   ;;  %s8797_s2 = inlined_call_operand.vmem [shape: f32[48,1], index: 2, kind: input, shape index: {}]   ;;  %s8798_s3 = inlined_call_operand.vmem [shape: f32[16,32], index: 3, kind: input, shape index: {}]   ;;  %s8799_s4 = inlined_call_operand.vmem [shape: f32[16,1], index: 4, kind: input, shape index: {}]   ;;  %s8800_s5 = inlined_call_operand.vmem [shape: f32[16,8], index: 5, kind: input, shape index: {}]   ;;  %s8801_s6 = inlined_call_operand.vmem [shape: f32[8,1], index: 6, kind: input, shape index: {}]   ;;  %s8802_s7 = inlined_call_operand.vmem [shape: f32[2,8,256], index: 7, kind: output, shape index: {}]  }
   0x1 LB: > { %s6611_s25 = sadd.s32 4294967295, %s6837_s24   ;;  %p6615_p0 = scmp.ge.s32.totalorder %s6837_s24, 1  ;;  %s6837_s24 = sphi %s6889_s24, %s17_s24  }
   0x2   : > { %p237_p1 = scmp.lt.s32.totalorder %s6837_s24, 3 }
   0x4   : > { %p238_p2 = pnand %p6615_p0, %p237_p1 }
   0x6   : > { %241 = sbr.rel (%p238_p2) target bundleno = 2927 (0xb6f), region = 48 }
   0xb   : > { %v287_v0 = vlaneseq  ;;  %v8805_v1 = vmov 0.0   ;;  %p269_p3 = scmp.lt.s32.totalorder %s6611_s25, 1  ;;  %s6840_s26 = smov 111   ;;  %v6848_v14 = vmov 0   ;;  %vm359_vm4 = vcmask 130048   ;;  %v6624_v41 = vld [vmem:[%s8796_s1 + $0x8] sm:$0xff] }
   0xc   : > { %432 = vmatprep.mubr.f32.mxu0 %v8805_v1  ;;  %520 = vmatprep.mubr.f32.mxu1 %v8805_v1  ;;  %s6841_s27 = smov 127   ;;  %s6842_s29 = smov 113   ;;  %vm364_vm5 = vcmask 64512   ;;  %vm339_vm6 = vcmask 908288   ;;  %vm637_vm7 = vcmask 1039360   ;;  %vm533_vm8 = vcmask 924672  }
   0xd   : > { %v288_v2 = vand.u32 127, %v287_v0  ;;  %s8906_s25 = smov (!%p269_p3, %s6611_s25), 1  ;;  %s6843_s30 = smov 1   ;;  %6787 = vset.pattern.permute.xlu0 %v6848_v14  ;;  %6808 = vset.pattern.permute.xlu1 %v6848_v14  ;;  %vm656_vm9 = vcmask 7168   ;;  %vm552_vm10 = vcmask 121856   ;;  %vm448_vm11 = vcmask 138240  }
   0xe   : > { %s6737_s28 = sshll.u32 %s8906_s25, 4  ;;  %s6844_s11 = smov 15   ;;  %v1216_v63 = vld [vmem:[%s8797_s2] sm:$0xff]  ;;  %vm1033_vm12 = vcmask 916480  }
   0xf   : > { %v289_v3 = vadd.s32 128, %v288_v2  ;;  %v294_v4 = vand.u32 15, %v288_v2  ;;  %s6915_s10 = scalar_lea.vmem %s8795_s0, %s6737_s28  ;;  %s6845_s12 = smov 17  }
  0x10   : > { %v6920_v12 = vld [vmem:[%s6915_s10] sm:$0xff]  ;;  %v6923_v13 = vld [vmem:[%s6915_s10 + $0x8] sm:$0xff]  ;;  %s6846_s13 = smov 16   ;;  %s6847_s14 = smov 112  }
  0x11   : > { %v301_v5 = vand.u32 15, %v289_v3  ;;  %vm320_vm0 = vcmp.gt.s32.totalorder %v294_v4, 0  ;;  %vm314_vm1 = vcmp.lt.s32.totalorder %v294_v4, 15  ;;  %s278_s19 = scalar_lea.vmem %s8802_s7, %s6737_s28 }
  0x12   : > { %v6622_v6 = vsel %vm320_vm0, 1.0, %v8805_v1  ;;  %v6620_v8 = vsel %vm314_vm1, 1.0, %v8805_v1  ;;  %vm2263_vm1 = vcmask 195584  }
  0x13   : > { %vm321_vm2 = vcmp.gt.s32.totalorder %v301_v5, 0  ;;  %vm315_vm3 = vcmp.lt.s32.totalorder %v301_v5, 15 }
  0x14   : > { %v6623_v7 = vsel %vm321_vm2, 1.0, %v8805_v1  ;;  %v6621_v9 = vsel %vm315_vm3, 1.0, %v8805_v1 }
  0x15   : > { %v6757_v10 = vpack.i.bf16 %v6623_v7, %v6622_v6  ;;  %v6762_v11 = vpack.i.bf16 %v6621_v9, %v6620_v8 }
  0x17   : > { %6758 = vrot.lane.b32.xlu0 %v6757_v10, %s6840_s26  ;;  %6768 = vrot.lane.b32.xlu1 %v6757_v10, %s6841_s27 }
  0x1b   : > { %6763 = vrot.lane.b32.xlu0 %v6762_v11, %s6842_s29  ;;  %6773 = vrot.lane.b32.xlu1 %v6762_v11, %s6843_s30 }
  0x1f   : > { %6778 = vrot.lane.b32.xlu0 %v6757_v10, %s6844_s11  ;;  %6783 = vrot.lane.b32.xlu1 %v6762_v11, %s6845_s12 }
  0x23   : > { %355 = vrot.lane.b32.xlu0 %v6920_v12, %s6846_s13  ;;  %357 = vrot.lane.b32.xlu1 %v6923_v13, %s6846_s13 }
  0x27   : > { %353 = vrot.lane.b32.xlu0 %v8805_v1, %s6846_s13  ;;  %1031 = vrot.lane.b32.xlu1 %v8805_v1, %s6847_s14 }
  0x2b   : > { %1029 = vrot.lane.b32.xlu0 %v6923_v13, %s6847_s14 }
  0x89   : > { %v6759_v15 = vpop.permute.xlu0 %6758  ;;  %v6769_v16 = vpop.permute.xlu1 %6768 }
  0x8a   : > { %v6760_v17 = vunpack.i.l.bf16 %v6759_v15  ;;  %v6770_v18 = vunpack.i.l.bf16 %v6769_v16  ;;  %v6955_v30 = vunpack.i.h.bf16 %v6759_v15  ;;  %v6968_v36 = vunpack.i.h.bf16 %v6769_v16 }
  0x8c   : > { %v6935_v19 = vmul.f32 0.0, %v6760_v17  ;;  %v6937_v22 = vmul.f32 0.0, %v6770_v18  ;;  %8849 = vst [vmem:[#allocation8_spill] sm:$0xff] %v6955_v30  ;;  %8851 = vst [vmem:[#allocation10_spill] sm:$0xff] %v6968_v36  ;;  %v6976_v39 = vmul.f32 %v6955_v30, %v6923_v13  ;;  %v6990_v45 = vmul.f32 %v6968_v36, %v6923_v13 }
  0x8d   : > { %v6764_v20 = vpop.permute.xlu0 %6763  ;;  %v6774_v21 = vpop.permute.xlu1 %6773  ;;  %v6995_v46 = vsel %vm339_vm6, %v6760_v17, %v6955_v30  ;;  %v7010_v49 = vsel %vm637_vm7, %v6770_v18, %v6968_v36  ;;  %v347_v18 = vld [vmem:[%s8796_s1] sm:$0xff] }
  0x8e   : > { %8844 = vst [vmem:[#allocation3_spill] sm:$0xff] %v6935_v19  ;;  %8845 = vst [vmem:[#allocation4_spill] sm:$0xff] %v6937_v22  ;;  %v6765_v23 = vunpack.i.l.bf16 %v6764_v20  ;;  %442 = vrot.lane.b32.xlu1 %v6935_v19, %s6845_s12  ;;  %v6941_v24 = vunpack.i.l.bf16 %v6774_v21  ;;  %v6957_v31 = vunpack.i.h.bf16 %v6764_v20  ;;  %v6776_v37 = vunpack.i.h.bf16 %v6774_v21 }
  0x8f   : > { %8853 = vst [vmem:[#allocation12_spill] sm:$0xff] %v6995_v46  ;;  %v7006_v48 = vmul.f32 %v6995_v46, %v6920_v12  ;;  %8855 = vst [vmem:[#allocation14_spill] sm:$0xff] %v7010_v49  ;;  %v7028_v54 = vmul.f32 %v7010_v49, %v6920_v12 }
  0x90   : > { %8846 = vst [vmem:[#allocation5_spill] sm:$0xff] %v6941_v24  ;;  %v6943_v25 = vmul.f32 0.0, %v6765_v23  ;;  %v6953_v29 = vmul.f32 %v6941_v24, %v6920_v12  ;;  %8850 = vst [vmem:[#allocation9_spill] sm:$0xff] %v6957_v31  ;;  %v6972_v38 = vmul.f32 %v6957_v31, %v6923_v13  ;;  %v6986_v43 = vmul.f32 0.0, %v6776_v37 }
  0x91   : > { %v6779_v26 = vpop.permute.xlu0 %6778  ;;  %v6784_v27 = vpop.permute.xlu1 %6783  ;;  %v7014_v50 = vsel %vm533_vm8, %v6765_v23, %v6957_v31  ;;  %v7032_v55 = vsel %vm656_vm9, %v6941_v24, %v6776_v37 }
  0x92   : > { %8847 = vst [vmem:[#allocation6_spill] sm:$0xff] %v6943_v25  ;;  %v6945_v28 = vunpack.i.l.bf16 %v6779_v26  ;;  %650 = vrot.lane.b32.xlu1 %v6937_v22, %s6843_s30  ;;  %546 = vrot.lane.b32.xlu0 %v6943_v25, %s6844_s11  ;;  %8852 = vst [vmem:[#allocation11_spill] sm:$0xff] %v6986_v43  ;;  %v6781_v44 = vunpack.i.h.bf16 %v6779_v26  ;;  %v6786_v51 = vunpack.i.h.bf16 %v6784_v27  ;;  %v7020_v52 = vunpack.i.l.bf16 %v6784_v27 }
  0x93   : > { %v7024_v53 = vmul.f32 %v7014_v50, %v6920_v12  ;;  %8857 = vst [vmem:[#allocation16_spill] sm:$0xff] %v7032_v55  ;;  %v7048_v58 = vmul.f32 %v7032_v55, %v6923_v13 }
  0x94   : > { %8848 = vst [vmem:[#allocation7_spill] sm:$0xff] %v6945_v28  ;;  %v6961_v32 = vmul.f32 %v6945_v28, %v6920_v12  ;;  %v7002_v47 = vmul.f32 0.0, %v6781_v44  ;;  %8856 = vst [vmem:[#allocation15_spill] sm:$0xff] %v7020_v52  ;;  %v7036_v56 = vsel %vm552_vm10, %v6945_v28, %v6781_v44  ;;  %v7044_v57 = vsel %vm448_vm11, %v7020_v52, %v6786_v51 }
  0x95   : > { %v356_v33 = vpop.permute.xlu0 %355  ;;  %v358_v34 = vpop.permute.xlu1 %357  ;;  %8858 = vst [vmem:[#allocation17_spill] sm:$0xff] %v7036_v56  ;;  %8859 = vst [vmem:[#allocation18_spill] sm:$0xff] %v7044_v57  ;;  %v7052_v59 = vmul.f32 %v7036_v56, %v6923_v13  ;;  %v7060_v60 = vmul.f32 %v7044_v57, %v6923_v13  ;;  %v7066_v61 = vmul.f32 0.0, %v6786_v51  ;;  %v7070_v62 = vmul.f32 %v7020_v52, %v6920_v12  ;;  %v6631_v51 = vld [vmem:[%s8796_s1 + $0x20] sm:$0xff] }
  0x96   : > { %936 = vrot.lane.b32.xlu1 %v6961_v32, %s6842_s29  ;;  %834 = vrot.lane.b32.xlu0 %v6953_v29, %s6841_s27  ;;  %v361_v35 = vsel %vm359_vm4, %v356_v33, %v358_v34  ;;  %8854 = vst [vmem:[#allocation13_spill] sm:$0xff] %v7002_v47  ;;  %v6627_v34 = vld [vmem:[%s8796_s1 + $0x10] sm:$0xff] }
  0x97   : > { %398 = vmatprep.subr.mxu0 %v361_v35  ;;  %8860 = vst [vmem:[#allocation19_spill] sm:$0xff] %v7066_v61  ;;  %v6629_v35 = vld [vmem:[%s8796_s1 + $0x18] sm:$0xff] }
  0x99   : > { %v354_v40 = vpop.permute.xlu0 %353  ;;  %v1032_v0 = vpop.permute.xlu1 %1031 }
  0x9a   : > { %550 = vrot.lane.b32.xlu1 %v6972_v38, %s6844_s11  ;;  %446 = vrot.lane.b32.xlu0 %v6976_v39, %s6845_s12  ;;  %v360_v42 = vsel %vm359_vm4, %v354_v40, %v356_v33 }
  0x9b   : > { %399 = vmatpush1.msra.mxu0 %v360_v42 }
  0x9c   : > { %6625 = vmatmul.mubr.msk.f32.vlgmr.msra.gmra.mxu0 %vm364_vm5, %v6624_v41 }
  0x9d   : > { %624 = vmatprep.mubr.f32.mxu0 %v8805_v1  ;;  %v1030_v2 = vpop.permute.xlu0 %1029 }
  0x9e   : > { %838 = vrot.lane.b32.xlu1 %v6986_v43, %s6841_s27  ;;  %654 = vrot.lane.b32.xlu0 %v6990_v45, %s6843_s30 }
  0xa2   : > { %940 = vrot.lane.b32.xlu0 %v7002_v47, %s6842_s29  ;;  %444 = vrot.lane.b32.xlu1 %v7006_v48, %s6845_s12 }
  0xa6   : > { %548 = vrot.lane.b32.xlu0 %v7024_v53, %s6844_s11  ;;  %652 = vrot.lane.b32.xlu1 %v7028_v54, %s6843_s30 }
  0xaa   : > { %836 = vrot.lane.b32.xlu0 %v7048_v58, %s6841_s27  ;;  %938 = vrot.lane.b32.xlu1 %v7052_v59, %s6842_s29 }
  0xae   : > { %1027 = vrot.lane.b32.xlu0 %v6920_v12, %s6847_s14  ;;  %1132 = vrot.lane.b32.xlu1 %v7060_v60, %s6840_s26 }
  0xb2   : > { %1134 = vrot.lane.b32.xlu0 %v7066_v61, %s6840_s26  ;;  %1130 = vrot.lane.b32.xlu1 %v7070_v62, %s6840_s26 }
  0xb6   : > { %1219 = vperm.xlu0 %6787, %v1216_v63   ;;  %1256 = vrot.lane.b32.xlu1 %v6920_v12, %s6846_s13  ;;  %v6633_v63 = vld [vmem:[%s8796_s1 + $0x28] sm:$0xff] }
  0xba   : > { %6789 = vrot.lane.b32.xlu0 %v8805_v1, %s6846_s13  ;;  %1360 = vrot.lane.b32.xlu1 %v6935_v19, %s6845_s12 }
  0xbe   : > { %1258 = vrot.lane.b32.xlu0 %v6923_v13, %s6846_s13  ;;  %1358 = vrot.lane.b32.xlu1 %v6976_v39, %s6845_s12 }
  0xc2   : > { %1354 = vrot.lane.b32.xlu0 %v6935_v19, %s6845_s12  ;;  %1468 = vrot.lane.b32.xlu1 %v6943_v25, %s6844_s11 }
  0xc6   : > { %1462 = vrot.lane.b32.xlu0 %v6943_v25, %s6844_s11  ;;  %1466 = vrot.lane.b32.xlu1 %v6972_v38, %s6844_s11 }
  0xca   : > { %1572 = vrot.lane.b32.xlu0 %v6937_v22, %s6843_s30  ;;  %1578 = vrot.lane.b32.xlu1 %v6937_v22, %s6843_s30 }
  0xce   : > { %1776 = vrot.lane.b32.xlu0 %v6986_v43, %s6841_s27  ;;  %1576 = vrot.lane.b32.xlu1 %v6990_v45, %s6843_s30 }
  0xd2   : > { %1766 = vrot.lane.b32.xlu0 %v6953_v29, %s6841_s27  ;;  %1770 = vrot.lane.b32.xlu1 %v6986_v43, %s6841_s27 }
  0xd6   : > { %1876 = vrot.lane.b32.xlu0 %v6961_v32, %s6842_s29  ;;  %1886 = vrot.lane.b32.xlu1 %v7002_v47, %s6842_s29 }
  0xda   : > { %1982 = vrot.lane.b32.xlu0 %v6923_v13, %s6847_s14  ;;  %1880 = vrot.lane.b32.xlu1 %v7002_v47, %s6842_s29 }
  0xde   : > { %1356 = vrot.lane.b32.xlu0 %v7006_v48, %s6845_s12  ;;  %6794 = vrot.lane.b32.xlu1 %v8805_v1, %s6847_s14 }
  0xe2   : > { %1464 = vrot.lane.b32.xlu0 %v7024_v53, %s6844_s11 }
  0xe6   : > { %1574 = vrot.lane.b32.xlu0 %v7028_v54, %s6843_s30 }
  0xea   : > { %1768 = vrot.lane.b32.xlu0 %v7048_v58, %s6841_s27 }
  0xee   : > { %1878 = vrot.lane.b32.xlu0 %v7052_v59, %s6842_s29 }
 0x100   : > { %v443_v3 = vpop.permute.xlu1 %442 }
 0x104   : > { %v651_v4 = vpop.permute.xlu1 %650  ;;  %v547_v5 = vpop.permute.xlu0 %546 }
 0x108   : > { %v937_v6 = vpop.permute.xlu1 %936  ;;  %v835_v7 = vpop.permute.xlu0 %834 }
 0x10c   : > { %v551_v8 = vpop.permute.xlu1 %550  ;;  %v447_v9 = vpop.permute.xlu0 %446 }
 0x110   : > { %v839_v10 = vpop.permute.xlu1 %838  ;;  %v655_v11 = vpop.permute.xlu0 %654 }
 0x114   : > { %v941_v14 = vpop.permute.xlu0 %940  ;;  %v445_v15 = vpop.permute.xlu1 %444 }
 0x115   : > { %v450_v16 = vsel %vm448_vm11, %v445_v15, %v447_v9  ;;  %v449_v17 = vsel %vm448_vm11, %v443_v3, %v445_v15  ;;  %v6635_v9 = vld [vmem:[%s8796_s1 + $0x30] sm:$0xff] }
 0x116   : > { %486 = vmatprep.subr.mxu1 %v450_v16 }
 0x117   : > { %487 = vmatpush1.msra.mxu1 %v449_v17 }
 0x118   : > { %v549_v20 = vpop.permute.xlu0 %548  ;;  %6626 = vmatmul.mubr.msk.f32.vlgmr.msra.gmra.mxu1 %vm364_vm5, %v347_v18  ;;  %v653_v21 = vpop.permute.xlu1 %652 }
 0x119   : > { %v554_v23 = vsel %vm552_vm10, %v549_v20, %v551_v8  ;;  %v658_v26 = vsel %vm656_vm9, %v653_v21, %v655_v11  ;;  %v553_v27 = vsel %vm552_vm10, %v547_v5, %v549_v20  ;;  %v657_v33 = vsel %vm656_vm9, %v651_v4, %v653_v21  ;;  %728 = vmatprep.mubr.f32.mxu1 %v8805_v1 }
 0x11a   : > { %590 = vmatprep.subr.mxu0 %v554_v23  ;;  %694 = vmatprep.subr.mxu1 %v658_v26  ;;  %v1035_v8 = vsel %vm1033_vm12, %v1030_v2, %v1032_v0 }
 0x11b   : > { %591 = vmatpush1.msra.mxu0 %v553_v27  ;;  %695 = vmatpush1.msra.mxu1 %v657_v33 }
 0x11c   : > { %6628 = vmatmul.mubr.msk.f32.vlgmr.msra.gmra.mxu0 %vm364_vm5, %v6627_v34  ;;  %772 = vmatprep.subr.mxu0 %v6923_v13  ;;  %v837_v37 = vpop.permute.xlu0 %836  ;;  %v939_v40 = vpop.permute.xlu1 %938 }
 0x11d   : > { %6630 = vmatmul.mubr.msk.f32.vlgmr.msra.gmra.mxu1 %vm364_vm5, %v6629_v35  ;;  %773 = vmatpush1.msra.mxu0 %v6920_v12  ;;  %v841_v41 = vsel %vm637_vm7, %v837_v37, %v839_v10  ;;  %v943_v42 = vsel %vm533_vm8, %v939_v40, %v941_v14  ;;  %v840_v44 = vsel %vm637_vm7, %v835_v7, %v837_v37  ;;  %v6637_v10 = vld [vmem:[%s8796_s1 + $0x38] sm:$0xff]  ;;  %v6639_v14 = vld [vmem:[%s8796_s1 + $0x40] sm:$0xff] }
 0x11e   : > { %877 = vmatprep.subr.mxu1 %v841_v41  ;;  %979 = vmatprep.subr.mxu0 %v943_v42  ;;  %v942_v4 = vsel %vm533_vm8, %v937_v6, %v939_v40 }
 0x11f   : > { %806 = vmatprep.mubr.f32.mxu0 %v8805_v1  ;;  %878 = vmatpush1.msra.mxu1 %v840_v44 }
 0x120   : > { %911 = vmatprep.mubr.f32.mxu1 %v8805_v1  ;;  %6632 = vmatmul.mubr.msk.f32.vlgmr.msra.gmra.mxu0 %vm364_vm5, %v6631_v51  ;;  %v1028_v3 = vpop.permute.xlu0 %1027  ;;  %v1133_v5 = vpop.permute.xlu1 %1132 }
 0x121   : > { %v1034_v7 = vsel %vm1033_vm12, %v1028_v3, %v1030_v2  ;;  %6634 = vmatmul.mubr.msk.f32.vlgmr.msra.gmra.mxu1 %vm364_vm5, %v6633_v63  ;;  %980 = vmatpush1.msra.mxu0 %v942_v4 }
 0x122   : > { %1071 = vmatprep.subr.mxu1 %v1035_v8  ;;  %1013 = vmatprep.mubr.f32.mxu0 %v8805_v1 }
 0x123   : > { %1072 = vmatpush1.msra.mxu1 %v1034_v7  ;;  %1105 = vmatprep.mubr.f32.mxu1 %v8805_v1 }
 0x124   : > { %v1135_v6 = vpop.permute.xlu0 %1134  ;;  %6636 = vmatmul.mubr.msk.f32.vlgmr.msra.gmra.mxu0 %vm364_vm5, %v6635_v9  ;;  %v1131_v11 = vpop.permute.xlu1 %1130 }
 0x125   : > { %6638 = vmatmul.mubr.msk.f32.vlgmr.msra.gmra.mxu1 %vm364_vm5, %v6637_v10  ;;  %v1136_v0 = vsel %vm339_vm6, %v1131_v11, %v1133_v5  ;;  %v1137_v2 = vsel %vm339_vm6, %v1133_v5, %v1135_v6  ;;  %1207 = vmatprep.mubr.f32.mxu0 %v8805_v1 }
 0x126   : > { %1173 = vmatprep.subr.mxu0 %v1137_v2  ;;  %1341 = vmatprep.mubr.f32.mxu1 %v8805_v1 }
 0x127   : > { %1174 = vmatpush1.msra.mxu0 %v1136_v0 }
 0x128   : > { %6640 = vmatmul.mubr.msk.f32.vlgmr.msra.gmra.mxu0 %vm364_vm5, %v6639_v14 }
 0x129   : > { %1441 = vmatprep.mubr.f32.mxu0 %v8805_v1 }
 0x15c   : > { %v434_v15 = vpop.f32.mrf.mxu0 }
 0x15e   : > { %v436_v17 = vpop.f32.mrf.mxu0 }
 0x1d8   : > { %v522_v16 = vpop.f32.mrf.mxu1 }
 0x1d9   : > { %v523_v20 = vadd.f32 %v522_v16, %v434_v15  ;;  %v1220_v16 = vpop.permute.xlu0 %1219 }
 0x1da   : > { %v524_v18 = vpop.f32.mrf.mxu1 }
 0x1db   : > { %v525_v23 = vadd.f32 %v524_v18, %v436_v17 }
 0x1dc   : > { %v626_v21 = vpop.f32.mrf.mxu0 }
 0x1dd   : > { %v631_v26 = vadd.f32 %v626_v21, %v523_v20  ;;  %v730_v27 = vpop.f32.mrf.mxu1 }
 0x1de   : > { %v628_v33 = vpop.f32.mrf.mxu0 }
 0x1df   : > { %v735_v34 = vadd.f32 %v730_v27, %v631_v26  ;;  %v632_v35 = vadd.f32 %v628_v33, %v525_v23  ;;  %v732_v37 = vpop.f32.mrf.mxu1 }
 0x1e0   : > { %v808_v40 = vpop.f32.mrf.mxu0 }
 0x1e1   : > { %v736_v41 = vadd.f32 %v732_v37, %v632_v35  ;;  %v813_v42 = vadd.f32 %v808_v40, %v735_v34  ;;  %v913_v44 = vpop.f32.mrf.mxu1 }
 0x1e2   : > { %v810_v51 = vpop.f32.mrf.mxu0 }
 0x1e3   : > { %v918_v63 = vadd.f32 %v913_v44, %v813_v42  ;;  %v814_v3 = vadd.f32 %v810_v51, %v736_v41  ;;  %v915_v4 = vpop.f32.mrf.mxu1 }
 0x1e4   : > { %v1015_v5 = vpop.f32.mrf.mxu0 }
 0x1e5   : > { %v919_v7 = vadd.f32 %v915_v4, %v814_v3  ;;  %v1020_v8 = vadd.f32 %v1015_v5, %v918_v63  ;;  %v1107_v9 = vpop.f32.mrf.mxu1  ;;  %v2186_v4 = vld [vmem:[%s8797_s2 + $0x8] sm:$0xff]  ;;  %v7257_v5 = vpop.permute.xlu0 %6789 }
 0x1e6   : > { %v1017_v10 = vpop.f32.mrf.mxu0 }
 0x1e7   : > { %v1112_v6 = vadd.f32 %v1107_v9, %v1020_v8  ;;  %v1021_v11 = vadd.f32 %v1017_v10, %v919_v7  ;;  %v1109_v0 = vpop.f32.mrf.mxu1 }
 0x1e8   : > { %v1209_v2 = vpop.f32.mrf.mxu0 }
 0x1e9   : > { %v1113_v14 = vadd.f32 %v1109_v0, %v1021_v11  ;;  %v1214_v15 = vadd.f32 %v1209_v2, %v1112_v6  ;;  %v7267_v8 = vpop.permute.xlu0 %1258  ;;  %v7286_v6 = vpop.permute.xlu1 %1256 }
 0x1ea   : > { %v1211_v17 = vpop.f32.mrf.mxu0 }
 0x1eb   : > { %v1222_v18 = vadd.f32 %v1220_v16, %v1214_v15  ;;  %v1215_v20 = vadd.f32 %v1211_v17, %v1113_v14 }
 0x1ed   : > { %vm1224_vm13 = vcmp.ge.f32.partialorder %v1222_v18, 0.0  ;;  %v1226_v21 = vmul.f32 0.1, %v1222_v18  ;;  %v1223_v26 = vadd.f32 %v1220_v16, %v1215_v20  ;;  %v7279_v10 = vpop.permute.xlu0 %1354  ;;  %v7296_v0 = vpop.permute.xlu1 %1360 }
 0x1ef   : > { %v7185_v23 = vsel %vm1224_vm13, %v1222_v18, %v1226_v21  ;;  %v1227_v33 = vmul.f32 0.1, %v1223_v26  ;;  %vm1225_vm14 = vcmp.ge.f32.partialorder %v1223_v26, 0.0  ;;  %vm3316_vm13 = vcmask 261120  }
 0x1f0   : > { %1262 = vrot.lane.b32.xlu1 %v7185_v23, %s6846_s13  ;;  %v1452_v27 = vmul.f32 %v7185_v23, %v7014_v50  ;;  %v1562_v34 = vmul.f32 %v7185_v23, %v7010_v49  ;;  %v1242_v37 = vmul.f32 %v7185_v23, %v6995_v46  ;;  %v7214_v41 = vmul.f32 %v6941_v24, %v7185_v23 }
 0x1f1   : > { %v7197_v35 = vsel %vm1225_vm14, %v1223_v26, %v1227_v33  ;;  %v7222_v42 = vmul.f32 %v6945_v28, %v7185_v23  ;;  %v7236_v51 = vmul.f32 %v7020_v52, %v7185_v23  ;;  %v7288_v11 = vpop.permute.xlu0 %1462  ;;  %v7305_v14 = vpop.permute.xlu1 %1358 }
 0x1f2   : > { %1470 = vrot.lane.b32.xlu0 %v1452_v27, %s6844_s11  ;;  %v7208_v40 = vmul.f32 %v6955_v30, %v7197_v35  ;;  %v7228_v44 = vmul.f32 %v7197_v35, %v7036_v56  ;;  %v7242_v63 = vmul.f32 %v6957_v31, %v7197_v35  ;;  %v7250_v3 = vmul.f32 %v6968_v36, %v7197_v35 }
 0x1f3   : > { %v7261_v7 = vmul.f32 %v7197_v35, %v7032_v55  ;;  %v7275_v9 = vmul.f32 %v7197_v35, %v7044_v57 }
 0x1f4   : > { %1986 = vrot.lane.b32.xlu1 %v7185_v23, %s6847_s14 }
 0x1f5   : > { %v7298_v2 = vpop.permute.xlu0 %1572  ;;  %v7315_v16 = vpop.permute.xlu1 %1468 }
 0x1f6   : > { %1580 = vrot.lane.b32.xlu0 %v1562_v34, %s6843_s30 }
 0x1f8   : > { %1264 = vrot.lane.b32.xlu1 %v7197_v35, %s6846_s13 }
 0x1f9   : > { %v7307_v15 = vpop.permute.xlu0 %1776  ;;  %v7325_v17 = vpop.permute.xlu1 %1466 }
 0x1fa   : > { %1988 = vrot.lane.b32.xlu0 %v7197_v35, %s6847_s14 }
 0x1fc   : > { %1362 = vrot.lane.b32.xlu1 %v1242_v37, %s6845_s12 }
 0x1fd   : > { %v7334_v20 = vpop.permute.xlu1 %1578 }
 0x1fe   : > { %1364 = vrot.lane.b32.xlu0 %v7208_v40, %s6845_s12 }
 0x200   : > { %1772 = vrot.lane.b32.xlu1 %v7214_v41, %s6841_s27 }
 0x202   : > { %2100 = vrot.lane.b32.xlu0 %v7066_v61, %s6840_s26 }
 0x204   : > { %1882 = vrot.lane.b32.xlu1 %v7222_v42, %s6842_s29 }
 0x206   : > { %1884 = vrot.lane.b32.xlu0 %v7228_v44, %s6842_s29 }
 0x208   : > { %1980 = vrot.lane.b32.xlu1 %v6920_v12, %s6847_s14 }
 0x20a   : > { %2096 = vrot.lane.b32.xlu0 %v7236_v51, %s6840_s26 }
 0x20c   : > { %1472 = vrot.lane.b32.xlu1 %v7242_v63, %s6844_s11 }
 0x20e   : > { %2094 = vrot.lane.b32.xlu0 %v7066_v61, %s6840_s26 }
 0x210   : > { %1582 = vrot.lane.b32.xlu1 %v7250_v3, %s6843_s30 }
 0x212   : > { %2189 = vperm.xlu0 %6787, %v2186_v4   ;;  %v6792_v4 = vunpack.i.h.bf16 %v7257_v5 }
 0x214   : > { %1774 = vrot.lane.b32.xlu1 %v7261_v7, %s6841_s27 }
 0x216   : > { %2241 = vrot.lane.b32.xlu0 %v7185_v23, %s6846_s13 }
 0x218   : > { %2092 = vrot.lane.b32.xlu1 %v7060_v60, %s6840_s26 }
 0x21a   : > { %2235 = vrot.lane.b32.xlu0 %v6920_v12, %s6846_s13 }
 0x21c   : > { %2098 = vrot.lane.b32.xlu1 %v7275_v9, %s6840_s26 }
 0x21e   : > { %2233 = vrot.lane.b32.xlu0 %v8805_v1, %s6846_s13 }
 0x220   : > { %2090 = vrot.lane.b32.xlu1 %v7070_v62, %s6840_s26 }
 0x222   : > { %2355 = vrot.lane.b32.xlu0 %v1242_v37, %s6845_s12 }
 0x224   : > { %6799 = vrot.lane.b32.xlu1 %v8805_v1, %s6846_s13 }
 0x226   : > { %2353 = vrot.lane.b32.xlu0 %v6935_v19, %s6845_s12 }
 0x228   : > { %2243 = vrot.lane.b32.xlu1 %v7197_v35, %s6846_s13 }
 0x22a   : > { %2349 = vrot.lane.b32.xlu0 %v7006_v48, %s6845_s12  ;;  %v7317_v48 = vpop.permute.xlu0 %1766 }
 0x22c   : > { %2237 = vrot.lane.b32.xlu1 %v6923_v13, %s6846_s13 }
 0x22e   : > { %2479 = vrot.lane.b32.xlu0 %v1452_v27, %s6844_s11  ;;  %v7327_v18 = vpop.permute.xlu0 %1876 }
 0x230   : > { %2359 = vrot.lane.b32.xlu1 %v6935_v19, %s6845_s12 }
 0x232   : > { %2347 = vrot.lane.b32.xlu0 %v6935_v19, %s6845_s12 }
 0x234   : > { %2483 = vrot.lane.b32.xlu1 %v6943_v25, %s6844_s11 }
 0x236   : > { %2473 = vrot.lane.b32.xlu0 %v7024_v53, %s6844_s11  ;;  %v7336_v53 = vpop.permute.xlu0 %1982 }
 0x238   : > { %2351 = vrot.lane.b32.xlu1 %v6976_v39, %s6845_s12  ;;  %v7344_v39 = vpop.permute.xlu1 %1576 }
 0x23a   : > { %2471 = vrot.lane.b32.xlu0 %v6943_v25, %s6844_s11  ;;  %v1357_v21 = vpop.permute.xlu0 %1356 }
 0x23c   : > { %2477 = vrot.lane.b32.xlu1 %v6943_v25, %s6844_s11 }
 0x23e   : > { %2605 = vrot.lane.b32.xlu0 %v1562_v34, %s6843_s30  ;;  %v7354_v26 = vpop.permute.xlu0 %1464 }
 0x240   : > { %2475 = vrot.lane.b32.xlu1 %v6972_v38, %s6844_s11  ;;  %v7352_v38 = vpop.permute.xlu1 %1770 }
 0x242   : > { %2603 = vrot.lane.b32.xlu0 %v6937_v22, %s6843_s30 }
 0x244   : > { %2609 = vrot.lane.b32.xlu1 %v6937_v22, %s6843_s30 }
 0x246   : > { %2601 = vrot.lane.b32.xlu0 %v6990_v45, %s6843_s30  ;;  %v7362_v45 = vpop.permute.xlu1 %1886 }
 0x248   : > { %2599 = vrot.lane.b32.xlu1 %v7028_v54, %s6843_s30  ;;  %v7364_v54 = vpop.permute.xlu0 %1574 }
 0x24a   : > { %2820 = vrot.lane.b32.xlu0 %v6986_v43, %s6841_s27  ;;  %v7372_v27 = vpop.permute.xlu1 %1880 }
 0x24c   : > { %2597 = vrot.lane.b32.xlu1 %v6937_v22, %s6843_s30  ;;  %v7374_v33 = vpop.permute.xlu0 %1768 }
 0x24e   : > { %2952 = vrot.lane.b32.xlu0 %v7002_v47, %s6842_s29  ;;  %v7380_v34 = vpop.permute.xlu1 %6794 }
 0x250   : > { %2826 = vrot.lane.b32.xlu1 %v6986_v43, %s6841_s27  ;;  %v7384_v37 = vpop.permute.xlu0 %1878 }
 0x252   : > { %2814 = vrot.lane.b32.xlu0 %v6986_v43, %s6841_s27 }
 0x254   : > { %2816 = vrot.lane.b32.xlu1 %v7214_v41, %s6841_s27 }
 0x256   : > { %2946 = vrot.lane.b32.xlu0 %v7002_v47, %s6842_s29 }
 0x258   : > { %2812 = vrot.lane.b32.xlu1 %v7048_v58, %s6841_s27 }
 0x25a   : > { %2942 = vrot.lane.b32.xlu0 %v7222_v42, %s6842_s29 }
 0x25c   : > { %2810 = vrot.lane.b32.xlu1 %v6953_v29, %s6841_s27 }
 0x25e   : > { %2940 = vrot.lane.b32.xlu0 %v7002_v47, %s6842_s29  ;;  %v1267_v47 = vsel %vm359_vm4, %v7286_v6, %v7267_v8 }
 0x260   : > { %2938 = vrot.lane.b32.xlu1 %v7052_v59, %s6842_s29  ;;  %v6791_v59 = vunpack.i.l.bf16 %v7257_v5  ;;  %v6642_v5 = vld [vmem:[%s8796_s1 + $0x50] sm:$0xff] }
 0x262   : > { %6804 = vrot.lane.b32.xlu0 %v8805_v1, %s6847_s14  ;;  %v1263_v58 = vpop.permute.xlu1 %1262 }
 0x263   : > { %v1268_v22 = vsel %vm359_vm4, %v6791_v59, %v1263_v58 }
 0x264   : > { %v1471_v41 = vpop.permute.xlu0 %1470  ;;  %2936 = vrot.lane.b32.xlu1 %v6961_v32, %s6842_s29 }
 0x266   : > { %3059 = vrot.lane.b32.xlu0 %v7185_v23, %s6847_s14  ;;  %v7394_v29 = vpop.permute.xlu1 %1986 }
 0x268   : > { %v1581_v42 = vpop.permute.xlu0 %1580  ;;  %3061 = vrot.lane.b32.xlu1 %v7197_v35, %s6847_s14 }
 0x26a   : > { %v1265_v43 = vpop.permute.xlu1 %1264  ;;  %3055 = vrot.lane.b32.xlu0 %v6923_v13, %s6847_s14 }
 0x26b   : > { %v1269_v1 = vsel %vm359_vm4, %v1263_v58, %v1265_v43  ;;  %v1266_v43 = vsel %vm359_vm4, %v6792_v4, %v7286_v6  ;;  %v8861_v58 = vmov 0.0   ;;  %v1367_v6 = vsel %vm448_vm11, %v1357_v21, %v7305_v14 }
 0x26c   : > { %v7403_v32 = vpop.permute.xlu0 %1988  ;;  %3195 = vrot.lane.b32.xlu1 %v7066_v61, %s6840_s26  ;;  %1305 = vmatprep.subr.mxu1 %v1269_v1  ;;  %v1366_v4 = vsel %vm448_vm11, %v7279_v10, %v1357_v21  ;;  %v1476_v10 = vsel %vm552_vm10, %v7315_v16, %v1471_v41  ;;  %v1586_v16 = vsel %vm656_vm9, %v7334_v20, %v1581_v42 }
 0x26d   : > { %1306 = vmatpush1.msra.mxu1 %v1268_v22  ;;  %v1584_v20 = vsel %vm656_vm9, %v7298_v2, %v7364_v54 }
 0x26e   : > { %1307 = vmatprep.subr.mxu1 %v1267_v47  ;;  %v1363_v19 = vpop.permute.xlu1 %1362 }
 0x26f   : > { %1308 = vmatpush1.msra.mxu1 %v1266_v43  ;;  %v1368_v47 = vsel %vm448_vm11, %v7296_v0, %v1363_v19 }
 0x270   : > { %2357 = vrot.lane.b32.xlu1 %v7208_v40, %s6845_s12  ;;  %v1365_v1 = vpop.permute.xlu0 %1364  ;;  %6643 = vmatmul.mubr.msk.f32.vlgmr.msra.gmra.mxu1 %vm359_vm4, %v6642_v5  ;;  %v6641_v40 = vld [vmem:[%s8796_s1 + $0x48] sm:$0xff]  ;;  %v6645_v5 = vld [vmem:[%s8796_s1 + $0x58] sm:$0xff] }
 0x271   : > { %v1369_v22 = vsel %vm448_vm11, %v1363_v19, %v1365_v1  ;;  %1549 = vmatprep.mubr.f32.mxu1 %v8861_v58  ;;  %v6797_v1 = vunpack.i.h.bf16 %v7380_v34 }
 0x272   : > { %1405 = vmatprep.subr.mxu0 %v1369_v22  ;;  %v1773_v8 = vpop.permute.xlu1 %1772  ;;  %v6796_v22 = vunpack.i.l.bf16 %v7380_v34 }
 0x273   : > { %1406 = vmatpush1.msra.mxu0 %v1368_v47  ;;  %v1778_v47 = vsel %vm637_vm7, %v7317_v48, %v7374_v33  ;;  %v1994_v48 = vsel %vm1033_vm12, %v7394_v29, %v7403_v32 }
 0x274   : > { %2481 = vrot.lane.b32.xlu1 %v7242_v63, %s6844_s11  ;;  %1407 = vmatprep.subr.mxu0 %v1367_v6  ;;  %v2101_v14 = vpop.permute.xlu0 %2100  ;;  %v1995_v34 = vsel %vm1033_vm12, %v7403_v32, %v6796_v22 }
 0x275   : > { %1408 = vmatpush1.msra.mxu0 %v1366_v4 }
 0x276   : > { %v1883_v59 = vpop.permute.xlu1 %1882  ;;  %6644 = vmatmul.mubr.msk.f32.vlgmr.msra.gmra.mxu0 %vm359_vm4, %v6641_v40 }
 0x277   : > { %1659 = vmatprep.mubr.f32.mxu0 %v8861_v58 }
 0x278   : > { %2607 = vrot.lane.b32.xlu1 %v7250_v3, %s6843_s30  ;;  %v1475_v3 = vsel %vm552_vm10, %v7354_v26, %v7325_v17  ;;  %v6647_v17 = vld [vmem:[%s8796_s1 + $0x60] sm:$0xff] }
 0x27a   : > { %v7436_v19 = vpop.permute.xlu1 %1980 }
 0x27b   : > { %v1992_v4 = vsel %vm1033_vm12, %v7436_v19, %v7336_v53 }
 0x27c   : > { %2818 = vrot.lane.b32.xlu1 %v7261_v7, %s6841_s27  ;;  %v1474_v7 = vsel %vm552_vm10, %v7288_v11, %v7354_v26  ;;  %v1585_v11 = vsel %vm656_vm9, %v7364_v54, %v7344_v39  ;;  %v1885_v26 = vpop.permute.xlu0 %1884  ;;  %v6649_v39 = vld [vmem:[%s8796_s1 + $0x68] sm:$0xff]  ;;  %v1889_v54 = vsel %vm533_vm8, %v7384_v37, %v7372_v27  ;;  %v6653_v27 = vld [vmem:[%s8796_s1 + $0x78] sm:$0xff] }
 0x27d   : > { %v1890_v2 = vsel %vm533_vm8, %v1883_v59, %v1885_v26 }
 0x27e   : > { %v1473_v0 = vpop.permute.xlu1 %1472 }
 0x27f   : > { %v1477_v63 = vsel %vm552_vm10, %v1471_v41, %v1473_v0 }
 0x280   : > { %2944 = vrot.lane.b32.xlu1 %v7228_v44, %s6842_s29  ;;  %1513 = vmatprep.subr.mxu1 %v1477_v63  ;;  %v6657_v63 = vld [vmem:[%s8796_s1 + $0x88] sm:$0xff] }
 0x281   : > { %1514 = vmatpush1.msra.mxu1 %v1476_v10 }
 0x282   : > { %1515 = vmatprep.subr.mxu1 %v1475_v3  ;;  %v1583_v21 = vpop.permute.xlu1 %1582 }
 0x283   : > { %1516 = vmatpush1.msra.mxu1 %v1474_v7  ;;  %v1587_v44 = vsel %vm656_vm9, %v1581_v42, %v1583_v21 }
 0x284   : > { %1623 = vmatprep.subr.mxu0 %v1587_v44  ;;  %1701 = vmatprep.subr.mxu1 %v7197_v35 }
 0x285   : > { %6646 = vmatmul.mubr.msk.f32.vlgmr.msra.gmra.mxu1 %vm359_vm4, %v6645_v5  ;;  %1624 = vmatpush1.msra.mxu0 %v1586_v16 }
 0x286   : > { %1702 = vmatpush1.msra.mxu1 %v7185_v23  ;;  %1625 = vmatprep.subr.mxu0 %v1585_v11  ;;  %v1775_v41 = vpop.permute.xlu1 %1774 }
 0x287   : > { %1703 = vmatprep.subr.mxu1 %v6923_v13  ;;  %1626 = vmatpush1.msra.mxu0 %v1584_v20  ;;  %v1781_v42 = vsel %vm637_vm7, %v1775_v41, %v7307_v15  ;;  %v1780_v43 = vsel %vm637_vm7, %v1773_v8, %v1775_v41  ;;  %v1891_v13 = vsel %vm533_vm8, %v1885_v26, %v7362_v45  ;;  %v6651_v45 = vld [vmem:[%s8796_s1 + $0x70] sm:$0xff]  ;;  %v2097_v8 = vpop.permute.xlu0 %2096 }
 0x288   : > { %1704 = vmatpush1.msra.mxu1 %v6920_v12  ;;  %6648 = vmatmul.mubr.msk.f32.vlgmr.msra.gmra.mxu0 %vm359_vm4, %v6647_v17  ;;  %v1779_v12 = vsel %vm637_vm7, %v7374_v33, %v7352_v38  ;;  %v1888_v38 = vsel %vm533_vm8, %v7327_v18, %v7384_v37  ;;  %v1993_v33 = vsel %vm1033_vm12, %v7336_v53, %v6797_v1  ;;  %v6655_v37 = vld [vmem:[%s8796_s1 + $0x80] sm:$0xff] }
 0x289   : > { %1737 = vmatprep.mubr.f32.mxu1 %v8861_v58  ;;  %1817 = vmatprep.subr.mxu0 %v1781_v42 }
 0x28a   : > { %1927 = vmatprep.subr.mxu1 %v1891_v13  ;;  %6650 = vmatmul.mubr.msk.f32.vlgmr.msra.gmra.mxu1 %vm359_vm4, %v6649_v39  ;;  %v2093_v15 = vpop.permute.xlu1 %2092 }
 0x28b   : > { %1818 = vmatpush1.msra.mxu0 %v1780_v43  ;;  %1928 = vmatpush1.msra.mxu1 %v1890_v2  ;;  %v2095_v29 = vpop.permute.xlu0 %2094 }
 0x28c   : > { %1819 = vmatprep.subr.mxu0 %v1779_v12  ;;  %1929 = vmatprep.subr.mxu1 %v1889_v54  ;;  %v2103_v59 = vsel %vm339_vm6, %v2093_v15, %v2095_v29 }
 0x28d   : > { %1820 = vmatpush1.msra.mxu0 %v1778_v47  ;;  %1853 = vmatprep.mubr.f32.mxu0 %v8861_v58 }
 0x28e   : > { %1930 = vmatpush1.msra.mxu1 %v1888_v38  ;;  %6652 = vmatmul.mubr.msk.f32.vlgmr.msra.gmra.mxu0 %vm359_vm4, %v6651_v45  ;;  %v2099_v6 = vpop.permute.xlu1 %2098 }
 0x28f   : > { %2031 = vmatprep.subr.mxu0 %v1995_v34  ;;  %1963 = vmatprep.mubr.f32.mxu1 %v8861_v58  ;;  %v2105_v18 = vsel %vm339_vm6, %v2099_v6, %v2101_v14  ;;  %v2104_v40 = vsel %vm339_vm6, %v2097_v8, %v2099_v6  ;;  %v2190_v16 = vpop.permute.xlu0 %2189 }
 0x290   : > { %2032 = vmatpush1.msra.mxu0 %v1994_v48  ;;  %6654 = vmatmul.mubr.msk.f32.vlgmr.msra.gmra.mxu1 %vm359_vm4, %v6653_v27 }
 0x291   : > { %2033 = vmatprep.subr.mxu0 %v1993_v33  ;;  %2067 = vmatprep.mubr.f32.mxu0 %v8861_v58 }
 0x292   : > { %2034 = vmatpush1.msra.mxu0 %v1992_v4  ;;  %2141 = vmatprep.subr.mxu1 %v2105_v18  ;;  %v2091_v32 = vpop.permute.xlu1 %2090 }
 0x293   : > { %6656 = vmatmul.mubr.msk.f32.vlgmr.msra.gmra.mxu0 %vm359_vm4, %v6655_v37  ;;  %2142 = vmatpush1.msra.mxu1 %v2104_v40  ;;  %v2102_v0 = vsel %vm339_vm6, %v2091_v32, %v2093_v15  ;;  %v7537_v15 = vpop.permute.xlu0 %2241 }
 0x294   : > { %2143 = vmatprep.subr.mxu1 %v2103_v59  ;;  %2177 = vmatprep.mubr.f32.mxu1 %v8861_v58 }
 0x295   : > { %2144 = vmatpush1.msra.mxu1 %v2102_v0  ;;  %2331 = vmatprep.mubr.f32.mxu0 %v8861_v58 }
 0x296   : > { %6658 = vmatmul.mubr.msk.f32.vlgmr.msra.gmra.mxu1 %vm359_vm4, %v6657_v63  ;;  %v7533_v3 = vpop.permute.xlu1 %6799 }
 0x297   : > { %2444 = vmatprep.mubr.f32.mxu1 %v8861_v58  ;;  %v7541_v48 = vpop.permute.xlu0 %2235 }
 0x29a   : > { %v7535_v17 = vpop.permute.xlu1 %2243 }
 0x29b   : > { %v7545_v63 = vpop.permute.xlu0 %2233 }
 0x29e   : > { %v7539_v54 = vpop.permute.xlu1 %2237 }
 0x2a2   : > { %v7543_v18 = vpop.permute.xlu1 %2359 }
 0x330   : > { %v1343_v53 = vpop.f32.mrf.mxu1 }
 0x332   : > { %v1345_v14 = vpop.f32.mrf.mxu1 }
 0x336   : > { %v1443_v19 = vpop.f32.mrf.mxu0 }
 0x337   : > { %v1444_v21 = vadd.f32 %v1443_v19, %v1343_v53  ;;  %v7547_v53 = vpop.permute.xlu1 %2483 }
 0x338   : > { %v1445_v10 = vpop.f32.mrf.mxu0 }
 0x339   : > { %v1446_v7 = vadd.f32 %v1445_v10, %v1345_v14 }
 0x345   : > { %v1551_v5 = vpop.f32.mrf.mxu1 }
 0x346   : > { %v1556_v44 = vadd.f32 %v1551_v5, %v1444_v21  ;;  %v7557_v5 = vpop.permute.xlu1 %2351 }
 0x347   : > { %v1553_v11 = vpop.f32.mrf.mxu1 }
 0x348   : > { %v1557_v26 = vadd.f32 %v1553_v11, %v1446_v7  ;;  %v1661_v41 = vpop.f32.mrf.mxu0  ;;  %v7555_v7 = vpop.permute.xlu0 %2355 }
 0x349   : > { %v1666_v20 = vadd.f32 %v1661_v41, %v1556_v44 }
 0x34a   : > { %v1663_v42 = vpop.f32.mrf.mxu0  ;;  %v1739_v39 = vpop.f32.mrf.mxu1 }
 0x34b   : > { %v1667_v43 = vadd.f32 %v1663_v42, %v1557_v26  ;;  %v1744_v13 = vadd.f32 %v1739_v39, %v1666_v20  ;;  %v7571_v41 = vpop.permute.xlu1 %2477 }
 0x34c   : > { %v1741_v2 = vpop.f32.mrf.mxu1  ;;  %v7569_v26 = vpop.permute.xlu0 %2353 }
 0x34d   : > { %v1745_v12 = vadd.f32 %v1741_v2, %v1667_v43 }
 0x34e   : > { %v1855_v45 = vpop.f32.mrf.mxu0 }
 0x34f   : > { %v1860_v1 = vadd.f32 %v1855_v45, %v1744_v13  ;;  %v7583_v43 = vpop.permute.xlu1 %2475 }
 0x350   : > { %v1857_v22 = vpop.f32.mrf.mxu0  ;;  %v1965_v8 = vpop.f32.mrf.mxu1 }
 0x351   : > { %v1861_v47 = vadd.f32 %v1857_v22, %v1745_v12  ;;  %v1970_v38 = vadd.f32 %v1965_v8, %v1860_v1  ;;  %v7581_v39 = vpop.permute.xlu0 %2349 }
 0x352   : > { %v1967_v27 = vpop.f32.mrf.mxu1 }
 0x353   : > { %v1971_v34 = vadd.f32 %v1967_v27, %v1861_v47  ;;  %v2069_v6 = vpop.f32.mrf.mxu0  ;;  %v7597_v22 = vpop.permute.xlu1 %2609 }
 0x354   : > { %v2074_v33 = vadd.f32 %v2069_v6, %v1970_v38 }
 0x355   : > { %v2071_v37 = vpop.f32.mrf.mxu0  ;;  %v7595_v1 = vpop.permute.xlu0 %2479 }
 0x356   : > { %v2179_v40 = vpop.f32.mrf.mxu1  ;;  %v2075_v4 = vadd.f32 %v2071_v37, %v1971_v34  ;;  %v7625_v37 = vld [vmem:[%s6915_s10] sm:$0xff] }
 0x357   : > { %v2184_v29 = vadd.f32 %v2179_v40, %v2074_v33  ;;  %v7608_v38 = vpop.permute.xlu1 %2599 }
 0x358   : > { %v2181_v32 = vpop.f32.mrf.mxu1 }
 0x359   : > { %v2192_v59 = vadd.f32 %v2190_v16, %v2184_v29  ;;  %v2185_v0 = vadd.f32 %v2181_v32, %v2075_v4  ;;  %v7606_v47 = vpop.permute.xlu0 %2347  ;;  %v3285_v29 = vld [vmem:[%s8797_s2 + $0x10] sm:$0xff] }
 0x35b   : > { %vm2194_vm15 = vcmp.ge.f32.partialorder %v2192_v59, 0.0  ;;  %v2196_v19 = vmul.f32 0.1, %v2192_v59  ;;  %v2193_v14 = vadd.f32 %v2190_v16, %v2185_v0  ;;  %v7619_v33 = vpop.permute.xlu1 %2597 }
 0x35d   : > { %v7549_v10 = vsel %vm2194_vm15, %v2192_v59, %v2196_v19  ;;  %v2197_v21 = vmul.f32 0.1, %v2193_v14  ;;  %vm2195_vm0 = vcmp.ge.f32.partialorder %v2193_v14, 0.0  ;;  %v7617_v6 = vpop.permute.xlu0 %2473 }
 0x35e   : > { %3065 = vrot.lane.b32.xlu0 %v7549_v10, %s6847_s14  ;;  %2247 = vrot.lane.b32.xlu1 %v7549_v10, %s6846_s13  ;;  %v3165_v16 = vmul.f32 %v7020_v52, %v7549_v10  ;;  %v2218_v11 = vmul.f32 %v7549_v10, %v6995_v46  ;;  %v2458_v20 = vmul.f32 %v7549_v10, %v7014_v50 }
 0x35f   : > { %v7559_v44 = vsel %vm2195_vm0, %v2193_v14, %v2197_v21  ;;  %v2584_v13 = vmul.f32 %v7549_v10, %v7010_v49  ;;  %v2796_v12 = vmul.f32 %v6941_v24, %v7549_v10  ;;  %v2922_v8 = vmul.f32 %v6945_v28, %v7549_v10  ;;  %v7633_v40 = vpop.permute.xlu1 %2826  ;;  %v8863_v21 = vld [vmem:[#allocation13_spill] sm:$0xff] }
 0x360   : > { %v2219_v42 = vmul.f32 %v6955_v30, %v7559_v44  ;;  %v2459_v2 = vmul.f32 %v6957_v31, %v7559_v44  ;;  %v2585_v45 = vmul.f32 %v6968_v36, %v7559_v44  ;;  %v2923_v27 = vmul.f32 %v7559_v44, %v7036_v56 }
 0x361   : > { %v2797_v34 = vmul.f32 %v7559_v44, %v7032_v55  ;;  %v3166_v4 = vmul.f32 %v7559_v44, %v7044_v57  ;;  %v6802_v56 = vunpack.i.h.bf16 %v7533_v3  ;;  %v6801_v55 = vunpack.i.l.bf16 %v7533_v3 }
 0x362   : > { %3067 = vrot.lane.b32.xlu1 %v7559_v44, %s6847_s14  ;;  %2249 = vrot.lane.b32.xlu0 %v7559_v44, %s6846_s13  ;;  %v2254_v49 = vsel %vm359_vm4, %v7537_v15, %v7535_v17 }
 0x363   : > { %v7645_v59 = vpop.permute.xlu1 %2816  ;;  %v2253_v3 = vsel %vm359_vm4, %v6802_v56, %v7537_v15  ;;  %v2367_v15 = vsel %vm448_vm11, %v7569_v26, %v7555_v7  ;;  %v2491_v26 = vsel %vm552_vm10, %v7571_v41, %v7595_v1 }
 0x366   : > { %3191 = vrot.lane.b32.xlu1 %v3165_v16, %s6840_s26  ;;  %2361 = vrot.lane.b32.xlu0 %v2218_v11, %s6845_s12  ;;  %v8864_v16 = vld [vmem:[#allocation4_spill] sm:$0xff] }
 0x367   : > { %v7658_v19 = vpop.permute.xlu1 %2812 }
 0x36a   : > { %2485 = vrot.lane.b32.xlu0 %v2458_v20, %s6844_s11  ;;  %2363 = vrot.lane.b32.xlu1 %v2219_v42, %s6845_s12  ;;  %v8865_v42 = vld [vmem:[#allocation11_spill] sm:$0xff] }
 0x36b   : > { %v7664_v14 = vpop.permute.xlu1 %2810 }
 0x36e   : > { %2611 = vrot.lane.b32.xlu0 %v2584_v13, %s6843_s30  ;;  %2487 = vrot.lane.b32.xlu1 %v2459_v2, %s6844_s11 }
 0x36f   : > { %v7674_v20 = vpop.permute.xlu1 %2938 }
 0x372   : > { %2822 = vrot.lane.b32.xlu0 %v2796_v12, %s6841_s27  ;;  %2613 = vrot.lane.b32.xlu1 %v2585_v45, %s6843_s30 }
 0x373   : > { %v7680_v2 = vpop.permute.xlu1 %2936 }
 0x376   : > { %2948 = vrot.lane.b32.xlu0 %v2922_v8, %s6842_s29  ;;  %3057 = vrot.lane.b32.xlu1 %v8861_v58, %s6847_s14 }
 0x377   : > { %v7684_v45 = vpop.permute.xlu1 %3061 }
 0x37a   : > { %3187 = vrot.lane.b32.xlu0 %v7275_v9, %s6840_s26  ;;  %2950 = vrot.lane.b32.xlu1 %v2923_v27, %s6842_s29  ;;  %v7631_v9 = vpop.permute.xlu0 %2471 }
 0x37b   : > { %v7688_v27 = vpop.permute.xlu1 %3195 }
 0x37e   : > { %2824 = vrot.lane.b32.xlu0 %v2797_v34, %s6841_s27  ;;  %3189 = vrot.lane.b32.xlu1 %v7066_v61, %s6840_s26  ;;  %v7643_v32 = vpop.permute.xlu0 %2605 }
 0x382   : > { %3053 = vrot.lane.b32.xlu0 %v7625_v37, %s6847_s14  ;;  %3185 = vrot.lane.b32.xlu1 %v7236_v51, %s6840_s26  ;;  %v3310_v51 = vld [vmem:[%s8799_s4] sm:$0xff]  ;;  %v7656_v0 = vpop.permute.xlu0 %2603 }
 0x386   : > { %3193 = vrot.lane.b32.xlu0 %v3166_v4, %s6840_s26  ;;  %3183 = vrot.lane.b32.xlu1 %v7066_v61, %s6840_s26  ;;  %v2358_v4 = vpop.permute.xlu1 %2357 }
 0x387   : > { %v2368_v17 = vsel %vm448_vm11, %v7555_v7, %v2358_v4 }
 0x38a   : > { %3181 = vrot.lane.b32.xlu0 %v7060_v60, %s6840_s26  ;;  %3288 = vperm.xlu1 %6808, %v3285_v29   ;;  %v7662_v60 = vpop.permute.xlu0 %2601 }
 0x38e   : > { %3179 = vrot.lane.b32.xlu0 %v7070_v62, %s6840_s26  ;;  %3409 = vrot.lane.b32.xlu1 %v8861_v58, %s6846_s13  ;;  %v8862_v62 = vld [vmem:[#allocation3_spill] sm:$0xff]  ;;  %v7672_v11 = vpop.permute.xlu0 %2820 }
 0x392   : > { %3313 = vperm.xlu0 %6787, %v3310_v51   ;;  %3588 = vrot.lane.b32.xlu1 %v6943_v25, %s6844_s11  ;;  %v7678_v13 = vpop.permute.xlu0 %2952  ;;  %v2482_v51 = vpop.permute.xlu1 %2481 }
 0x396   : > { %3496 = vrot.lane.b32.xlu0 %v8862_v62, %s6845_s12  ;;  %3955 = vrot.lane.b32.xlu1 %v8863_v21, %s6842_s29  ;;  %v7682_v12 = vpop.permute.xlu0 %2814 }
 0x39a   : > { %3682 = vrot.lane.b32.xlu0 %v8864_v16, %s6843_s30  ;;  %v7686_v8 = vpop.permute.xlu0 %2946 }
 0x39e   : > { %3861 = vrot.lane.b32.xlu0 %v8865_v42, %s6841_s27  ;;  %v7690_v34 = vpop.permute.xlu0 %2942  ;;  %v7696_v42 = vpop.permute.xlu1 %2607 }
 0x3a2   : > { %v7692_v29 = vpop.permute.xlu0 %2940  ;;  %v7700_v25 = vpop.permute.xlu1 %2818 }
 0x3a6   : > { %v7694_v21 = vpop.permute.xlu0 %6804  ;;  %v7704_v52 = vpop.permute.xlu1 %2944 }
 0x3aa   : > { %v7698_v16 = vpop.permute.xlu0 %3059 }
 0x3ae   : > { %v7702_v62 = vpop.permute.xlu0 %3055 }
 0x3d0   : > { %v7706_v61 = vpop.permute.xlu0 %3065  ;;  %v2248_v57 = vpop.permute.xlu1 %2247 }
 0x3d1   : > { %v2255_v28 = vsel %vm359_vm4, %v6801_v55, %v2248_v57 }
 0x3d4   : > { %v7710_v36 = vpop.permute.xlu1 %3067  ;;  %v2250_v31 = vpop.permute.xlu0 %2249 }
 0x3d5   : > { %v2256_v30 = vsel %vm359_vm4, %v2248_v57, %v2250_v31  ;;  %v2252_v31 = vsel %vm359_vm4, %v7541_v48, %v7539_v54 }
 0x3d6   : > { %2293 = vmatprep.subr.mxu0 %v2256_v30  ;;  %v2251_v30 = vsel %vm359_vm4, %v7545_v63, %v7541_v48  ;;  %v2366_v63 = vsel %vm448_vm11, %v7581_v39, %v7557_v5  ;;  %v2492_v5 = vsel %vm552_vm10, %v7595_v1, %v2482_v51  ;;  %v6663_v1 = vld [vmem:[%s8796_s1 + $0xa0] sm:$0xff]  ;;  %v2617_v51 = vsel %vm656_vm9, %v7656_v0, %v7643_v32 }
 0x3d7   : > { %2294 = vmatpush1.msra.mxu0 %v2255_v28  ;;  %v6660_v28 = vld [vmem:[%s8796_s1 + $0x98] sm:$0xff] }
 0x3d8   : > { %v7717_v24 = vpop.permute.xlu1 %3191  ;;  %2295 = vmatprep.subr.mxu0 %v2254_v49  ;;  %v2362_v46 = vpop.permute.xlu0 %2361 }
 0x3d9   : > { %2296 = vmatpush1.msra.mxu0 %v2253_v3  ;;  %v2369_v57 = vsel %vm448_vm11, %v7543_v18, %v2362_v46  ;;  %v2365_v18 = vsel %vm448_vm11, %v7606_v47, %v7581_v39  ;;  %v2490_v39 = vsel %vm552_vm10, %v7617_v6, %v7583_v43  ;;  %v2489_v47 = vsel %vm552_vm10, %v7631_v9, %v7617_v6 }
 0x3da   : > { %2297 = vmatprep.subr.mxu0 %v2252_v31  ;;  %v2618_v43 = vsel %vm656_vm9, %v7643_v32, %v7696_v42  ;;  %v2616_v9 = vsel %vm656_vm9, %v7608_v38, %v7662_v60  ;;  %v6665_v42 = vld [vmem:[%s8796_s1 + $0xa8] sm:$0xff]  ;;  %v2615_v32 = vsel %vm656_vm9, %v7619_v33, %v7608_v38  ;;  %v6667_v60 = vld [vmem:[%s8796_s1 + $0xb0] sm:$0xff] }
 0x3db   : > { %2298 = vmatpush1.msra.mxu0 %v2251_v30  ;;  %v7800_v30 = vld [vmem:[%s6915_s10 + $0x8] sm:$0xff] }
 0x3dc   : > { %v2486_v49 = vpop.permute.xlu0 %2485  ;;  %v2364_v55 = vpop.permute.xlu1 %2363  ;;  %6661 = vmatmul.mubr.msk.f32.vlgmr.msra.gmra.mxu0 %vm2263_vm1, %v6660_v28 }
 0x3dd   : > { %v2370_v56 = vsel %vm448_vm11, %v2362_v46, %v2364_v55  ;;  %2568 = vmatprep.mubr.f32.mxu0 %v8861_v58  ;;  %v6659_v46 = vld [vmem:[%s8796_s1 + $0x90] sm:$0xff]  ;;  %v2493_v7 = vsel %vm552_vm10, %v7547_v53, %v2486_v49  ;;  %v2957_v55 = vsel %vm533_vm8, %v7704_v52, %v7686_v8  ;;  %v6671_v8 = vld [vmem:[%s8796_s1 + $0xc0] sm:$0xff] }
 0x3de   : > { %2406 = vmatprep.subr.mxu1 %v2370_v56 }
 0x3df   : > { %2407 = vmatpush1.msra.mxu1 %v2369_v57 }
 0x3e0   : > { %v2612_v54 = vpop.permute.xlu0 %2611  ;;  %2408 = vmatprep.subr.mxu1 %v2368_v17  ;;  %v2488_v48 = vpop.permute.xlu1 %2487 }
 0x3e1   : > { %2409 = vmatpush1.msra.mxu1 %v2367_v15  ;;  %v2494_v3 = vsel %vm552_vm10, %v2486_v49, %v2488_v48  ;;  %v2619_v41 = vsel %vm656_vm9, %v7597_v22, %v2612_v54  ;;  %v2955_v15 = vsel %vm533_vm8, %v7674_v20, %v7692_v29  ;;  %v6807_v29 = vunpack.i.h.bf16 %v7694_v21 }
 0x3e2   : > { %2410 = vmatprep.subr.mxu1 %v2366_v63  ;;  %2530 = vmatprep.subr.mxu0 %v2494_v3  ;;  %v6806_v48 = vunpack.i.l.bf16 %v7694_v21  ;;  %v3073_v3 = vsel %vm1033_vm12, %v7698_v16, %v7684_v45 }
 0x3e3   : > { %2411 = vmatpush1.msra.mxu1 %v2365_v18  ;;  %2531 = vmatpush1.msra.mxu0 %v2493_v7 }
 0x3e4   : > { %v2823_v4 = vpop.permute.xlu0 %2822  ;;  %2532 = vmatprep.subr.mxu0 %v2492_v5  ;;  %v2614_v31 = vpop.permute.xlu1 %2613  ;;  %6662 = vmatmul.mubr.msk.f32.vlgmr.msra.gmra.mxu1 %vm2263_vm1, %v6659_v46 }
 0x3e5   : > { %2533 = vmatpush1.msra.mxu0 %v2491_v26  ;;  %v2620_v53 = vsel %vm656_vm9, %v2612_v54, %v2614_v31  ;;  %2694 = vmatprep.mubr.f32.mxu1 %v8861_v58  ;;  %v2954_v54 = vsel %vm533_vm8, %v7680_v2, %v7674_v20  ;;  %v2829_v20 = vsel %vm637_vm7, %v7658_v19, %v7682_v12 }
 0x3e6   : > { %2534 = vmatprep.subr.mxu0 %v2490_v39  ;;  %2656 = vmatprep.subr.mxu1 %v2620_v53  ;;  %v2828_v2 = vsel %vm637_vm7, %v7664_v14, %v7658_v19  ;;  %v3075_v12 = vsel %vm1033_vm12, %v7706_v61, %v7710_v36  ;;  %v3074_v19 = vsel %vm1033_vm12, %v7684_v45, %v6807_v29 }
 0x3e7   : > { %2535 = vmatpush1.msra.mxu0 %v2489_v47  ;;  %2657 = vmatpush1.msra.mxu1 %v2619_v41 }
 0x3e8   : > { %v2949_v6 = vpop.permute.xlu0 %2948  ;;  %2658 = vmatprep.subr.mxu1 %v2618_v43  ;;  %2734 = vmatprep.subr.mxu0 %v7559_v44  ;;  %v7778_v22 = vpop.permute.xlu1 %3057 }
 0x3e9   : > { %6664 = vmatmul.mubr.msk.f32.vlgmr.msra.gmra.mxu0 %vm2263_vm1, %v6663_v1  ;;  %2659 = vmatpush1.msra.mxu1 %v2617_v51 }
 0x3ea   : > { %2735 = vmatpush1.msra.mxu0 %v7549_v10  ;;  %2660 = vmatprep.subr.mxu1 %v2616_v9 }
 0x3eb   : > { %2736 = vmatprep.subr.mxu0 %v7197_v35  ;;  %2661 = vmatpush1.msra.mxu1 %v2615_v32 }
 0x3ec   : > { %2737 = vmatpush1.msra.mxu0 %v7185_v23  ;;  %v7793_v0 = vpop.permute.xlu0 %3187  ;;  %v2951_v28 = vpop.permute.xlu1 %2950  ;;  %6666 = vmatmul.mubr.msk.f32.vlgmr.msra.gmra.mxu1 %vm2263_vm1, %v6665_v42 }
 0x3ed   : > { %2738 = vmatprep.subr.mxu0 %v7800_v30  ;;  %2772 = vmatprep.mubr.f32.mxu0 %v8861_v58  ;;  %v2959_v38 = vsel %vm533_vm8, %v2951_v28, %v7678_v13  ;;  %v2958_v33 = vsel %vm533_vm8, %v2949_v6, %v2951_v28  ;;  %v2956_v13 = vsel %vm533_vm8, %v7690_v34, %v7704_v52 }
 0x3ee   : > { %2739 = vmatpush1.msra.mxu0 %v7625_v37  ;;  %2907 = vmatprep.mubr.f32.mxu1 %v8861_v58  ;;  %v2831_v52 = vsel %vm637_vm7, %v7700_v25, %v7672_v11  ;;  %v2830_v34 = vsel %vm637_vm7, %v7645_v59, %v7700_v25  ;;  %v6669_v11 = vld [vmem:[%s8796_s1 + $0xb8] sm:$0xff]  ;;  %v3076_v59 = vsel %vm1033_vm12, %v7710_v36, %v6806_v48 }
 0x3ef   : > { %2995 = vmatprep.subr.mxu0 %v2959_v38  ;;  %6668 = vmatmul.mubr.msk.f32.vlgmr.msra.gmra.mxu0 %vm2263_vm1, %v6667_v60  ;;  %v3072_v36 = vsel %vm1033_vm12, %v7702_v62, %v7778_v22 }
 0x3f0   : > { %2996 = vmatpush1.msra.mxu0 %v2958_v33  ;;  %v2825_v49 = vpop.permute.xlu0 %2824  ;;  %v3190_v56 = vpop.permute.xlu1 %3189  ;;  %3033 = vmatprep.mubr.f32.mxu0 %v8861_v58 }
 0x3f1   : > { %2997 = vmatprep.subr.mxu0 %v2957_v55  ;;  %v2833_v57 = vsel %vm637_vm7, %v2825_v49, %v7633_v40  ;;  %v2832_v17 = vsel %vm637_vm7, %v2823_v4, %v2825_v49  ;;  %v3200_v61 = vsel %vm339_vm6, %v7793_v0, %v3190_v56 }
 0x3f2   : > { %2998 = vmatpush1.msra.mxu0 %v2956_v13  ;;  %2869 = vmatprep.subr.mxu1 %v2833_v57 }
 0x3f3   : > { %2999 = vmatprep.subr.mxu0 %v2955_v15  ;;  %2870 = vmatpush1.msra.mxu1 %v2832_v17 }
 0x3f4   : > { %3000 = vmatpush1.msra.mxu0 %v2954_v54  ;;  %v3054_v40 = vpop.permute.xlu0 %3053  ;;  %2871 = vmatprep.subr.mxu1 %v2831_v52  ;;  %v3186_v25 = vpop.permute.xlu1 %3185 }
 0x3f5   : > { %2872 = vmatpush1.msra.mxu1 %v2830_v34  ;;  %6672 = vmatmul.mubr.msk.f32.vlgmr.msra.gmra.mxu0 %vm2263_vm1, %v6671_v8  ;;  %v3199_v16 = vsel %vm339_vm6, %v3186_v25, %v7793_v0 }
 0x3f6   : > { %2873 = vmatprep.subr.mxu1 %v2829_v20  ;;  %3276 = vmatprep.mubr.f32.mxu0 %v8861_v58 }
 0x3f7   : > { %2874 = vmatpush1.msra.mxu1 %v2828_v2 }
 0x3f8   : > { %v3194_v21 = vpop.permute.xlu0 %3193  ;;  %6670 = vmatmul.mubr.msk.f32.vlgmr.msra.gmra.mxu1 %vm2263_vm1, %v6669_v11  ;;  %3112 = vmatprep.subr.mxu1 %v3076_v59  ;;  %v3184_v45 = vpop.permute.xlu1 %3183 }
 0x3f9   : > { %3113 = vmatpush1.msra.mxu1 %v3075_v12  ;;  %v3202_v14 = vsel %vm339_vm6, %v3194_v21, %v7688_v27  ;;  %v3201_v63 = vsel %vm339_vm6, %v7717_v24, %v3194_v21  ;;  %3150 = vmatprep.mubr.f32.mxu1 %v8861_v58  ;;  %v6673_v24 = vld [vmem:[%s8796_s1 + $0xc8] sm:$0xff]  ;;  %v3071_v27 = vsel %vm1033_vm12, %v3054_v40, %v7702_v62  ;;  %v6675_v62 = vld [vmem:[%s8796_s1 + $0xd0] sm:$0xff] }
 0x3fa   : > { %3114 = vmatprep.subr.mxu1 %v3074_v19  ;;  %3238 = vmatprep.subr.mxu0 %v3202_v14  ;;  %v3309_v19 = vld [vmem:[%s8798_s3] sm:$0xff] }
 0x3fb   : > { %3115 = vmatpush1.msra.mxu1 %v3073_v3  ;;  %3239 = vmatpush1.msra.mxu0 %v3201_v63 }
 0x3fc   : > { %v3182_v46 = vpop.permute.xlu0 %3181  ;;  %3116 = vmatprep.subr.mxu1 %v3072_v36  ;;  %3240 = vmatprep.subr.mxu0 %v3200_v61  ;;  %v8867_v61 = vld [vmem:[#allocation12_spill] sm:$0xff] }
 0x3fd   : > { %3117 = vmatpush1.msra.mxu1 %v3071_v27  ;;  %3241 = vmatpush1.msra.mxu0 %v3199_v16  ;;  %v3198_v18 = vsel %vm339_vm6, %v3182_v46, %v3184_v45  ;;  %v8869_v27 = vld [vmem:[#allocation14_spill] sm:$0xff]  ;;  %v8870_v45 = vld [vmem:[#allocation7_spill] sm:$0xff] }
 0x3fe   : > { %6674 = vmatmul.mubr.msk.f32.vlgmr.msra.gmra.mxu1 %vm2263_vm1, %v6673_v24  ;;  %3242 = vmatprep.subr.mxu0 %v3198_v18  ;;  %v8871_v18 = vld [vmem:[#allocation8_spill] sm:$0xff] }
 0x3ff   : > { %3384 = vmatprep.mubr.f32.mxu1 %v8861_v58 }
 0x400   : > { %v3180_v7 = vpop.permute.xlu0 %3179 }
 0x401   : > { %v3197_v5 = vsel %vm339_vm6, %v3180_v7, %v3182_v46 }
 0x402   : > { %3243 = vmatpush1.msra.mxu0 %v3197_v5 }
 0x403   : > { %6676 = vmatmul.mubr.msk.f32.vlgmr.msra.gmra.mxu0 %vm2263_vm1, %v6675_v62  ;;  %v8872_v62 = vld [vmem:[#allocation9_spill] sm:$0xff] }
 0x404   : > { %3486 = vmatprep.mubr.f32.mxu0 %v8861_v58 }
 0x405   : > { %v3289_v29 = vpop.permute.xlu1 %3288 }
 0x49c   : > { %v2333_v26 = vpop.f32.mrf.mxu0 }
 0x49e   : > { %v2335_v4 = vpop.f32.mrf.mxu0 }
 0x4a4   : > { %v2446_v31 = vpop.f32.mrf.mxu1 }
 0x4a5   : > { %v2447_v47 = vadd.f32 %v2446_v31, %v2333_v26  ;;  %v8873_v26 = vld [vmem:[#allocation10_spill] sm:$0xff]  ;;  %v8874_v31 = vld [vmem:[#allocation16_spill] sm:$0xff] }
 0x4a6   : > { %v2448_v39 = vpop.f32.mrf.mxu1 }
 0x4a7   : > { %v2449_v41 = vadd.f32 %v2448_v39, %v2335_v4 }
 0x4a9   : > { %v2570_v53 = vpop.f32.mrf.mxu0 }
 0x4aa   : > { %v2575_v51 = vadd.f32 %v2570_v53, %v2447_v47  ;;  %v8875_v53 = vld [vmem:[#allocation17_spill] sm:$0xff] }
 0x4ab   : > { %v2572_v1 = vpop.f32.mrf.mxu0 }
 0x4ac   : > { %v2696_v43 = vpop.f32.mrf.mxu1  ;;  %v2576_v6 = vadd.f32 %v2572_v1, %v2449_v41  ;;  %v8876_v41 = vld [vmem:[#allocation18_spill] sm:$0xff] }
 0x4ad   : > { %v2701_v42 = vadd.f32 %v2696_v43, %v2575_v51  ;;  %v8877_v43 = vld [vmem:[#allocation19_spill] sm:$0xff] }
 0x4ae   : > { %v2698_v22 = vpop.f32.mrf.mxu1  ;;  %v8878_v51 = vld [vmem:[#allocation15_spill] sm:$0xff] }
 0x4af   : > { %v2774_v9 = vpop.f32.mrf.mxu0  ;;  %v2702_v32 = vadd.f32 %v2698_v22, %v2576_v6  ;;  %v4222_v22 = vld [vmem:[%s8797_s2 + $0x18] sm:$0xff] }
 0x4b0   : > { %v2779_v60 = vadd.f32 %v2774_v9, %v2701_v42  ;;  %v8879_v9 = vld [vmem:[#allocation3_spill] sm:$0xff]  ;;  %v8880_v42 = vld [vmem:[#allocation6_spill] sm:$0xff] }
 0x4b1   : > { %v2776_v28 = vpop.f32.mrf.mxu0 }
 0x4b2   : > { %v2780_v49 = vadd.f32 %v2776_v28, %v2702_v32  ;;  %v8881_v32 = vld [vmem:[#allocation4_spill] sm:$0xff]  ;;  %v8883_v28 = vld [vmem:[#allocation13_spill] sm:$0xff] }
 0x4b5   : > { %v3035_v33 = vpop.f32.mrf.mxu0 }
 0x4b7   : > { %v3037_v57 = vpop.f32.mrf.mxu0 }
 0x4b8   : > { %v2909_v0 = vpop.f32.mrf.mxu1 }
 0x4b9   : > { %v2914_v55 = vadd.f32 %v2909_v0, %v2779_v60  ;;  %v8882_v0 = vld [vmem:[#allocation11_spill] sm:$0xff]  ;;  %v3410_v60 = vpop.permute.xlu1 %3409 }
 0x4ba   : > { %v2911_v38 = vpop.f32.mrf.mxu1 }
 0x4bb   : > { %v2915_v56 = vadd.f32 %v2911_v38, %v2780_v49  ;;  %v3040_v17 = vadd.f32 %v3035_v33, %v2914_v55 }
 0x4bd   : > { %v3041_v8 = vadd.f32 %v3037_v57, %v2915_v56  ;;  %v3589_v33 = vpop.permute.xlu1 %3588 }
 0x4be   : > { %v3152_v13 = vpop.f32.mrf.mxu1 }
 0x4bf   : > { %v3157_v54 = vadd.f32 %v3152_v13, %v3040_v17 }
 0x4c0   : > { %v3154_v15 = vpop.f32.mrf.mxu1 }
 0x4c1   : > { %v3158_v40 = vadd.f32 %v3154_v15, %v3041_v8  ;;  %v3956_v55 = vpop.permute.xlu1 %3955  ;;  %v6679_v15 = vld [vmem:[%s8796_s1 + $0xe0] sm:$0xff] }
 0x4c3   : > { %v3278_v52 = vpop.f32.mrf.mxu0 }
 0x4c4   : > { %v3283_v34 = vadd.f32 %v3278_v52, %v3157_v54 }
 0x4c5   : > { %v3280_v48 = vpop.f32.mrf.mxu0 }
 0x4c6   : > { %v3291_v20 = vadd.f32 %v3289_v29, %v3283_v34  ;;  %v3284_v11 = vadd.f32 %v3280_v48, %v3158_v40 }
 0x4c8   : > { %v3292_v2 = vadd.f32 %v3289_v29, %v3284_v11  ;;  %v3295_v25 = vmul.f32 0.1, %v3291_v20  ;;  %vm3293_vm3 = vcmp.ge.f32.partialorder %v3291_v20, 0.0 }
 0x4ca   : > { %vm3294_vm2 = vcmp.ge.f32.partialorder %v3292_v2, 0.0  ;;  %v3296_v59 = vmul.f32 0.1, %v3292_v2  ;;  %v3297_v12 = vsel %vm3293_vm3, %v3291_v20, %v3295_v25 }
 0x4cc   : > { %v3298_v21 = vsel %vm3294_vm2, %v3292_v2, %v3296_v59  ;;  %v6678_v2 = vld [vmem:[%s8796_s1 + $0xd8] sm:$0xff] }
 0x4cd   : > { %3344 = vmatprep.subr.mxu1 %v3298_v21 }
 0x4ce   : > { %3345 = vmatpush1.msra.mxu1 %v3297_v12  ;;  %v6682_v12 = vld [vmem:[%s8796_s1 + $0xe8] sm:$0xff] }
 0x4cf   : > { %3346 = vmatprep.subr.mxu1 %v7559_v44  ;;  %v3314_v44 = vpop.permute.xlu0 %3313 }
 0x4d0   : > { %3347 = vmatpush1.msra.mxu1 %v7549_v10 }
 0x4d1   : > { %3348 = vmatprep.subr.mxu1 %v7197_v35 }
 0x4d2   : > { %3349 = vmatpush1.msra.mxu1 %v7185_v23 }
 0x4d3   : > { %3350 = vmatprep.subr.mxu1 %v7800_v30  ;;  %v3497_v38 = vpop.permute.xlu0 %3496 }
 0x4d4   : > { %3351 = vmatpush1.msra.mxu1 %v7625_v37 }
 0x4d5   : > { %6677 = vmatmul.mubr.msk.f32.vlgmr.msra.gmra.mxu1 %vm3316_vm13, %v3309_v19 }
 0x4d6   : > { %3573 = vmatprep.mubr.f32.mxu1 %v8861_v58 }
 0x4d7   : > { %v3683_v49 = vpop.permute.xlu0 %3682 }
 0x4db   : > { %v3862_v56 = vpop.permute.xlu0 %3861 }
 0x595   : > { %v3386_v14 = vpop.f32.mrf.mxu1 }
 0x596   : > { %v3387_v10 = vadd.f32 %v3386_v14, %v3314_v44 }
 0x597   : > { %v3388_v63 = vpop.f32.mrf.mxu1 }
 0x598   : > { %v7897_v35 = vadd.f32 %v7625_v37, %v3387_v10  ;;  %v3389_v23 = vadd.f32 %v3388_v63, %v3314_v44  ;;  %v6684_v10 = vld [vmem:[%s8796_s1 + $0xf0] sm:$0xff] }
 0x59a   : > { %v7900_v3 = vadd.f32 %v7800_v30, %v3389_v23  ;;  %3411 = vrot.lane.b32.xlu1 %v7897_v35, %s6846_s13  ;;  %v7908_v36 = vmul.f32 %v7897_v35, %v7014_v50  ;;  %v7914_v37 = vmul.f32 %v7897_v35, %v8867_v61  ;;  %v8868_v30 = vld [vmem:[#allocation5_spill] sm:$0xff]  ;;  %v7926_v16 = vmul.f32 %v7897_v35, %v8869_v27 }
 0x59b   : > { %v7920_v24 = vmul.f32 %v8868_v30, %v7897_v35  ;;  %v7934_v46 = vmul.f32 %v8870_v45, %v7897_v35  ;;  %v7982_v6 = vmul.f32 %v8878_v51, %v7897_v35 }
 0x59c   : > { %8866 = vst [vmem:[#allocation20_spill] sm:$0xff] %v7900_v3  ;;  %3413 = vrot.lane.b32.xlu0 %v7900_v3, %s6846_s13  ;;  %v7940_v7 = vmul.f32 %v8871_v18, %v7900_v3  ;;  %v7946_v5 = vmul.f32 %v8872_v62, %v7900_v3  ;;  %v7952_v4 = vmul.f32 %v8873_v26, %v7900_v3 }
 0x59d   : > { %v7960_v39 = vmul.f32 %v7900_v3, %v8874_v31  ;;  %v7966_v47 = vmul.f32 %v7900_v3, %v8875_v53  ;;  %v7974_v1 = vmul.f32 %v7900_v3, %v8876_v41 }
 0x59e   : > { %3590 = vrot.lane.b32.xlu1 %v7908_v36, %s6844_s11 }
 0x5a0   : > { %3498 = vrot.lane.b32.xlu0 %v7914_v37, %s6845_s12 }
 0x5a2   : > { %3857 = vrot.lane.b32.xlu1 %v7920_v24, %s6841_s27 }
 0x5a4   : > { %3684 = vrot.lane.b32.xlu0 %v7926_v16, %s6843_s30 }
 0x5a6   : > { %4044 = vrot.lane.b32.xlu1 %v7900_v3, %s6847_s14 }
 0x5a8   : > { %3951 = vrot.lane.b32.xlu0 %v7934_v46, %s6842_s29 }
 0x5aa   : > { %3500 = vrot.lane.b32.xlu1 %v7940_v7, %s6845_s12 }
 0x5ac   : > { %3592 = vrot.lane.b32.xlu0 %v7946_v5, %s6844_s11 }
 0x5ae   : > { %3686 = vrot.lane.b32.xlu1 %v7952_v4, %s6843_s30 }
 0x5b0   : > { %4046 = vrot.lane.b32.xlu0 %v8861_v58, %s6847_s14 }
 0x5b2   : > { %3859 = vrot.lane.b32.xlu1 %v7960_v39, %s6841_s27 }
 0x5b4   : > { %3953 = vrot.lane.b32.xlu0 %v7966_v47, %s6842_s29 }
 0x5b6   : > { %4042 = vrot.lane.b32.xlu1 %v7897_v35, %s6847_s14 }
 0x5b8   : > { %4138 = vrot.lane.b32.xlu0 %v7974_v1, %s6840_s26 }
 0x5ba   : > { %4140 = vrot.lane.b32.xlu1 %v8877_v43, %s6840_s26 }
 0x5bc   : > { %4136 = vrot.lane.b32.xlu0 %v7982_v6, %s6840_s26 }
 0x5be   : > { %4225 = vperm.xlu1 %6808, %v4222_v22   ;;  %v6686_v22 = vld [vmem:[%s8796_s1 + $0xf8] sm:$0xff] }
 0x5c0   : > { %6810 = vrot.lane.b32.xlu0 %v8861_v58, %s6846_s13 }
 0x5c2   : > { %4262 = vrot.lane.b32.xlu1 %v7897_v35, %s6846_s13 }
 0x5c4   : > { %4264 = vrot.lane.b32.xlu0 %v7900_v3, %s6846_s13 }
 0x5c6   : > { %4366 = vrot.lane.b32.xlu1 %v8879_v9, %s6845_s12 }
 0x5c8   : > { %4362 = vrot.lane.b32.xlu0 %v7914_v37, %s6845_s12 }
 0x5ca   : > { %4474 = vrot.lane.b32.xlu1 %v8880_v42, %s6844_s11 }
 0x5cc   : > { %4360 = vrot.lane.b32.xlu0 %v8879_v9, %s6845_s12 }
 0x5ce   : > { %4584 = vrot.lane.b32.xlu1 %v8881_v32, %s6843_s30 }
 0x5d0   : > { %4470 = vrot.lane.b32.xlu0 %v7908_v36, %s6844_s11 }
 0x5d2   : > { %4776 = vrot.lane.b32.xlu1 %v8882_v0, %s6841_s27 }
 0x5d4   : > { %4468 = vrot.lane.b32.xlu0 %v8880_v42, %s6844_s11 }
 0x5d6   : > { %4892 = vrot.lane.b32.xlu1 %v8883_v28, %s6842_s29 }
 0x5d8   : > { %4580 = vrot.lane.b32.xlu0 %v7926_v16, %s6843_s30 }
 0x5da   : > { %4886 = vrot.lane.b32.xlu1 %v8883_v28, %s6842_s29 }
 0x5dc   : > { %4578 = vrot.lane.b32.xlu0 %v8881_v32, %s6843_s30 }
 0x5de   : > { %6815 = vrot.lane.b32.xlu1 %v8861_v58, %s6847_s14 }
 0x5e0   : > { %4782 = vrot.lane.b32.xlu0 %v8882_v0, %s6841_s27 }
 0x5e2   : > { %4364 = vrot.lane.b32.xlu1 %v7940_v7, %s6845_s12 }
 0x5e4   : > { %4772 = vrot.lane.b32.xlu0 %v7920_v24, %s6841_s27 }
 0x5e6   : > { %4472 = vrot.lane.b32.xlu1 %v7946_v5, %s6844_s11 }
 0x5e8   : > { %4882 = vrot.lane.b32.xlu0 %v7934_v46, %s6842_s29 }
 0x5ea   : > { %4582 = vrot.lane.b32.xlu1 %v7952_v4, %s6843_s30 }
 0x5ec   : > { %4988 = vrot.lane.b32.xlu0 %v7900_v3, %s6847_s14 }
 0x5f0   : > { %4774 = vrot.lane.b32.xlu0 %v7960_v39, %s6841_s27 }
 0x5f4   : > { %4884 = vrot.lane.b32.xlu0 %v7966_v47, %s6842_s29 }
 0x60c   : > { %v3412_v13 = vpop.permute.xlu1 %3411 }
 0x60d   : > { %v3415_v54 = vsel %vm359_vm4, %v3410_v60, %v3412_v13 }
 0x60e   : > { %v3414_v57 = vpop.permute.xlu0 %3413 }
 0x60f   : > { %v3416_v17 = vsel %vm359_vm4, %v3412_v13, %v3414_v57 }
 0x610   : > { %3452 = vmatprep.subr.mxu0 %v3416_v17  ;;  %v3591_v8 = vpop.permute.xlu1 %3590 }
 0x611   : > { %3453 = vmatpush1.msra.mxu0 %v3415_v54  ;;  %v3594_v44 = vsel %vm552_vm10, %v3589_v33, %v3591_v8 }
 0x612   : > { %v3499_v52 = vpop.permute.xlu0 %3498  ;;  %6680 = vmatmul.mubr.msk.f32.vlgmr.msra.gmra.mxu0 %vm364_vm5, %v6679_v15 }
 0x613   : > { %3665 = vmatprep.mubr.f32.mxu0 %v8861_v58  ;;  %v3502_v59 = vsel %vm448_vm11, %v3497_v38, %v3499_v52 }
 0x614   : > { %v3858_v40 = vpop.permute.xlu1 %3857 }
 0x616   : > { %v3685_v34 = vpop.permute.xlu0 %3684 }
 0x617   : > { %v3688_v23 = vsel %vm656_vm9, %v3683_v49, %v3685_v34  ;;  %v6688_v49 = vld [vmem:[%s8796_s1 + $0x100] sm:$0xff] }
 0x618   : > { %v4045_v29 = vpop.permute.xlu1 %4044 }
 0x61a   : > { %v3952_v48 = vpop.permute.xlu0 %3951 }
 0x61c   : > { %v3501_v20 = vpop.permute.xlu1 %3500 }
 0x61d   : > { %v3503_v11 = vsel %vm448_vm11, %v3499_v52, %v3501_v20 }
 0x61e   : > { %v3593_v25 = vpop.permute.xlu0 %3592  ;;  %3539 = vmatprep.subr.mxu1 %v3503_v11 }
 0x61f   : > { %3540 = vmatpush1.msra.mxu1 %v3502_v59  ;;  %v3595_v21 = vsel %vm552_vm10, %v3591_v8, %v3593_v25 }
 0x620   : > { %6681 = vmatmul.mubr.msk.f32.vlgmr.msra.gmra.mxu1 %vm364_vm5, %v6678_v2  ;;  %3631 = vmatprep.subr.mxu0 %v3595_v21  ;;  %v3687_v19 = vpop.permute.xlu1 %3686 }
 0x621   : > { %3632 = vmatpush1.msra.mxu0 %v3594_v44  ;;  %v3689_v14 = vsel %vm656_vm9, %v3685_v34, %v3687_v19  ;;  %3759 = vmatprep.mubr.f32.mxu1 %v8861_v58 }
 0x622   : > { %v4047_v63 = vpop.permute.xlu0 %4046  ;;  %6683 = vmatmul.mubr.msk.f32.vlgmr.msra.gmra.mxu0 %vm364_vm5, %v6682_v12  ;;  %3725 = vmatprep.subr.mxu1 %v3689_v14 }
 0x623   : > { %3803 = vmatprep.subr.mxu0 %v7900_v3  ;;  %3726 = vmatpush1.msra.mxu1 %v3688_v23  ;;  %v4049_v15 = vsel %vm1033_vm12, %v4045_v29, %v4047_v63 }
 0x624   : > { %3804 = vmatpush1.msra.mxu0 %v7897_v35  ;;  %6685 = vmatmul.mubr.msk.f32.vlgmr.msra.gmra.mxu1 %vm364_vm5, %v6684_v10  ;;  %v3860_v60 = vpop.permute.xlu1 %3859 }
 0x625   : > { %3837 = vmatprep.mubr.f32.mxu0 %v8861_v58  ;;  %v3864_v38 = vsel %vm637_vm7, %v3860_v60, %v3862_v56  ;;  %v3863_v33 = vsel %vm637_vm7, %v3858_v40, %v3860_v60  ;;  %3934 = vmatprep.mubr.f32.mxu1 %v8861_v58  ;;  %v6690_v56 = vld [vmem:[%s8796_s1 + $0x108] sm:$0xff] }
 0x626   : > { %v3954_v13 = vpop.permute.xlu0 %3953  ;;  %6687 = vmatmul.mubr.msk.f32.vlgmr.msra.gmra.mxu0 %vm364_vm5, %v6686_v22  ;;  %3900 = vmatprep.subr.mxu1 %v3864_v38 }
 0x627   : > { %3901 = vmatpush1.msra.mxu1 %v3863_v33  ;;  %v3958_v57 = vsel %vm533_vm8, %v3954_v13, %v3956_v55  ;;  %v3957_v17 = vsel %vm533_vm8, %v3952_v48, %v3954_v13  ;;  %4028 = vmatprep.mubr.f32.mxu0 %v8861_v58  ;;  %v6692_v55 = vld [vmem:[%s8796_s1 + $0x110] sm:$0xff]  ;;  %v6694_v48 = vld [vmem:[%s8796_s1 + $0x118] sm:$0xff] }
 0x628   : > { %6689 = vmatmul.mubr.msk.f32.vlgmr.msra.gmra.mxu1 %vm364_vm5, %v6688_v49  ;;  %3994 = vmatprep.subr.mxu0 %v3958_v57  ;;  %v4043_v8 = vpop.permute.xlu1 %4042 }
 0x629   : > { %4085 = vmatprep.subr.mxu1 %v4049_v15  ;;  %v4048_v54 = vsel %vm1033_vm12, %v4043_v8, %v4045_v29  ;;  %3995 = vmatpush1.msra.mxu0 %v3957_v17 }
 0x62a   : > { %v4139_v52 = vpop.permute.xlu0 %4138  ;;  %6691 = vmatmul.mubr.msk.f32.vlgmr.msra.gmra.mxu0 %vm364_vm5, %v6690_v56  ;;  %4086 = vmatpush1.msra.mxu1 %v4048_v54 }
 0x62b   : > { %4119 = vmatprep.mubr.f32.mxu1 %v8861_v58  ;;  %4213 = vmatprep.mubr.f32.mxu0 %v8861_v58 }
 0x62c   : > { %6693 = vmatmul.mubr.msk.f32.vlgmr.msra.gmra.mxu1 %vm364_vm5, %v6692_v55  ;;  %v4141_v40 = vpop.permute.xlu1 %4140 }
 0x62d   : > { %v4143_v34 = vsel %vm339_vm6, %v4139_v52, %v4141_v40  ;;  %4347 = vmatprep.mubr.f32.mxu1 %v8861_v58 }
 0x62e   : > { %v4137_v29 = vpop.permute.xlu0 %4136  ;;  %4179 = vmatprep.subr.mxu0 %v4143_v34 }
 0x62f   : > { %v4142_v20 = vsel %vm339_vm6, %v4137_v29, %v4139_v52 }
 0x630   : > { %4180 = vmatpush1.msra.mxu0 %v4142_v20 }
 0x631   : > { %6695 = vmatmul.mubr.msk.f32.vlgmr.msra.gmra.mxu0 %vm364_vm5, %v6694_v48 }
 0x632   : > { %4447 = vmatprep.mubr.f32.mxu0 %v8861_v58 }
 0x6d2   : > { %v3488_v11 = vpop.f32.mrf.mxu0 }
 0x6d4   : > { %v3490_v2 = vpop.f32.mrf.mxu0 }
 0x6e0   : > { %v3575_v25 = vpop.f32.mrf.mxu1 }
 0x6e1   : > { %v3576_v59 = vadd.f32 %v3575_v25, %v3488_v11 }
 0x6e2   : > { %v3577_v21 = vpop.f32.mrf.mxu1  ;;  %v3667_v12 = vpop.f32.mrf.mxu0 }
 0x6e3   : > { %v3578_v19 = vadd.f32 %v3577_v21, %v3490_v2  ;;  %v3672_v44 = vadd.f32 %v3667_v12, %v3576_v59  ;;  %v4226_v2 = vpop.permute.xlu1 %4225 }
 0x6e4   : > { %v3669_v14 = vpop.f32.mrf.mxu0  ;;  %v3761_v10 = vpop.f32.mrf.mxu1 }
 0x6e5   : > { %v3673_v63 = vadd.f32 %v3669_v14, %v3578_v19  ;;  %v3766_v23 = vadd.f32 %v3761_v10, %v3672_v44 }
 0x6e6   : > { %v3763_v22 = vpop.f32.mrf.mxu1  ;;  %v3839_v60 = vpop.f32.mrf.mxu0 }
 0x6e7   : > { %v3767_v38 = vadd.f32 %v3763_v22, %v3673_v63  ;;  %v3844_v33 = vadd.f32 %v3839_v60, %v3766_v23 }
 0x6e8   : > { %v3841_v49 = vpop.f32.mrf.mxu0  ;;  %v3936_v13 = vpop.f32.mrf.mxu1 }
 0x6e9   : > { %v3845_v57 = vadd.f32 %v3841_v49, %v3767_v38  ;;  %v3941_v17 = vadd.f32 %v3936_v13, %v3844_v33 }
 0x6ea   : > { %v3938_v56 = vpop.f32.mrf.mxu1  ;;  %v4030_v15 = vpop.f32.mrf.mxu0 }
 0x6eb   : > { %v3942_v8 = vadd.f32 %v3938_v56, %v3845_v57  ;;  %v4035_v54 = vadd.f32 %v4030_v15, %v3941_v17  ;;  %v8173_v15 = vpop.permute.xlu0 %6810 }
 0x6ec   : > { %v4032_v55 = vpop.f32.mrf.mxu0  ;;  %v4121_v52 = vpop.f32.mrf.mxu1 }
 0x6ed   : > { %v4036_v40 = vadd.f32 %v4032_v55, %v3942_v8  ;;  %v4126_v29 = vadd.f32 %v4121_v52, %v4035_v54  ;;  %v5192_v8 = vld [vmem:[%s8797_s2 + $0x20] sm:$0xff] }
 0x6ee   : > { %v4123_v34 = vpop.f32.mrf.mxu1 }
 0x6ef   : > { %v4127_v20 = vadd.f32 %v4123_v34, %v4036_v40  ;;  %v8184_v54 = vpop.permute.xlu0 %4264  ;;  %v8204_v40 = vpop.permute.xlu1 %4262 }
 0x6f1   : > { %v4215_v48 = vpop.f32.mrf.mxu0 }
 0x6f2   : > { %v4220_v11 = vadd.f32 %v4215_v48, %v4126_v29 }
 0x6f3   : > { %v4217_v25 = vpop.f32.mrf.mxu0  ;;  %v8194_v52 = vpop.permute.xlu0 %4362 }
 0x6f4   : > { %v4228_v59 = vadd.f32 %v4226_v2, %v4220_v11  ;;  %v4221_v21 = vadd.f32 %v4217_v25, %v4127_v20  ;;  %v8211_v29 = vpop.permute.xlu1 %4366 }
 0x6f6   : > { %vm4230_vm14 = vcmp.ge.f32.partialorder %v4228_v59, 0.0  ;;  %v4232_v12 = vmul.f32 0.1, %v4228_v59  ;;  %v4229_v19 = vadd.f32 %v4226_v2, %v4221_v21 }
 0x6f7   : > { %v8206_v34 = vpop.permute.xlu0 %4360 }
 0x6f8   : > { %v8102_v44 = vsel %vm4230_vm14, %v4228_v59, %v4232_v12  ;;  %v4233_v14 = vmul.f32 0.1, %v4229_v19  ;;  %vm4231_vm15 = vcmp.ge.f32.partialorder %v4229_v19, 0.0  ;;  %v8223_v20 = vpop.permute.xlu1 %4474 }
 0x6f9   : > { %8884 = vst [vmem:[#allocation12_spill] sm:$0xff] %v8102_v44  ;;  %4992 = vrot.lane.b32.xlu1 %v8102_v44, %s6847_s14  ;;  %4268 = vrot.lane.b32.xlu0 %v8102_v44, %s6846_s13  ;;  %v4458_v10 = vmul.f32 %v8102_v44, %v7014_v50  ;;  %v4568_v23 = vmul.f32 %v8102_v44, %v8869_v27 }
 0x6fa   : > { %v8110_v63 = vsel %vm4231_vm15, %v4229_v19, %v4233_v14  ;;  %v4248_v22 = vmul.f32 %v8102_v44, %v8867_v61  ;;  %v8123_v60 = vmul.f32 %v8868_v30, %v8102_v44  ;;  %v8135_v33 = vmul.f32 %v8870_v45, %v8102_v44 }
 0x6fb   : > { %v8131_v38 = vmul.f32 %v8871_v18, %v8110_v63  ;;  %v8147_v49 = vmul.f32 %v8110_v63, %v8875_v53  ;;  %v8151_v13 = vmul.f32 %v8872_v62, %v8110_v63  ;;  %v8159_v57 = vmul.f32 %v8878_v51, %v8102_v44  ;;  %v8213_v48 = vpop.permute.xlu0 %4470 }
 0x6fc   : > { %v8163_v17 = vmul.f32 %v8873_v26, %v8110_v63  ;;  %v8171_v56 = vmul.f32 %v8110_v63, %v8874_v31  ;;  %v8188_v55 = vmul.f32 %v8110_v63, %v8876_v41  ;;  %v8230_v2 = vpop.permute.xlu1 %4584 }
 0x6fd   : > { %4270 = vrot.lane.b32.xlu1 %v8110_v63, %s6846_s13  ;;  %4476 = vrot.lane.b32.xlu0 %v4458_v10, %s6844_s11 }
 0x6ff   : > { %v8225_v11 = vpop.permute.xlu0 %4468 }
 0x701   : > { %4586 = vrot.lane.b32.xlu0 %v4568_v23, %s6843_s30  ;;  %4368 = vrot.lane.b32.xlu1 %v4248_v22, %s6845_s12 }
 0x703   : > { %v8232_v25 = vpop.permute.xlu0 %4580 }
 0x705   : > { %4994 = vrot.lane.b32.xlu0 %v8110_v63, %s6847_s14  ;;  %4778 = vrot.lane.b32.xlu1 %v8123_v60, %s6841_s27 }
 0x707   : > { %v8244_v59 = vpop.permute.xlu0 %4578 }
 0x709   : > { %4370 = vrot.lane.b32.xlu0 %v8131_v38, %s6845_s12  ;;  %4888 = vrot.lane.b32.xlu1 %v8135_v33, %s6842_s29 }
 0x70b   : > { %v8252_v21 = vpop.permute.xlu0 %4782 }
 0x70d   : > { %5106 = vrot.lane.b32.xlu0 %v8877_v43, %s6840_s26  ;;  %4986 = vrot.lane.b32.xlu1 %v7897_v35, %s6847_s14 }
 0x711   : > { %4890 = vrot.lane.b32.xlu0 %v8147_v49, %s6842_s29  ;;  %4478 = vrot.lane.b32.xlu1 %v8151_v13, %s6844_s11 }
 0x715   : > { %5102 = vrot.lane.b32.xlu0 %v8159_v57, %s6840_s26  ;;  %4588 = vrot.lane.b32.xlu1 %v8163_v17, %s6843_s30 }
 0x719   : > { %5100 = vrot.lane.b32.xlu0 %v8877_v43, %s6840_s26  ;;  %4780 = vrot.lane.b32.xlu1 %v8171_v56, %s6841_s27 }
 0x71d   : > { %5195 = vperm.xlu0 %6787, %v5192_v8   ;;  %5098 = vrot.lane.b32.xlu1 %v7974_v1, %s6840_s26 }
 0x721   : > { %5247 = vrot.lane.b32.xlu0 %v8102_v44, %s6846_s13  ;;  %5104 = vrot.lane.b32.xlu1 %v8188_v55, %s6840_s26 }
 0x725   : > { %5241 = vrot.lane.b32.xlu0 %v7897_v35, %s6846_s13  ;;  %5096 = vrot.lane.b32.xlu1 %v7982_v6, %s6840_s26 }
 0x729   : > { %5239 = vrot.lane.b32.xlu0 %v8861_v58, %s6846_s13  ;;  %6820 = vrot.lane.b32.xlu1 %v8861_v58, %s6846_s13 }
 0x72d   : > { %5360 = vrot.lane.b32.xlu0 %v4248_v22, %s6845_s12  ;;  %5249 = vrot.lane.b32.xlu1 %v8110_v63, %s6846_s13 }
 0x731   : > { %5358 = vrot.lane.b32.xlu0 %v8879_v9, %s6845_s12  ;;  %5243 = vrot.lane.b32.xlu1 %v7900_v3, %s6846_s13 }
 0x735   : > { %5354 = vrot.lane.b32.xlu0 %v7914_v37, %s6845_s12  ;;  %5364 = vrot.lane.b32.xlu1 %v8879_v9, %s6845_s12  ;;  %v8242_v37 = vpop.permute.xlu1 %4776 }
 0x739   : > { %5484 = vrot.lane.b32.xlu0 %v4458_v10, %s6844_s11  ;;  %5488 = vrot.lane.b32.xlu1 %v8880_v42, %s6844_s11  ;;  %v6813_v10 = vunpack.i.h.bf16 %v8173_v15 }
 0x73b   : > { %v4272_v8 = vsel %vm359_vm4, %v6813_v10, %v8204_v40 }
 0x73d   : > { %5352 = vrot.lane.b32.xlu0 %v8879_v9, %s6845_s12  ;;  %5356 = vrot.lane.b32.xlu1 %v7940_v7, %s6845_s12  ;;  %v8250_v9 = vpop.permute.xlu1 %4892  ;;  %v8263_v7 = vpop.permute.xlu0 %4772 }
 0x741   : > { %5478 = vrot.lane.b32.xlu0 %v7908_v36, %s6844_s11  ;;  %5482 = vrot.lane.b32.xlu1 %v8880_v42, %s6844_s11  ;;  %v8261_v36 = vpop.permute.xlu1 %4886 }
 0x745   : > { %5476 = vrot.lane.b32.xlu0 %v8880_v42, %s6844_s11  ;;  %5480 = vrot.lane.b32.xlu1 %v7946_v5, %s6844_s11  ;;  %v8269_v5 = vpop.permute.xlu1 %6815  ;;  %v8271_v42 = vpop.permute.xlu0 %4882 }
 0x749   : > { %5610 = vrot.lane.b32.xlu0 %v4568_v23, %s6843_s30  ;;  %5614 = vrot.lane.b32.xlu1 %v8881_v32, %s6843_s30  ;;  %v6812_v23 = vunpack.i.l.bf16 %v8173_v15  ;;  %v6697_v15 = vld [vmem:[%s8796_s1 + $0x128] sm:$0xff] }
 0x74d   : > { %5608 = vrot.lane.b32.xlu0 %v8881_v32, %s6843_s30  ;;  %5604 = vrot.lane.b32.xlu1 %v7926_v16, %s6843_s30  ;;  %v4365_v16 = vpop.permute.xlu1 %4364 }
 0x751   : > { %5606 = vrot.lane.b32.xlu0 %v7952_v4, %s6843_s30  ;;  %5602 = vrot.lane.b32.xlu1 %v8881_v32, %s6843_s30  ;;  %v8281_v4 = vpop.permute.xlu0 %4988  ;;  %v4473_v32 = vpop.permute.xlu1 %4472 }
 0x755   : > { %5825 = vrot.lane.b32.xlu0 %v8882_v0, %s6841_s27  ;;  %5831 = vrot.lane.b32.xlu1 %v8882_v0, %s6841_s27  ;;  %v8287_v12 = vpop.permute.xlu0 %4774  ;;  %v8297_v19 = vpop.permute.xlu1 %4582 }
 0x759   : > { %5957 = vrot.lane.b32.xlu0 %v8883_v28, %s6842_s29  ;;  %5821 = vrot.lane.b32.xlu1 %v8123_v60, %s6841_s27  ;;  %v4273_v60 = vsel %vm359_vm4, %v8204_v40, %v8184_v54 }
 0x75d   : > { %5819 = vrot.lane.b32.xlu0 %v8882_v0, %s6841_s27  ;;  %5817 = vrot.lane.b32.xlu1 %v7960_v39, %s6841_s27  ;;  %v8299_v0 = vpop.permute.xlu0 %4884 }
 0x761   : > { %5951 = vrot.lane.b32.xlu0 %v8883_v28, %s6842_s29  ;;  %5815 = vrot.lane.b32.xlu1 %v7920_v24, %s6841_s27 }
 0x765   : > { %5947 = vrot.lane.b32.xlu0 %v8135_v33, %s6842_s29  ;;  %5943 = vrot.lane.b32.xlu1 %v7966_v47, %s6842_s29 }
 0x769   : > { %5945 = vrot.lane.b32.xlu0 %v8883_v28, %s6842_s29  ;;  %5941 = vrot.lane.b32.xlu1 %v7934_v46, %s6842_s29 }
 0x76b   : > { %v4269_v39 = vpop.permute.xlu0 %4268  ;;  %v8305_v14 = vpop.permute.xlu1 %4992 }
 0x76c   : > { %v4274_v46 = vsel %vm359_vm4, %v6812_v23, %v4269_v39 }
 0x76d   : > { %6825 = vrot.lane.b32.xlu0 %v8861_v58, %s6847_s14  ;;  %6066 = vrot.lane.b32.xlu1 %v8110_v63, %s6847_s14 }
 0x76f   : > { %v4477_v24 = vpop.permute.xlu0 %4476  ;;  %v4271_v47 = vpop.permute.xlu1 %4270 }
 0x770   : > { %v4275_v28 = vsel %vm359_vm4, %v4269_v39, %v4271_v47 }
 0x771   : > { %6064 = vrot.lane.b32.xlu0 %v8102_v44, %s6847_s14  ;;  %6200 = vrot.lane.b32.xlu1 %v8877_v43, %s6840_s26 }
 0x772   : > { %4311 = vmatprep.subr.mxu1 %v4275_v28  ;;  %v6696_v28 = vld [vmem:[%s8796_s1 + $0x120] sm:$0xff] }
 0x773   : > { %4312 = vmatpush1.msra.mxu1 %v4274_v46  ;;  %v4587_v22 = vpop.permute.xlu0 %4586  ;;  %v4369_v33 = vpop.permute.xlu1 %4368 }
 0x774   : > { %4313 = vmatprep.subr.mxu1 %v4273_v60  ;;  %v4374_v10 = vsel %vm448_vm11, %v8211_v29, %v4369_v33  ;;  %v4482_v60 = vsel %vm552_vm10, %v8223_v20, %v4477_v24 }
 0x775   : > { %4314 = vmatpush1.msra.mxu1 %v4272_v8  ;;  %6060 = vrot.lane.b32.xlu0 %v7900_v3, %s6847_s14 }
 0x776   : > { %5362 = vrot.lane.b32.xlu1 %v8131_v38, %s6845_s12  ;;  %6698 = vmatmul.mubr.msk.f32.vlgmr.msra.gmra.mxu1 %vm359_vm4, %v6697_v15  ;;  %v4373_v38 = vsel %vm448_vm11, %v8194_v52, %v4365_v16 }
 0x777   : > { %v8332_v39 = vpop.permute.xlu0 %4994  ;;  %v4779_v54 = vpop.permute.xlu1 %4778  ;;  %4555 = vmatprep.mubr.f32.mxu1 %v8861_v58 }
 0x77a   : > { %5486 = vrot.lane.b32.xlu1 %v8151_v13, %s6844_s11  ;;  %v4372_v13 = vsel %vm448_vm11, %v8206_v34, %v8194_v52  ;;  %v4481_v52 = vsel %vm552_vm10, %v8213_v48, %v4473_v32  ;;  %v4590_v32 = vsel %vm656_vm9, %v8244_v59, %v8232_v25 }
 0x77b   : > { %v4371_v47 = vpop.permute.xlu0 %4370  ;;  %v4889_v23 = vpop.permute.xlu1 %4888 }
 0x77c   : > { %v4375_v40 = vsel %vm448_vm11, %v4369_v33, %v4371_v47  ;;  %v6700_v33 = vld [vmem:[%s8796_s1 + $0x130] sm:$0xff]  ;;  %v4895_v47 = vsel %vm533_vm8, %v8299_v0, %v8261_v36 }
 0x77d   : > { %4411 = vmatprep.subr.mxu0 %v4375_v40  ;;  %v6817_v40 = vunpack.i.l.bf16 %v8269_v5  ;;  %v6708_v36 = vld [vmem:[%s8796_s1 + $0x150] sm:$0xff] }
 0x77e   : > { %5612 = vrot.lane.b32.xlu1 %v8163_v17, %s6843_s30  ;;  %4412 = vmatpush1.msra.mxu0 %v4374_v10  ;;  %v4784_v10 = vsel %vm637_vm7, %v8263_v7, %v8287_v12 }
 0x77f   : > { %4413 = vmatprep.subr.mxu0 %v4373_v38  ;;  %v8350_v46 = vpop.permute.xlu1 %4986  ;;  %v8353_v29 = vpop.permute.xlu0 %5106 }
 0x780   : > { %4414 = vmatpush1.msra.mxu0 %v4372_v13  ;;  %v6710_v13 = vld [vmem:[%s8796_s1 + $0x158] sm:$0xff] }
 0x781   : > { %6699 = vmatmul.mubr.msk.f32.vlgmr.msra.gmra.mxu0 %vm359_vm4, %v6696_v28 }
 0x782   : > { %5823 = vrot.lane.b32.xlu1 %v8171_v56, %s6841_s27  ;;  %4665 = vmatprep.mubr.f32.mxu0 %v8861_v58  ;;  %v4480_v56 = vsel %vm552_vm10, %v8225_v11, %v8213_v48  ;;  %v4591_v48 = vsel %vm656_vm9, %v8232_v25, %v8297_v19  ;;  %v6702_v11 = vld [vmem:[%s8796_s1 + $0x138] sm:$0xff]  ;;  %v6704_v19 = vld [vmem:[%s8796_s1 + $0x140] sm:$0xff] }
 0x783   : > { %v4479_v17 = vpop.permute.xlu1 %4478  ;;  %v4891_v15 = vpop.permute.xlu0 %4890 }
 0x784   : > { %v4483_v16 = vsel %vm552_vm10, %v4477_v24, %v4479_v17  ;;  %v4897_v59 = vsel %vm533_vm8, %v4891_v15, %v8250_v9  ;;  %v4896_v8 = vsel %vm533_vm8, %v4889_v23, %v4891_v15  ;;  %v6706_v9 = vld [vmem:[%s8796_s1 + $0x148] sm:$0xff]  ;;  %v6818_v23 = vunpack.i.h.bf16 %v8269_v5 }
 0x785   : > { %4519 = vmatprep.subr.mxu1 %v4483_v16  ;;  %v5001_v5 = vsel %vm1033_vm12, %v8332_v39, %v6817_v40 }
 0x786   : > { %5949 = vrot.lane.b32.xlu1 %v8147_v49, %s6842_s29  ;;  %4520 = vmatpush1.msra.mxu1 %v4482_v60  ;;  %v4592_v49 = vsel %vm656_vm9, %v8230_v2, %v4587_v22  ;;  %v4999_v28 = vsel %vm1033_vm12, %v8281_v4, %v6818_v23  ;;  %v6712_v60 = vld [vmem:[%s8796_s1 + $0x160] sm:$0xff] }
 0x787   : > { %4521 = vmatprep.subr.mxu1 %v4481_v52  ;;  %v4589_v34 = vpop.permute.xlu1 %4588  ;;  %v5103_v25 = vpop.permute.xlu0 %5102 }
 0x788   : > { %4522 = vmatpush1.msra.mxu1 %v4480_v56  ;;  %v4593_v20 = vsel %vm656_vm9, %v4587_v22, %v4589_v34 }
 0x789   : > { %4629 = vmatprep.subr.mxu0 %v4593_v20  ;;  %4707 = vmatprep.subr.mxu1 %v8110_v63 }
 0x78a   : > { %6701 = vmatmul.mubr.msk.f32.vlgmr.msra.gmra.mxu1 %vm359_vm4, %v6700_v33  ;;  %4630 = vmatpush1.msra.mxu0 %v4592_v49 }
 0x78b   : > { %4708 = vmatpush1.msra.mxu1 %v8102_v44  ;;  %4631 = vmatprep.subr.mxu0 %v4591_v48  ;;  %v4781_v2 = vpop.permute.xlu1 %4780  ;;  %v5101_v38 = vpop.permute.xlu0 %5100 }
 0x78c   : > { %4709 = vmatprep.subr.mxu1 %v7900_v3  ;;  %4632 = vmatpush1.msra.mxu0 %v4590_v32  ;;  %v4787_v24 = vsel %vm637_vm7, %v4781_v2, %v8252_v21  ;;  %v4786_v22 = vsel %vm637_vm7, %v4779_v54, %v4781_v2  ;;  %v4785_v54 = vsel %vm637_vm7, %v8287_v12, %v8242_v37 }
 0x78d   : > { %4710 = vmatpush1.msra.mxu1 %v7897_v35  ;;  %6703 = vmatmul.mubr.msk.f32.vlgmr.msra.gmra.mxu0 %vm359_vm4, %v6702_v11  ;;  %v4894_v37 = vsel %vm533_vm8, %v8271_v42, %v8299_v0  ;;  %v5000_v12 = vsel %vm1033_vm12, %v8305_v14, %v8332_v39  ;;  %v4998_v14 = vsel %vm1033_vm12, %v8350_v46, %v8281_v4 }
 0x78e   : > { %4743 = vmatprep.mubr.f32.mxu1 %v8861_v58  ;;  %4823 = vmatprep.subr.mxu0 %v4787_v24 }
 0x78f   : > { %4933 = vmatprep.subr.mxu1 %v4897_v59  ;;  %6705 = vmatmul.mubr.msk.f32.vlgmr.msra.gmra.mxu1 %vm359_vm4, %v6704_v19  ;;  %v5099_v21 = vpop.permute.xlu1 %5098 }
 0x790   : > { %4824 = vmatpush1.msra.mxu0 %v4786_v22  ;;  %4934 = vmatpush1.msra.mxu1 %v4896_v8 }
 0x791   : > { %4825 = vmatprep.subr.mxu0 %v4785_v54  ;;  %4935 = vmatprep.subr.mxu1 %v4895_v47 }
 0x792   : > { %4826 = vmatpush1.msra.mxu0 %v4784_v10  ;;  %4859 = vmatprep.mubr.f32.mxu0 %v8861_v58 }
 0x793   : > { %4936 = vmatpush1.msra.mxu1 %v4894_v37  ;;  %6707 = vmatmul.mubr.msk.f32.vlgmr.msra.gmra.mxu0 %vm359_vm4, %v6706_v9  ;;  %v5105_v7 = vpop.permute.xlu1 %5104 }
 0x794   : > { %5037 = vmatprep.subr.mxu0 %v5001_v5  ;;  %4969 = vmatprep.mubr.f32.mxu1 %v8861_v58  ;;  %v5111_v42 = vsel %vm339_vm6, %v5105_v7, %v8353_v29  ;;  %v5110_v0 = vsel %vm339_vm6, %v5103_v25, %v5105_v7  ;;  %v5109_v29 = vsel %vm339_vm6, %v5099_v21, %v5101_v38 }
 0x795   : > { %5038 = vmatpush1.msra.mxu0 %v5000_v12  ;;  %6709 = vmatmul.mubr.msk.f32.vlgmr.msra.gmra.mxu1 %vm359_vm4, %v6708_v36 }
 0x796   : > { %5039 = vmatprep.subr.mxu0 %v4999_v28  ;;  %5073 = vmatprep.mubr.f32.mxu0 %v8861_v58 }
 0x797   : > { %5040 = vmatpush1.msra.mxu0 %v4998_v14  ;;  %5147 = vmatprep.subr.mxu1 %v5111_v42  ;;  %v5097_v39 = vpop.permute.xlu1 %5096 }
 0x798   : > { %6711 = vmatmul.mubr.msk.f32.vlgmr.msra.gmra.mxu0 %vm359_vm4, %v6710_v13  ;;  %5148 = vmatpush1.msra.mxu1 %v5110_v0  ;;  %v5108_v17 = vsel %vm339_vm6, %v5097_v39, %v5099_v21  ;;  %v8444_v16 = vpop.permute.xlu0 %5195 }
 0x799   : > { %5149 = vmatprep.subr.mxu1 %v5109_v29  ;;  %5183 = vmatprep.mubr.f32.mxu1 %v8861_v58 }
 0x79a   : > { %5150 = vmatpush1.msra.mxu1 %v5108_v17  ;;  %5336 = vmatprep.mubr.f32.mxu0 %v8861_v58 }
 0x79b   : > { %6713 = vmatmul.mubr.msk.f32.vlgmr.msra.gmra.mxu1 %vm359_vm4, %v6712_v60  ;;  %v8452_v4 = vpop.permute.xlu1 %6820 }
 0x79c   : > { %v6823_v46 = vunpack.i.h.bf16 %v8452_v4  ;;  %v5248_v52 = vpop.permute.xlu0 %5247  ;;  %5449 = vmatprep.mubr.f32.mxu1 %v8861_v58 }
 0x79e   : > { %v8457_v56 = vsel %vm359_vm4, %v6823_v46, %v5248_v52 }
 0x79f   : > { %v5250_v34 = vpop.permute.xlu1 %5249 }
 0x7a0   : > { %v5242_v33 = vpop.permute.xlu0 %5241  ;;  %v8460_v15 = vsel %vm359_vm4, %v5248_v52, %v5250_v34 }
 0x7a3   : > { %v5244_v20 = vpop.permute.xlu1 %5243 }
 0x7a4   : > { %v5240_v49 = vpop.permute.xlu0 %5239  ;;  %v8463_v48 = vsel %vm359_vm4, %v5242_v33, %v5244_v20 }
 0x7a5   : > { %v8466_v11 = vsel %vm359_vm4, %v5240_v49, %v5242_v33 }
 0x7a7   : > { %v8468_v32 = vpop.permute.xlu1 %5364 }
 0x7a8   : > { %v8470_v2 = vpop.permute.xlu0 %5360 }
 0x7ab   : > { %v8472_v24 = vpop.permute.xlu1 %5488 }
 0x7ac   : > { %v5359_v19 = vpop.permute.xlu0 %5358 }
 0x7ad   : > { %v8476_v22 = vsel %vm448_vm11, %v5359_v19, %v8470_v2 }
 0x7af   : > { %v5357_v25 = vpop.permute.xlu1 %5356 }
 0x7b0   : > { %v5355_v59 = vpop.permute.xlu0 %5354 }
 0x7b1   : > { %v8479_v8 = vsel %vm448_vm11, %v5355_v59, %v5357_v25 }
 0x7b3   : > { %v5483_v21 = vpop.permute.xlu1 %5482 }
 0x7b4   : > { %v8481_v54 = vpop.permute.xlu0 %5484 }
 0x7b5   : > { %v8485_v47 = vsel %vm552_vm10, %v5483_v21, %v8481_v54 }
 0x7b7   : > { %v5481_v9 = vpop.permute.xlu1 %5480 }
 0x7b8   : > { %v5353_v23 = vpop.permute.xlu0 %5352 }
 0x7b9   : > { %v8488_v40 = vsel %vm448_vm11, %v5353_v23, %v5355_v59 }
 0x7bb   : > { %v8490_v10 = vpop.permute.xlu1 %5614 }
 0x7bc   : > { %v5479_v37 = vpop.permute.xlu0 %5478 }
 0x7bd   : > { %v8493_v36 = vsel %vm552_vm10, %v5479_v37, %v5481_v9 }
 0x7bf   : > { %v5605_v5 = vpop.permute.xlu1 %5604 }
 0x7c0   : > { %v5477_v7 = vpop.permute.xlu0 %5476 }
 0x7c1   : > { %v8496_v12 = vsel %vm552_vm10, %v5477_v7, %v5479_v37 }
 0x7c3   : > { %v5603_v38 = vpop.permute.xlu1 %5602 }
 0x7c4   : > { %v8499_v42 = vsel %vm656_vm9, %v5603_v38, %v5605_v5  ;;  %v8501_v0 = vpop.permute.xlu0 %5610 }
 0x7c5   : > { %8885 = vst [vmem:[#allocation5_spill] sm:$0xff] %v8499_v42 }
 0x7c7   : > { %v8503_v28 = vpop.permute.xlu1 %5831 }
 0x7c8   : > { %8886 = vst [vmem:[#allocation14_spill] sm:$0xff] %v8503_v28  ;;  %v5609_v13 = vpop.permute.xlu0 %5608 }
 0x7c9   : > { %v8507_v14 = vsel %vm656_vm9, %v5609_v13, %v8501_v0 }
 0x7cb   : > { %v8509_v39 = vpop.permute.xlu1 %5821 }
 0x7cc   : > { %8887 = vst [vmem:[#allocation7_spill] sm:$0xff] %v8509_v39  ;;  %v5607_v29 = vpop.permute.xlu0 %5606 }
 0x7cd   : > { %v8512_v17 = vsel %vm656_vm9, %v5605_v5, %v5607_v29 }
 0x7cf   : > { %v5818_v60 = vpop.permute.xlu1 %5817 }
 0x7d0   : > { %v8514_v46 = vpop.permute.xlu0 %5825 }
 0x7d1   : > { %8888 = vst [vmem:[#allocation8_spill] sm:$0xff] %v8514_v46 }
 0x7d3   : > { %v5816_v52 = vpop.permute.xlu1 %5815 }
 0x7d4   : > { %v8517_v34 = vsel %vm637_vm7, %v5816_v52, %v5818_v60  ;;  %v8519_v33 = vpop.permute.xlu0 %5957 }
 0x7d5   : > { %8889 = vst [vmem:[#allocation9_spill] sm:$0xff] %v8517_v34  ;;  %8890 = vst [vmem:[#allocation10_spill] sm:$0xff] %v8519_v33 }
 0x7d7   : > { %v8521_v20 = vpop.permute.xlu1 %5943 }
 0x7d8   : > { %8891 = vst [vmem:[#allocation16_spill] sm:$0xff] %v8521_v20  ;;  %v5820_v49 = vpop.permute.xlu0 %5819 }
 0x7d9   : > { %v8524_v19 = vsel %vm637_vm7, %v5818_v60, %v5820_v49 }
 0x7da   : > { %8892 = vst [vmem:[#allocation17_spill] sm:$0xff] %v8524_v19 }
 0x7db   : > { %v5942_v25 = vpop.permute.xlu1 %5941 }
 0x7dc   : > { %v8528_v59 = vsel %vm533_vm8, %v5942_v25, %v8521_v20 }
 0x7dd   : > { %8893 = vst [vmem:[#allocation18_spill] sm:$0xff] %v8528_v59 }
 0x836   : > { %v4349_v21 = vpop.f32.mrf.mxu1 }
 0x838   : > { %v4351_v23 = vpop.f32.mrf.mxu1 }
 0x841   : > { %v4449_v9 = vpop.f32.mrf.mxu0 }
 0x842   : > { %v4450_v5 = vadd.f32 %v4449_v9, %v4349_v21 }
 0x843   : > { %v4451_v37 = vpop.f32.mrf.mxu0 }
 0x844   : > { %v4452_v7 = vadd.f32 %v4451_v37, %v4351_v23 }
 0x84a   : > { %v4557_v38 = vpop.f32.mrf.mxu1 }
 0x84b   : > { %v4562_v13 = vadd.f32 %v4557_v38, %v4450_v5 }
 0x84c   : > { %v4559_v29 = vpop.f32.mrf.mxu1 }
 0x84d   : > { %v4563_v52 = vadd.f32 %v4559_v29, %v4452_v7  ;;  %v4667_v34 = vpop.f32.mrf.mxu0 }
 0x84e   : > { %v4672_v39 = vadd.f32 %v4667_v34, %v4562_v13 }
 0x84f   : > { %v4669_v46 = vpop.f32.mrf.mxu0  ;;  %v4745_v60 = vpop.f32.mrf.mxu1 }
 0x850   : > { %v4673_v49 = vadd.f32 %v4669_v46, %v4563_v52  ;;  %v4750_v19 = vadd.f32 %v4745_v60, %v4672_v39 }
 0x851   : > { %v4747_v28 = vpop.f32.mrf.mxu1 }
 0x852   : > { %v4751_v33 = vadd.f32 %v4747_v28, %v4673_v49 }
 0x853   : > { %v4861_v25 = vpop.f32.mrf.mxu0 }
 0x854   : > { %v4866_v59 = vadd.f32 %v4861_v25, %v4750_v19 }
 0x855   : > { %v4863_v20 = vpop.f32.mrf.mxu0  ;;  %v4971_v3 = vpop.f32.mrf.mxu1 }
 0x856   : > { %v4867_v44 = vadd.f32 %v4863_v20, %v4751_v33  ;;  %v4976_v42 = vadd.f32 %v4971_v3, %v4866_v59 }
 0x857   : > { %v4973_v21 = vpop.f32.mrf.mxu1 }
 0x858   : > { %v4977_v9 = vadd.f32 %v4973_v21, %v4867_v44  ;;  %v5075_v23 = vpop.f32.mrf.mxu0 }
 0x859   : > { %v5080_v37 = vadd.f32 %v5075_v23, %v4976_v42 }
 0x85a   : > { %v5077_v5 = vpop.f32.mrf.mxu0 }
 0x85b   : > { %v5185_v7 = vpop.f32.mrf.mxu1  ;;  %v5081_v38 = vadd.f32 %v5077_v5, %v4977_v9  ;;  %v6822_v5 = vunpack.i.l.bf16 %v8452_v4  ;;  %v6715_v4 = vld [vmem:[%s8796_s1 + $0x170] sm:$0xff] }
 0x85c   : > { %v5190_v34 = vadd.f32 %v5185_v7, %v5080_v37 }
 0x85d   : > { %v5187_v13 = vpop.f32.mrf.mxu1 }
 0x85e   : > { %v5198_v46 = vadd.f32 %v8444_v16, %v5190_v34  ;;  %v5191_v39 = vadd.f32 %v5187_v13, %v5081_v38 }
 0x860   : > { %vm5200_vm0 = vcmp.ge.f32.partialorder %v5198_v46, 0.0  ;;  %v5202_v28 = vmul.f32 0.1, %v5198_v46  ;;  %v5199_v19 = vadd.f32 %v8444_v16, %v5191_v39 }
 0x862   : > { %v8532_v29 = vsel %vm5200_vm0, %v5198_v46, %v5202_v28  ;;  %v5203_v33 = vmul.f32 0.1, %v5199_v19  ;;  %vm5201_vm2 = vcmp.ge.f32.partialorder %v5199_v19, 0.0 }
 0x863   : > { %6070 = vrot.lane.b32.xlu0 %v8532_v29, %s6847_s14  ;;  %5253 = vrot.lane.b32.xlu1 %v8532_v29, %s6846_s13  ;;  %v6170_v44 = vmul.f32 %v8878_v51, %v8532_v29  ;;  %v5224_v16 = vmul.f32 %v8532_v29, %v8867_v61  ;;  %v5463_v42 = vmul.f32 %v8532_v29, %v7014_v50 }
 0x864   : > { %v8538_v3 = vsel %vm5201_vm2, %v5199_v19, %v5203_v33  ;;  %v5589_v51 = vmul.f32 %v8532_v29, %v8869_v27  ;;  %v5801_v50 = vmul.f32 %v8868_v30, %v8532_v29  ;;  %v5927_v27 = vmul.f32 %v8870_v45, %v8532_v29 }
 0x865   : > { %v5225_v20 = vmul.f32 %v8871_v18, %v8538_v3  ;;  %v5464_v61 = vmul.f32 %v8872_v62, %v8538_v3  ;;  %v5590_v18 = vmul.f32 %v8873_v26, %v8538_v3  ;;  %v5928_v62 = vmul.f32 %v8538_v3, %v8875_v53  ;;  %v6290_v26 = vld [vmem:[%s8797_s2 + $0x28] sm:$0xff] }
 0x866   : > { %v5802_v30 = vmul.f32 %v8538_v3, %v8874_v31  ;;  %v6171_v45 = vmul.f32 %v8538_v3, %v8876_v41  ;;  %v6546_v31 = vld [vmem:[%s8801_s6] sm:$0xff]  ;;  %v6315_v53 = vld [vmem:[%s8799_s4 + $0x8] sm:$0xff]  ;;  %v8605_v41 = vpop.permute.xlu1 %6066 }
 0x867   : > { %6072 = vrot.lane.b32.xlu1 %v8538_v3, %s6847_s14  ;;  %5255 = vrot.lane.b32.xlu0 %v8538_v3, %s6846_s13 }
 0x86b   : > { %6196 = vrot.lane.b32.xlu1 %v6170_v44, %s6840_s26  ;;  %5366 = vrot.lane.b32.xlu0 %v5224_v16, %s6845_s12  ;;  %v6714_v16 = vld [vmem:[%s8796_s1 + $0x168] sm:$0xff] }
 0x86f   : > { %5490 = vrot.lane.b32.xlu0 %v5463_v42, %s6844_s11  ;;  %5368 = vrot.lane.b32.xlu1 %v5225_v20, %s6845_s12 }
 0x873   : > { %5616 = vrot.lane.b32.xlu0 %v5589_v51, %s6843_s30  ;;  %5492 = vrot.lane.b32.xlu1 %v5464_v61, %s6844_s11  ;;  %v8896_v61 = vld [vmem:[#allocation20_spill] sm:$0xff] }
 0x877   : > { %5827 = vrot.lane.b32.xlu0 %v5801_v50, %s6841_s27  ;;  %5618 = vrot.lane.b32.xlu1 %v5590_v18, %s6843_s30 }
 0x87b   : > { %5953 = vrot.lane.b32.xlu0 %v5927_v27, %s6842_s29  ;;  %6062 = vrot.lane.b32.xlu1 %v8861_v58, %s6847_s14 }
 0x87f   : > { %6192 = vrot.lane.b32.xlu0 %v8188_v55, %s6840_s26  ;;  %5955 = vrot.lane.b32.xlu1 %v5928_v62, %s6842_s29 }
 0x883   : > { %5829 = vrot.lane.b32.xlu0 %v5802_v30, %s6841_s27  ;;  %6194 = vrot.lane.b32.xlu1 %v8877_v43, %s6840_s26 }
 0x887   : > { %6058 = vrot.lane.b32.xlu0 %v7897_v35, %s6847_s14  ;;  %6190 = vrot.lane.b32.xlu1 %v8159_v57, %s6840_s26  ;;  %v8609_v57 = vpop.permute.xlu1 %6200 }
 0x88b   : > { %6198 = vrot.lane.b32.xlu0 %v6171_v45, %s6840_s26  ;;  %6188 = vrot.lane.b32.xlu1 %v8877_v43, %s6840_s26  ;;  %v8607_v43 = vpop.permute.xlu0 %5951  ;;  %v5363_v55 = vpop.permute.xlu1 %5362 }
 0x88f   : > { %6186 = vrot.lane.b32.xlu0 %v7974_v1, %s6840_s26  ;;  %6293 = vperm.xlu1 %6808, %v6290_v26   ;;  %v8611_v1 = vpop.permute.xlu0 %5947  ;;  %v5487_v52 = vpop.permute.xlu1 %5486 }
 0x893   : > { %6184 = vrot.lane.b32.xlu0 %v7982_v6, %s6840_s26  ;;  %6549 = vperm.xlu1 %6808, %v6546_v31   ;;  %v8613_v59 = vpop.permute.xlu0 %5945  ;;  %v5613_v6 = vpop.permute.xlu1 %5612  ;;  %v8898_v31 = vld [vmem:[#allocation14_spill] sm:$0xff] }
 0x897   : > { %6318 = vperm.xlu0 %6787, %v6315_v53   ;;  %v8615_v60 = vpop.permute.xlu0 %6825  ;;  %v8619_v25 = vpop.permute.xlu1 %5823 }
 0x89b   : > { %v8617_v49 = vpop.permute.xlu0 %6064  ;;  %v8623_v9 = vpop.permute.xlu1 %5949 }
 0x89c   : > { %v5962_v62 = vsel %vm533_vm8, %v8623_v9, %v8607_v43  ;;  %v5961_v45 = vsel %vm533_vm8, %v8611_v1, %v8623_v9  ;;  %v6726_v43 = vld [vmem:[%s8796_s1 + $0x198] sm:$0xff]  ;;  %v8901_v9 = vld [vmem:[#allocation7_spill] sm:$0xff] }
 0x89f   : > { %v8621_v21 = vpop.permute.xlu0 %6060 }
 0x8d5   : > { %v8625_v23 = vpop.permute.xlu0 %6070  ;;  %v5254_v37 = vpop.permute.xlu1 %5253 }
 0x8d6   : > { %v5261_v13 = vsel %vm359_vm4, %v6822_v5, %v5254_v37  ;;  %v8902_v5 = vld [vmem:[#allocation18_spill] sm:$0xff] }
 0x8d9   : > { %v8628_v7 = vpop.permute.xlu1 %6072  ;;  %v5256_v38 = vpop.permute.xlu0 %5255 }
 0x8da   : > { %v5262_v34 = vsel %vm359_vm4, %v5254_v37, %v5256_v38  ;;  %v5835_v37 = vsel %vm637_vm7, %v8901_v9, %v8619_v25 }
 0x8db   : > { %5298 = vmatprep.subr.mxu0 %v5262_v34  ;;  %v6827_v34 = vunpack.i.l.bf16 %v8615_v60 }
 0x8dc   : > { %5299 = vmatpush1.msra.mxu0 %v5261_v13  ;;  %v6724_v13 = vld [vmem:[%s8796_s1 + $0x190] sm:$0xff] }
 0x8dd   : > { %v8632_v46 = vpop.permute.xlu1 %6196  ;;  %5300 = vmatprep.subr.mxu0 %v8460_v15  ;;  %v5367_v39 = vpop.permute.xlu0 %5366 }
 0x8de   : > { %5301 = vmatpush1.msra.mxu0 %v8457_v56  ;;  %v5374_v15 = vsel %vm448_vm11, %v8468_v32, %v5367_v39  ;;  %v5373_v56 = vsel %vm448_vm11, %v8470_v2, %v5363_v55  ;;  %v5497_v32 = vsel %vm552_vm10, %v8481_v54, %v5487_v52  ;;  %v5623_v54 = vsel %vm656_vm9, %v8501_v0, %v5613_v6  ;;  %v8899_v55 = vld [vmem:[#allocation16_spill] sm:$0xff] }
 0x8df   : > { %5302 = vmatprep.subr.mxu0 %v8463_v48  ;;  %v5960_v52 = vsel %vm533_vm8, %v8899_v55, %v8613_v59  ;;  %v8900_v6 = vld [vmem:[#allocation8_spill] sm:$0xff]  ;;  %v6828_v59 = vunpack.i.h.bf16 %v8615_v60  ;;  %v6080_v60 = vsel %vm1033_vm12, %v8625_v23, %v8628_v7  ;;  %v6078_v23 = vsel %vm1033_vm12, %v8617_v49, %v8605_v41 }
 0x8e0   : > { %5303 = vmatpush1.msra.mxu0 %v8466_v11  ;;  %v5836_v1 = vsel %vm637_vm7, %v8619_v25, %v8900_v6  ;;  %v8904_v25 = vld [vmem:[#allocation9_spill] sm:$0xff] }
 0x8e1   : > { %v5491_v28 = vpop.permute.xlu0 %5490  ;;  %v5369_v19 = vpop.permute.xlu1 %5368  ;;  %6716 = vmatmul.mubr.msk.f32.vlgmr.msra.gmra.mxu0 %vm2263_vm1, %v6715_v4  ;;  %v8903_v4 = vld [vmem:[#allocation17_spill] sm:$0xff] }
 0x8e2   : > { %v5375_v33 = vsel %vm448_vm11, %v5367_v39, %v5369_v19  ;;  %5573 = vmatprep.mubr.f32.mxu0 %v8861_v58  ;;  %v5498_v42 = vsel %vm552_vm10, %v8472_v24, %v5491_v28 }
 0x8e3   : > { %5411 = vmatprep.subr.mxu1 %v5375_v33 }
 0x8e4   : > { %5412 = vmatpush1.msra.mxu1 %v5374_v15  ;;  %v6079_v15 = vsel %vm1033_vm12, %v8605_v41, %v6828_v59 }
 0x8e5   : > { %v5617_v44 = vpop.permute.xlu0 %5616  ;;  %5413 = vmatprep.subr.mxu1 %v5373_v56  ;;  %v5493_v48 = vpop.permute.xlu1 %5492 }
 0x8e6   : > { %5414 = vmatpush1.msra.mxu1 %v8476_v22  ;;  %v5499_v11 = vsel %vm552_vm10, %v5491_v28, %v5493_v48  ;;  %v5624_v24 = vsel %vm656_vm9, %v8490_v10, %v5617_v44  ;;  %v6720_v10 = vld [vmem:[%s8796_s1 + $0x180] sm:$0xff]  ;;  %v6081_v28 = vsel %vm1033_vm12, %v8628_v7, %v6827_v34 }
 0x8e7   : > { %5415 = vmatprep.subr.mxu1 %v8479_v8  ;;  %5535 = vmatprep.subr.mxu0 %v5499_v11  ;;  %v6718_v8 = vld [vmem:[%s8796_s1 + $0x178] sm:$0xff] }
 0x8e8   : > { %5416 = vmatpush1.msra.mxu1 %v8488_v40  ;;  %5536 = vmatpush1.msra.mxu0 %v5498_v42 }
 0x8e9   : > { %v5828_v2 = vpop.permute.xlu0 %5827  ;;  %5537 = vmatprep.subr.mxu0 %v5497_v32  ;;  %v5619_v22 = vpop.permute.xlu1 %5618  ;;  %6717 = vmatmul.mubr.msk.f32.vlgmr.msra.gmra.mxu1 %vm2263_vm1, %v6714_v16 }
 0x8ea   : > { %5538 = vmatpush1.msra.mxu0 %v8485_v47  ;;  %v5625_v20 = vsel %vm656_vm9, %v5617_v44, %v5619_v22  ;;  %5699 = vmatprep.mubr.f32.mxu1 %v8861_v58 }
 0x8eb   : > { %5539 = vmatprep.subr.mxu0 %v8493_v36  ;;  %5661 = vmatprep.subr.mxu1 %v5625_v20  ;;  %v8894_v36 = vld [vmem:[#allocation5_spill] sm:$0xff] }
 0x8ec   : > { %5540 = vmatpush1.msra.mxu0 %v8496_v12  ;;  %5662 = vmatpush1.msra.mxu1 %v5624_v24  ;;  %v8895_v12 = vld [vmem:[#allocation12_spill] sm:$0xff] }
 0x8ed   : > { %v5954_v47 = vpop.permute.xlu0 %5953  ;;  %5663 = vmatprep.subr.mxu1 %v5623_v54  ;;  %5739 = vmatprep.subr.mxu0 %v8538_v3  ;;  %v8673_v40 = vpop.permute.xlu1 %6062 }
 0x8ee   : > { %6719 = vmatmul.mubr.msk.f32.vlgmr.msra.gmra.mxu0 %vm2263_vm1, %v6718_v8  ;;  %5664 = vmatpush1.msra.mxu1 %v8507_v14  ;;  %v6722_v14 = vld [vmem:[%s8796_s1 + $0x188] sm:$0xff]  ;;  %v6077_v7 = vsel %vm1033_vm12, %v8621_v21, %v8673_v40 }
 0x8ef   : > { %5740 = vmatpush1.msra.mxu0 %v8532_v29  ;;  %5665 = vmatprep.subr.mxu1 %v8512_v17  ;;  %v8897_v17 = vld [vmem:[#allocation10_spill] sm:$0xff] }
 0x8f0   : > { %5741 = vmatprep.subr.mxu0 %v8110_v63  ;;  %5666 = vmatpush1.msra.mxu1 %v8894_v36 }
 0x8f1   : > { %5742 = vmatpush1.msra.mxu0 %v8895_v12  ;;  %v6193_v0 = vpop.permute.xlu0 %6192  ;;  %v5956_v51 = vpop.permute.xlu1 %5955  ;;  %6721 = vmatmul.mubr.msk.f32.vlgmr.msra.gmra.mxu1 %vm2263_vm1, %v6720_v10 }
 0x8f2   : > { %5743 = vmatprep.subr.mxu0 %v8896_v61  ;;  %v5963_v50 = vsel %vm533_vm8, %v5954_v47, %v5956_v51  ;;  %5777 = vmatprep.mubr.f32.mxu0 %v8861_v58  ;;  %v5964_v18 = vsel %vm533_vm8, %v5956_v51, %v8897_v17 }
 0x8f3   : > { %5744 = vmatpush1.msra.mxu0 %v7897_v35  ;;  %5912 = vmatprep.mubr.f32.mxu1 %v8861_v58 }
 0x8f4   : > { %6000 = vmatprep.subr.mxu0 %v5964_v18  ;;  %6723 = vmatmul.mubr.msk.f32.vlgmr.msra.gmra.mxu0 %vm2263_vm1, %v6722_v14 }
 0x8f5   : > { %6001 = vmatpush1.msra.mxu0 %v5963_v50  ;;  %v5830_v27 = vpop.permute.xlu0 %5829  ;;  %v6195_v30 = vpop.permute.xlu1 %6194  ;;  %6038 = vmatprep.mubr.f32.mxu0 %v8861_v58 }
 0x8f6   : > { %v5837_v26 = vsel %vm637_vm7, %v5828_v2, %v5830_v27  ;;  %6002 = vmatprep.subr.mxu0 %v5962_v62  ;;  %v5838_v53 = vsel %vm637_vm7, %v5830_v27, %v8898_v31 }
 0x8f7   : > { %6003 = vmatpush1.msra.mxu0 %v5961_v45  ;;  %5874 = vmatprep.subr.mxu1 %v5838_v53 }
 0x8f8   : > { %6004 = vmatprep.subr.mxu0 %v5960_v52  ;;  %5875 = vmatpush1.msra.mxu1 %v5837_v26 }
 0x8f9   : > { %6005 = vmatpush1.msra.mxu0 %v8902_v5  ;;  %v6059_v38 = vpop.permute.xlu0 %6058  ;;  %5876 = vmatprep.subr.mxu1 %v5836_v1  ;;  %v6191_v39 = vpop.permute.xlu1 %6190 }
 0x8fa   : > { %5877 = vmatpush1.msra.mxu1 %v5835_v37  ;;  %6727 = vmatmul.mubr.msk.f32.vlgmr.msra.gmra.mxu0 %vm2263_vm1, %v6726_v43  ;;  %v6076_v44 = vsel %vm1033_vm12, %v6059_v38, %v8621_v21  ;;  %v6204_v48 = vsel %vm339_vm6, %v6191_v39, %v6193_v0  ;;  %v6730_v21 = vld [vmem:[%s8796_s1 + $0x1a8] sm:$0xff] }
 0x8fb   : > { %5878 = vmatprep.subr.mxu1 %v8903_v4  ;;  %6281 = vmatprep.mubr.f32.mxu0 %v8861_v58 }
 0x8fc   : > { %5879 = vmatpush1.msra.mxu1 %v8904_v25 }
 0x8fd   : > { %v6199_v19 = vpop.permute.xlu0 %6198  ;;  %6725 = vmatmul.mubr.msk.f32.vlgmr.msra.gmra.mxu1 %vm2263_vm1, %v6724_v13  ;;  %6117 = vmatprep.subr.mxu1 %v6081_v28  ;;  %v6189_v41 = vpop.permute.xlu1 %6188 }
 0x8fe   : > { %v6206_v33 = vsel %vm339_vm6, %v8632_v46, %v6199_v19  ;;  %6118 = vmatpush1.msra.mxu1 %v6080_v60  ;;  %v6207_v56 = vsel %vm339_vm6, %v6199_v19, %v8609_v57  ;;  %6155 = vmatprep.mubr.f32.mxu1 %v8861_v58  ;;  %v6205_v46 = vsel %vm339_vm6, %v6193_v0, %v6195_v30  ;;  %v6728_v57 = vld [vmem:[%s8796_s1 + $0x1a0] sm:$0xff]  ;;  %v6314_v19 = vld [vmem:[%s8798_s3 + $0x8] sm:$0xff] }
 0x8ff   : > { %6119 = vmatprep.subr.mxu1 %v6079_v15  ;;  %6243 = vmatprep.subr.mxu0 %v6207_v56 }
 0x900   : > { %6120 = vmatpush1.msra.mxu1 %v6078_v23  ;;  %6244 = vmatpush1.msra.mxu0 %v6206_v33 }
 0x901   : > { %v6187_v49 = vpop.permute.xlu0 %6186  ;;  %6121 = vmatprep.subr.mxu1 %v6077_v7  ;;  %6245 = vmatprep.subr.mxu0 %v6205_v46  ;;  %v3393_v7 = vld [vmem:[%s8800_s5] sm:$0xff] }
 0x902   : > { %6122 = vmatpush1.msra.mxu1 %v6076_v44  ;;  %6246 = vmatpush1.msra.mxu0 %v6204_v48  ;;  %v6203_v11 = vsel %vm339_vm6, %v6187_v49, %v6189_v41 }
 0x903   : > { %6729 = vmatmul.mubr.msk.f32.vlgmr.msra.gmra.mxu1 %vm2263_vm1, %v6728_v57  ;;  %6247 = vmatprep.subr.mxu0 %v6203_v11 }
 0x904   : > { %6388 = vmatprep.mubr.f32.mxu1 %v8861_v58 }
 0x905   : > { %v6185_v16 = vpop.permute.xlu0 %6184 }
 0x906   : > { %v6202_v42 = vsel %vm339_vm6, %v6185_v16, %v6187_v49 }
 0x907   : > { %6248 = vmatpush1.msra.mxu0 %v6202_v42 }
 0x908   : > { %6731 = vmatmul.mubr.msk.f32.vlgmr.msra.gmra.mxu0 %vm2263_vm1, %v6730_v21 }
 0x909   : > { %6465 = vmatprep.mubr.f32.mxu0 %v8861_v58 }
 0x90a   : > { %v6294_v38 = vpop.permute.xlu1 %6293 }
 0x90e   : > { %v6550_v41 = vpop.permute.xlu1 %6549 }
 0x912   : > { %v6319_v15 = vpop.permute.xlu0 %6318 }
 0x9a1   : > { %v5338_v32 = vpop.f32.mrf.mxu0 }
 0x9a3   : > { %v5340_v2 = vpop.f32.mrf.mxu0 }
 0x9a9   : > { %v5451_v22 = vpop.f32.mrf.mxu1 }
 0x9aa   : > { %v5452_v8 = vadd.f32 %v5451_v22, %v5338_v32 }
 0x9ab   : > { %v5453_v20 = vpop.f32.mrf.mxu1 }
 0x9ac   : > { %v5454_v54 = vadd.f32 %v5453_v20, %v5340_v2 }
 0x9ae   : > { %v5575_v24 = vpop.f32.mrf.mxu0 }
 0x9af   : > { %v5580_v10 = vadd.f32 %v5575_v24, %v5452_v8 }
 0x9b0   : > { %v5577_v47 = vpop.f32.mrf.mxu0 }
 0x9b1   : > { %v5701_v40 = vpop.f32.mrf.mxu1  ;;  %v5581_v36 = vadd.f32 %v5577_v47, %v5454_v54 }
 0x9b2   : > { %v5706_v14 = vadd.f32 %v5701_v40, %v5580_v10 }
 0x9b3   : > { %v5703_v0 = vpop.f32.mrf.mxu1 }
 0x9b4   : > { %v5779_v51 = vpop.f32.mrf.mxu0  ;;  %v5707_v50 = vadd.f32 %v5703_v0, %v5581_v36 }
 0x9b5   : > { %v5784_v27 = vadd.f32 %v5779_v51, %v5706_v14 }
 0x9b6   : > { %v5781_v18 = vpop.f32.mrf.mxu0 }
 0x9b7   : > { %v5785_v45 = vadd.f32 %v5781_v18, %v5707_v50 }
 0x9ba   : > { %v6040_v30 = vpop.f32.mrf.mxu0 }
 0x9bc   : > { %v6042_v55 = vpop.f32.mrf.mxu0 }
 0x9bd   : > { %v5914_v17 = vpop.f32.mrf.mxu1 }
 0x9be   : > { %v5919_v26 = vadd.f32 %v5914_v17, %v5784_v27 }
 0x9bf   : > { %v5916_v62 = vpop.f32.mrf.mxu1 }
 0x9c0   : > { %v5920_v31 = vadd.f32 %v5916_v62, %v5785_v45  ;;  %v6045_v52 = vadd.f32 %v6040_v30, %v5919_v26 }
 0x9c2   : > { %v6046_v6 = vadd.f32 %v6042_v55, %v5920_v31 }
 0x9c3   : > { %v6157_v53 = vpop.f32.mrf.mxu1 }
 0x9c4   : > { %v6162_v1 = vadd.f32 %v6157_v53, %v6045_v52 }
 0x9c5   : > { %v6159_v43 = vpop.f32.mrf.mxu1 }
 0x9c6   : > { %v6163_v37 = vadd.f32 %v6159_v43, %v6046_v6 }
 0x9c8   : > { %v6283_v9 = vpop.f32.mrf.mxu0 }
 0x9c9   : > { %v6288_v5 = vadd.f32 %v6283_v9, %v6162_v1 }
 0x9ca   : > { %v6285_v59 = vpop.f32.mrf.mxu0 }
 0x9cb   : > { %v6296_v34 = vadd.f32 %v6294_v38, %v6288_v5  ;;  %v6289_v13 = vadd.f32 %v6285_v59, %v6163_v37 }
 0x9cd   : > { %v6297_v39 = vadd.f32 %v6294_v38, %v6289_v13  ;;  %v6300_v4 = vmul.f32 0.1, %v6296_v34  ;;  %vm6298_vm6 = vcmp.ge.f32.partialorder %v6296_v34, 0.0 }
 0x9cf   : > { %vm6299_vm4 = vcmp.ge.f32.partialorder %v6297_v39, 0.0  ;;  %v6301_v25 = vmul.f32 0.1, %v6297_v39  ;;  %v6302_v60 = vsel %vm6298_vm6, %v6296_v34, %v6300_v4 }
 0x9d1   : > { %v6303_v28 = vsel %vm6299_vm4, %v6297_v39, %v6301_v25 }
 0x9d2   : > { %6348 = vmatprep.subr.mxu1 %v6303_v28 }
 0x9d3   : > { %6349 = vmatpush1.msra.mxu1 %v6302_v60 }
 0x9d4   : > { %6350 = vmatprep.subr.mxu1 %v8538_v3 }
 0x9d5   : > { %6351 = vmatpush1.msra.mxu1 %v8532_v29 }
 0x9d6   : > { %6352 = vmatprep.subr.mxu1 %v8110_v63 }
 0x9d7   : > { %6353 = vmatpush1.msra.mxu1 %v8895_v12  ;;  %v6397_v12 = vld [vmem:[%s8800_s5 + $0x8] sm:$0xff] }
 0x9d8   : > { %6354 = vmatprep.subr.mxu1 %v8896_v61 }
 0x9d9   : > { %6355 = vmatpush1.msra.mxu1 %v7897_v35 }
 0x9da   : > { %6732 = vmatmul.mubr.msk.f32.vlgmr.msra.gmra.mxu1 %vm3316_vm13, %v6314_v19 }
 0xa9a   : > { %v6390_v33 = vpop.f32.mrf.mxu1 }
 0xa9b   : > { %v6391_v56 = vadd.f32 %v6390_v33, %v6319_v15 }
 0xa9c   : > { %v6392_v3 = vpop.f32.mrf.mxu1 }
 0xa9d   : > { %v6393_v23 = vadd.f32 %v6392_v3, %v6319_v15  ;;  %v6395_v63 = vadd.f32 %v6391_v56, %v7897_v35 }
 0xa9f   : > { %v6396_v29 = vadd.f32 %v6393_v23, %v8896_v61 }
 0xaa1   : > { %6431 = vmatprep.subr.mxu0 %v6396_v29 }
 0xaa2   : > { %6432 = vmatpush1.msra.mxu0 %v6395_v63 }
 0xaa3   : > { %6733 = vmatmul.mubr.msk.f32.vlgmr.msra.gmra.mxu0 %vm364_vm5, %v6397_v12  ;;  %6505 = vmatprep.subr.mxu0 %v8896_v61 }
 0xaa4   : > { %6506 = vmatpush1.msra.mxu0 %v7897_v35  ;;  %6539 = vmatprep.mubr.f32.mxu0 %v8861_v58 }
 0xaa7   : > { %6734 = vmatmul.mubr.msk.f32.vlgmr.msra.gmra.mxu0 %vm364_vm5, %v3393_v7 }
 0xb63   : > { %v6467_v46 = vpop.f32.mrf.mxu0 }
 0xb65   : > { %v6469_v57 = vpop.f32.mrf.mxu0 }
 0xb67   : > { %v6541_v44 = vpop.f32.mrf.mxu0 }
 0xb68   : > { %v6542_v48 = vadd.f32 %v6541_v44, %v6467_v46 }
 0xb69   : > { %v6543_v61 = vpop.f32.mrf.mxu0 }
 0xb6a   : > { %v6552_v35 = vadd.f32 %v6550_v41, %v6542_v48  ;;  %v6544_v49 = vadd.f32 %v6543_v61, %v6469_v57 }
 0xb6c   : > { %6554 = vst [vmem:[%s278_s19] sm:$0xff] %v6552_v35  ;;  %v6553_v58 = vadd.f32 %v6550_v41, %v6544_v49 }
 0xb6e   : > { %6555 = vst [vmem:[%s278_s19 + $0x8] sm:$0xff] %v6553_v58 }
 0xb6f PF: > { %s17_s24 = sadd.s32 1, %s6837_s24  }
 0xb70   : > { %p14_p4 = scmp.ge.s32.totalorder %s17_s24, 4  }
 0xb72   :  { %16 = sbr.rel (!%p14_p4) target bundleno = 1 (0x1), region = 131 }

</bundles_post_ra>
